<compile_context>
chip_gen: v7x
topology: tpu7x:2x2x1
jax: 0.10.0
libtpu: 0.0.40
codegen_flags: <defaults>
</compile_context>

<pallas_src>
import jax
import jax.numpy as jnp
from jax.experimental import pallas as pl
from jax.experimental.pallas import tpu as pltpu

IMG_SIZE = 64
IN_DIM = IMG_SIZE * IMG_SIZE  # 4096
H1, H2, H3, OUT = 256, 128, 32, 1
TB_ALIGN = 128  # lane width: keeps x sublanes aligned and the (1, tb) output fully lane-dense


def _round_up(n, m):
    return ((n + m - 1) // m) * m


def _tile_config():
    """(max_tb, vmem_limit_bytes) per TPU generation.

    Working set per row at tile tb (f32 x double-buffered + in-kernel bf16
    copy + resident bf16 w1 + activations) is ~45 KiB/row:
      tb=512  -> ~26 MiB,   tb=1024 -> ~47 MiB.
    v5e/v6e have 128 MiB physical VMEM -> tb=1024 under an explicit 64 MiB limit.
    v7x has only 64 MiB/TC -> stay at tb=512 with a 40 MiB limit (also keeps
    >=2 grid steps at realistic batch sizes so both TensorCores get tiles).
    Unknown generations fall back to the conservative setting.
    """
    try:
        kind = jax.devices()[0].device_kind.lower()
    except Exception:
        kind = ""
    if "v5" in kind or "v6" in kind:
        return 1024, 64 << 20
    return 512, 40 << 20


def mlp_kernel(x_ref, w1_ref, b1_ref, w2_ref, b2_ref,
               w3_ref, b3_ref, w4t_ref, b4_ref, o_ref):
    # fc1 + relu: x streamed f32, cast to bf16 on the VPU right before the MXU
    # (f32 accumulation via preferred_element_type).
    x = x_ref[...].astype(jnp.bfloat16)
    h = jnp.dot(x, w1_ref[...], preferred_element_type=jnp.float32) + b1_ref[...]
    h = jnp.maximum(h, 0.0)

    # dropout(p=0.5): identity in eval/inference mode.
    # TODO(synk): training-mode dropout (prng mask + 1/(1-p) scale) not implemented.

    # fc2 + relu (bf16 operands, f32 accumulation)
    h = jnp.dot(h.astype(jnp.bfloat16), w2_ref[...],
                preferred_element_type=jnp.float32) + b2_ref[...]
    h = jnp.maximum(h, 0.0)

    # fc3 + relu (bf16 operands, f32 accumulation)
    h = jnp.dot(h.astype(jnp.bfloat16), w3_ref[...],
                preferred_element_type=jnp.float32) + b3_ref[...]
    h = jnp.maximum(h, 0.0)

    # fc4 + sigmoid: N=1 head -> VPU multiply + cross-lane reduce (keeps the
    # 1-lane-wide matmul off the MXU). Emit the tile result lane-dense (1, tb).
    z = jnp.sum(h * w4t_ref[...], axis=-1, keepdims=True) + b4_ref[...]  # (tb, 1)
    s = 1.0 / (1.0 + jnp.exp(-z))
    o_ref[...] = s.T  # (1, tb) lane-dense store; XLU has plenty of slack


def model2_forward(x_nchw, params):
    """x_nchw: (B, 1, 64, 64) float32  ->  (B, 1) float32."""
    B = x_nchw.shape[0]
    x_flat = x_nchw.reshape(B, IN_DIM).astype(jnp.float32)

    (w1, b1), (w2, b2), (w3, b3), (w4, b4) = params

    # Weight-side casts are one-off / constant-foldable; activation-side casts
    # happen inside the kernel so x is read from HBM exactly once, in f32.
    w1_bf16 = w1.astype(jnp.bfloat16)
    w2_bf16 = w2.astype(jnp.bfloat16)
    w3_bf16 = w3.astype(jnp.bfloat16)
    w4t = w4.reshape(1, H3).astype(jnp.float32)   # row form for the VPU reduction
    b1 = b1.reshape(1, H1).astype(jnp.float32)
    b2 = b2.reshape(1, H2).astype(jnp.float32)
    b3 = b3.reshape(1, H3).astype(jnp.float32)
    b4 = b4.reshape(1, OUT).astype(jnp.float32)

    max_tb, vmem_limit = _tile_config()

    # Tile from cdiv(B, n_tiles): avoids padding B up by a whole extra tile
    # when B is just above a multiple of max_tb (was up to ~2x wasted work).
    n_tiles = max(1, pl.cdiv(B, max_tb))
    tb = _round_up(pl.cdiv(B, n_tiles), TB_ALIGN)
    b_pad = n_tiles * tb
    if b_pad != B:
        x_flat = jnp.pad(x_flat, ((0, b_pad - B), (0, 0)))

    resident = lambda i: (0, 0)  # same block every step -> stays in VMEM
    # TODO(synk): single-buffer the resident weights (pipeline_mode=pl.Buffered(1))
    # to reclaim w1's second 2 MiB buffer; the chosen tiles fit the VMEM budget
    # comfortably without it, so it is left out to keep lowering risk minimal.

    flops_per_row = 2 * (IN_DIM * H1 + H1 * H2 + H2 * H3 + H3 * OUT)
    weight_bytes = (IN_DIM * H1 * 2 + H1 * H2 * 2 + H2 * H3 * 2
                    + (H1 + H2 + H3 + OUT + H3) * 4)
    cost = pl.CostEstimate(
        flops=b_pad * flops_per_row,
        transcendentals=b_pad,
        bytes_accessed=b_pad * IN_DIM * 4 + weight_bytes + b_pad * 4,
    )

    out = pl.pallas_call(
        mlp_kernel,
        out_shape=jax.ShapeDtypeStruct((n_tiles, tb), jnp.float32),
        grid=(n_tiles,),
        in_specs=[
            pl.BlockSpec((tb, IN_DIM), lambda i: (i, 0)),   # streamed x tile (f32)
            pl.BlockSpec((IN_DIM, H1), resident),           # w1 (bf16, resident)
            pl.BlockSpec((1, H1), resident),                # b1
            pl.BlockSpec((H1, H2), resident),               # w2 (bf16)
            pl.BlockSpec((1, H2), resident),                # b2
            pl.BlockSpec((H2, H3), resident),               # w3 (bf16)
            pl.BlockSpec((1, H3), resident),                # b3
            pl.BlockSpec((1, H3), resident),                # w4 (row form)
            pl.BlockSpec((1, OUT), resident),               # b4
        ],
        out_specs=pl.BlockSpec((1, tb), lambda i: (i, 0)),  # lane-dense per-tile row
        compiler_params=pltpu.CompilerParams(
            dimension_semantics=("parallel",),
            vmem_limit_bytes=vmem_limit),
        cost_estimate=cost,
    )(x_flat, w1_bf16, b1, w2_bf16, b2, w3_bf16, b3, w4t, b4)

    # (n_tiles, tb) row-major == batch order; drop pad rows, restore (B, 1).
    return out.reshape(b_pad, 1)[:B]


def init_params(key):
    """Deterministic init mirroring nn.Linear shapes (stored as (in, out))."""
    def linear(k, fan_in, fan_out):
        kw, kb = jax.random.split(k)
        bound = 1.0 / jnp.sqrt(fan_in)
        w = jax.random.uniform(kw, (fan_in, fan_out), jnp.float32, -bound, bound)
        b = jax.random.uniform(kb, (1, fan_out), jnp.float32, -bound, bound)
        return w, b

    k1, k2, k3, k4 = jax.random.split(key, 4)
    return (
        linear(k1, IN_DIM, H1),
        linear(k2, H1, H2),
        linear(k3, H2, H3),
        linear(k4, H3, OUT),
    )


if __name__ == "__main__":
    key = jax.random.PRNGKey(0)
    kx, kp = jax.random.split(key)

    B = 2
    x = jax.random.normal(kx, (B, 1, IMG_SIZE, IMG_SIZE), jnp.float32)
    params = init_params(kp)

    out = model2_forward(x, params)
    jax.block_until_ready(out)

    assert out.shape == (B, OUT), out.shape
    assert bool(jnp.all((out >= 0.0) & (out <= 1.0)))
    assert bool(jnp.all(jnp.isfinite(out)))
    print("KERNEL_OK")
</pallas_src>

<mosaic_0001>
module attributes {stable_mosaic.version = 11 : i64} {
  func.func @mlp_kernel(%arg0: i32, %arg1: memref<128x4096xf32, #tpu.memory_space<vmem>>, %arg2: memref<4096x256xbf16, #tpu.memory_space<vmem>>, %arg3: memref<1x256xf32, #tpu.memory_space<vmem>>, %arg4: memref<256x128xbf16, #tpu.memory_space<vmem>>, %arg5: memref<1x128xf32, #tpu.memory_space<vmem>>, %arg6: memref<128x32xbf16, #tpu.memory_space<vmem>>, %arg7: memref<1x32xf32, #tpu.memory_space<vmem>>, %arg8: memref<1x32xf32, #tpu.memory_space<vmem>>, %arg9: memref<1x1xf32, #tpu.memory_space<vmem>>, %arg10: memref<1x128xf32, #tpu.memory_space<vmem>>) attributes {dimension_semantics = [#tpu.dimension_semantics<parallel>], iteration_bounds = array<i64: 1>, scalar_prefetch = 0 : i64, scratch_operands = 0 : i64, tpu.core_type = #tpu.core_type<tc>, window_params = [{transform_indices = @transform_0, window_bounds = array<i64: 128, 4096>}, {pipeline_mode = #tpu.pipeline_mode<synchronous>, transform_indices = @transform_1, window_bounds = array<i64: 4096, 256>}, {pipeline_mode = #tpu.pipeline_mode<synchronous>, transform_indices = @transform_2, window_bounds = array<i64: 1, 256>}, {pipeline_mode = #tpu.pipeline_mode<synchronous>, transform_indices = @transform_3, window_bounds = array<i64: 256, 128>}, {pipeline_mode = #tpu.pipeline_mode<synchronous>, transform_indices = @transform_4, window_bounds = array<i64: 1, 128>}, {pipeline_mode = #tpu.pipeline_mode<synchronous>, transform_indices = @transform_5, window_bounds = array<i64: 128, 32>}, {pipeline_mode = #tpu.pipeline_mode<synchronous>, transform_indices = @transform_6, window_bounds = array<i64: 1, 32>}, {pipeline_mode = #tpu.pipeline_mode<synchronous>, transform_indices = @transform_7, window_bounds = array<i64: 1, 32>}, {pipeline_mode = #tpu.pipeline_mode<synchronous>, transform_indices = @transform_8, window_bounds = array<i64: 1, 1>}, {transform_indices = @transform_9, window_bounds = array<i64: 1, 128>}]} {
    %c0 = arith.constant 0 : index
    %c0_0 = arith.constant 0 : index
    %0 = vector.load %arg1[%c0, %c0_0] : memref<128x4096xf32, #tpu.memory_space<vmem>>, vector<128x4096xf32>
    %1 = arith.truncf %0 : vector<128x4096xf32> to vector<128x4096xbf16>
    %c0_1 = arith.constant 0 : index
    %c0_2 = arith.constant 0 : index
    %2 = vector.load %arg2[%c0_1, %c0_2] : memref<4096x256xbf16, #tpu.memory_space<vmem>>, vector<4096x256xbf16>
    %cst = arith.constant dense<0.000000e+00> : vector<128x256xf32>
    %3 = tpu.matmul %1, %2, %cst {dimension_numbers = #tpu.dot_dimension_numbers<[1], [0], [0], [1], [0, 0, 1, 1], [], []>} : vector<128x4096xbf16>, vector<4096x256xbf16>, vector<128x256xf32> -> vector<128x256xf32>
    %c0_3 = arith.constant 0 : index
    %c0_4 = arith.constant 0 : index
    %4 = vector.load %arg3[%c0_3, %c0_4] : memref<1x256xf32, #tpu.memory_space<vmem>>, vector<1x256xf32>
    %5 = vector.broadcast %4 : vector<1x256xf32> to vector<128x256xf32>
    %6 = arith.addf %3, %5 : vector<128x256xf32>
    %cst_5 = arith.constant 0.000000e+00 : f32
    %7 = vector.broadcast %cst_5 : f32 to vector<128x256xf32>
    %8 = arith.maximumf %6, %7 : vector<128x256xf32>
    %9 = arith.truncf %8 : vector<128x256xf32> to vector<128x256xbf16>
    %c0_6 = arith.constant 0 : index
    %c0_7 = arith.constant 0 : index
    %10 = vector.load %arg4[%c0_6, %c0_7] : memref<256x128xbf16, #tpu.memory_space<vmem>>, vector<256x128xbf16>
    %cst_8 = arith.constant dense<0.000000e+00> : vector<128x128xf32>
    %11 = tpu.matmul %9, %10, %cst_8 {dimension_numbers = #tpu.dot_dimension_numbers<[1], [0], [0], [1], [0, 0, 1, 1], [], []>} : vector<128x256xbf16>, vector<256x128xbf16>, vector<128x128xf32> -> vector<128x128xf32>
    %c0_9 = arith.constant 0 : index
    %c0_10 = arith.constant 0 : index
    %12 = vector.load %arg5[%c0_9, %c0_10] : memref<1x128xf32, #tpu.memory_space<vmem>>, vector<1x128xf32>
    %13 = vector.broadcast %12 : vector<1x128xf32> to vector<128x128xf32>
    %14 = arith.addf %11, %13 : vector<128x128xf32>
    %cst_11 = arith.constant 0.000000e+00 : f32
    %15 = vector.broadcast %cst_11 : f32 to vector<128x128xf32>
    %16 = arith.maximumf %14, %15 : vector<128x128xf32>
    %17 = arith.truncf %16 : vector<128x128xf32> to vector<128x128xbf16>
    %c0_12 = arith.constant 0 : index
    %c0_13 = arith.constant 0 : index
    %18 = vector.load %arg6[%c0_12, %c0_13] : memref<128x32xbf16, #tpu.memory_space<vmem>>, vector<128x32xbf16>
    %cst_14 = arith.constant dense<0.000000e+00> : vector<128x32xf32>
    %19 = tpu.matmul %17, %18, %cst_14 {dimension_numbers = #tpu.dot_dimension_numbers<[1], [0], [0], [1], [0, 0, 1, 1], [], []>} : vector<128x128xbf16>, vector<128x32xbf16>, vector<128x32xf32> -> vector<128x32xf32>
    %c0_15 = arith.constant 0 : index
    %c0_16 = arith.constant 0 : index
    %20 = vector.load %arg7[%c0_15, %c0_16] : memref<1x32xf32, #tpu.memory_space<vmem>>, vector<1x32xf32>
    %21 = vector.broadcast %20 : vector<1x32xf32> to vector<128x32xf32>
    %22 = arith.addf %19, %21 : vector<128x32xf32>
    %cst_17 = arith.constant 0.000000e+00 : f32
    %23 = vector.broadcast %cst_17 : f32 to vector<128x32xf32>
    %24 = arith.maximumf %22, %23 : vector<128x32xf32>
    %c0_18 = arith.constant 0 : index
    %c0_19 = arith.constant 0 : index
    %25 = vector.load %arg8[%c0_18, %c0_19] : memref<1x32xf32, #tpu.memory_space<vmem>>, vector<1x32xf32>
    %26 = vector.broadcast %25 : vector<1x32xf32> to vector<128x32xf32>
    %27 = arith.mulf %24, %26 : vector<128x32xf32>
    %cst_20 = arith.constant dense<0.000000e+00> : vector<128xf32>
    %28 = vector.multi_reduction <add>, %27, %cst_20 [1] : vector<128x32xf32> to vector<128xf32>
    %29 = vector.shape_cast %28 : vector<128xf32> to vector<128x1xf32>
    %c0_21 = arith.constant 0 : index
    %c0_22 = arith.constant 0 : index
    %30 = vector.load %arg9[%c0_21, %c0_22] : memref<1x1xf32, #tpu.memory_space<vmem>>, vector<1x1xf32>
    %31 = vector.broadcast %30 : vector<1x1xf32> to vector<128x1xf32>
    %32 = arith.addf %29, %31 : vector<128x1xf32>
    %cst_23 = arith.constant 0.000000e+00 : f32
    %33 = vector.broadcast %cst_23 : f32 to vector<128x1xf32>
    %34 = arith.subf %33, %32 : vector<128x1xf32>
    %35 = math.exp %34 : vector<128x1xf32>
    %cst_24 = arith.constant 1.000000e+00 : f32
    %36 = vector.broadcast %cst_24 : f32 to vector<128x1xf32>
    %37 = arith.addf %36, %35 : vector<128x1xf32>
    %cst_25 = arith.constant 1.000000e+00 : f32
    %38 = vector.broadcast %cst_25 : f32 to vector<128x1xf32>
    %39 = arith.divf %38, %37 : vector<128x1xf32>
    %40 = tpu.transpose %39, [1, 0] : vector<128x1xf32> -> vector<1x128xf32>
    %c0_26 = arith.constant 0 : index
    %c0_27 = arith.constant 0 : index
    %41 = vector.load %arg10[%c0_26, %c0_27] : memref<1x128xf32, #tpu.memory_space<vmem>>, vector<1x128xf32>
    tpu.vector_store %arg10[%c0_26, %c0_27], %40 {strides = array<i32>} : memref<1x128xf32, #tpu.memory_space<vmem>>, vector<1x128xf32>,
    return
  }
  func.func @transform_0(%arg0: i32) -> (i32, i32) {
    %c0_i32 = arith.constant 0 : i32
    %c0_i32_0 = arith.constant 0 : i32
    return %arg0, %c0_i32 : i32, i32
  }
  func.func @transform_1(%arg0: i32) -> (i32, i32) {
    %c0_i32 = arith.constant 0 : i32
    %c0_i32_0 = arith.constant 0 : i32
    %c0_i32_1 = arith.constant 0 : i32
    return %c0_i32, %c0_i32_0 : i32, i32
  }
  func.func @transform_2(%arg0: i32) -> (i32, i32) {
    %c0_i32 = arith.constant 0 : i32
    %c0_i32_0 = arith.constant 0 : i32
    %c0_i32_1 = arith.constant 0 : i32
    return %c0_i32, %c0_i32_0 : i32, i32
  }
  func.func @transform_3(%arg0: i32) -> (i32, i32) {
    %c0_i32 = arith.constant 0 : i32
    %c0_i32_0 = arith.constant 0 : i32
    %c0_i32_1 = arith.constant 0 : i32
    return %c0_i32, %c0_i32_0 : i32, i32
  }
  func.func @transform_4(%arg0: i32) -> (i32, i32) {
    %c0_i32 = arith.constant 0 : i32
    %c0_i32_0 = arith.constant 0 : i32
    %c0_i32_1 = arith.constant 0 : i32
    return %c0_i32, %c0_i32_0 : i32, i32
  }
  func.func @transform_5(%arg0: i32) -> (i32, i32) {
    %c0_i32 = arith.constant 0 : i32
    %c0_i32_0 = arith.constant 0 : i32
    %c0_i32_1 = arith.constant 0 : i32
    return %c0_i32, %c0_i32_0 : i32, i32
  }
  func.func @transform_6(%arg0: i32) -> (i32, i32) {
    %c0_i32 = arith.constant 0 : i32
    %c0_i32_0 = arith.constant 0 : i32
    %c0_i32_1 = arith.constant 0 : i32
    return %c0_i32, %c0_i32_0 : i32, i32
  }
  func.func @transform_7(%arg0: i32) -> (i32, i32) {
    %c0_i32 = arith.constant 0 : i32
    %c0_i32_0 = arith.constant 0 : i32
    %c0_i32_1 = arith.constant 0 : i32
    return %c0_i32, %c0_i32_0 : i32, i32
  }
  func.func @transform_8(%arg0: i32) -> (i32, i32) {
    %c0_i32 = arith.constant 0 : i32
    %c0_i32_0 = arith.constant 0 : i32
    %c0_i32_1 = arith.constant 0 : i32
    return %c0_i32, %c0_i32_0 : i32, i32
  }
  func.func @transform_9(%arg0: i32) -> (i32, i32) {
    %c0_i32 = arith.constant 0 : i32
    %c0_i32_0 = arith.constant 0 : i32
    return %arg0, %c0_i32 : i32, i32
  }
}

</mosaic_0001>

<bundles_post_ra>
// kernel: tpu_custom_call.1
= control target key start
LH: loop header
LB: loop body
LE: loop exit
PB: predicated region body
PF: predicated region fallthrough
CT: control target
= control target key end

     0   :  { %s9123_s0 = inlined_call_operand.hbm [shape: f32[128,4096], index: 0, kind: input, shape index: {}]   ;;  %s9124_s1 = inlined_call_operand.hbm [shape: bf16[4096,256], index: 1, kind: input, shape index: {}]   ;;  %s9125_s2 = inlined_call_operand.hbm [shape: f32[1,256], index: 2, kind: input, shape index: {}]   ;;  %s9126_s3 = inlined_call_operand.hbm [shape: bf16[256,128], index: 3, kind: input, shape index: {}]   ;;  %s9127_s4 = inlined_call_operand.hbm [shape: f32[1,128], index: 4, kind: input, shape index: {}]   ;;  %s9128_s5 = inlined_call_operand.vmem [shape: bf16[128,32], index: 5, kind: input, shape index: {}]   ;;  %s9129_s6 = inlined_call_operand.hbm [shape: f32[1,32], index: 6, kind: input, shape index: {}]   ;;  %s9130_s7 = inlined_call_operand.hbm [shape: f32[1,32], index: 7, kind: input, shape index: {}]   ;;  %s9131_s8 = inlined_call_operand.<no memory space> [shape: f32[1,1], index: 8, kind: input, shape index: {}]   ;;  %s9132_s9 = inlined_call_operand.hbm [shape: f32[1,128], index: 9, kind: output, shape index: {}]  }
   0x1   :  { %v14_v0 = vstv %s9131_s8 }
   0x2   :  { %15 = vst [vmem:[#allocation2] sm:$0x1] %v14_v0 }
   0x3   :  { %16 = vsyncpa [#allocation4], 0 }
   0x4   :  { %17 = vsyncpa [#allocation7], 0 }
   0x5   :  { %18 = vsyncpa [#allocation10], 0 }
   0x6   :  { %19 = vsyncpa [#allocation13], 0 }
   0x7   :  { %20 = vsyncpa [#allocation5], 0  ;;  %s8733_s11 = smov [#allocation6]   ;;  %s8547_s15 = scalar_lea.hbm %s9124_s1, 65536 }
   0x8   :  { %s38_s12 = sshll.u32 %s8733_s11, 4  ;;  %p8548_p0 = scmp.ne.s32.totalorder %s9124_s1, %s8547_s15  ;;  %s39_s12 = int_to_ptr.vmem [resolvable:$true] %s38_s12 }
   0x9   :  { %p8551_p1 = scmp.lt.u32.totalorder %s8547_s15, %s9124_s1 }
   0xb   :  { %p8553_p2 = pnand %p8551_p1, %p8548_p0 }
   0xd   :  { %8556 = shalt.err (!%p8553_p2)
}
   0xe   :  { %s8557_s8 = scalar_lea.vmem %s39_s12, 65536  ;;  %p8562_p4 = scmp.lt.s32.totalorder %s39_s12, %s39_s12 }
   0xf   :  { %p8558_p3 = scmp.ne.s32.totalorder %s39_s12, %s8557_s8  ;;  %p8563_p5 = scmp.lt.s32.totalorder %s8557_s8, %s8557_s8 }
  0x11   :  { %p8564_p6 = por %p8563_p5, %p8562_p4 }
  0x13   :  { %p8565_p7 = pnand %p8564_p6, %p8558_p3 }
  0x15   :  { %8568 = shalt.err (!%p8565_p7)
}
  0x16   :  { %s8734_s20 = smov 128   ;;  %s8735_s21 = smov 8  }
  0x17   :  { %44 = dma.hbm_to_vmem [thread:$0]  %s9124_s1, 65536, %s39_s12, [#allocation7], %s8734_s20, %s8734_s20, %s8735_s21  }
  0x18   :  { %s8736_s24 = smov [#allocation9]   ;;  %s8569_s28 = scalar_lea.hbm %s9126_s3, 2048 }
  0x19   :  { %s60_s25 = sshll.u32 %s8736_s24, 4  ;;  %p8570_p8 = scmp.ne.s32.totalorder %s9126_s3, %s8569_s28  ;;  %s61_s25 = int_to_ptr.vmem [resolvable:$true] %s60_s25 }
  0x1a   :  { %p8573_p9 = scmp.lt.u32.totalorder %s8569_s28, %s9126_s3 }
  0x1c   :  { %p8575_p10 = pnand %p8573_p9, %p8570_p8 }
  0x1e   :  { %8578 = shalt.err (!%p8575_p10)
}
  0x1f   :  { %s8579_s13 = scalar_lea.vmem %s61_s25, 2048  ;;  %p8584_p12 = scmp.lt.s32.totalorder %s61_s25, %s61_s25 }
  0x20   :  { %p8580_p11 = scmp.ne.s32.totalorder %s61_s25, %s8579_s13  ;;  %p8585_p13 = scmp.lt.s32.totalorder %s8579_s13, %s8579_s13 }
  0x22   :  { %p8586_p0 = por %p8585_p13, %p8584_p12 }
  0x24   :  { %p8587_p1 = pnand %p8586_p0, %p8580_p11 }
  0x26   :  { %8590 = shalt.err (!%p8587_p1)
}
  0x27   :  { %s8737_s1 = smov 64   ;;  %s8738_s12 = smov 4  }
  0x28   :  { %66 = dma.hbm_to_vmem [thread:$0]  %s9126_s3, 2048, %s61_s25, [#allocation10], %s8737_s1, %s8737_s1, %s8738_s12  }
  0x29   :  { %s8739_s16 = smov [#allocation12]   ;;  %s8740_s18 = smov [#allocation3]  }
  0x2a   :  { %s85_s17 = sshll.u32 %s8739_s16, 4  ;;  %s26_s19 = sshll.u32 %s8740_s18, 4  ;;  %s86_s17 = int_to_ptr.vmem [resolvable:$true] %s85_s17  ;;  %s8824_s19 = int_to_ptr.vmem [resolvable:$true] %s26_s19 }
  0x2b   :  { %s8591_s21 = scalar_lea.hbm %s9129_s6, 16 }
  0x2c   :  { %p8592_p2 = scmp.ne.s32.totalorder %s9129_s6, %s8591_s21  ;;  %p8595_p3 = scmp.lt.u32.totalorder %s8591_s21, %s9129_s6 }
  0x2e   :  { %p8597_p4 = pnand %p8595_p3, %p8592_p2 }
  0x30   :  { %8600 = shalt.err (!%p8597_p4)
}
  0x31   :  { %s8601_s3 = scalar_lea.vmem %s86_s17, 16  ;;  %s8605_s25 = scalar_lea.vmem %s86_s17, 32 }
  0x32   :  { %p8602_p5 = scmp.ne.s32.totalorder %s86_s17, %s8601_s3  ;;  %p8606_p6 = scmp.lt.s32.totalorder %s86_s17, %s86_s17 }
  0x33   :  { %p8607_p7 = scmp.lt.s32.totalorder %s8605_s25, %s8601_s3 }
  0x35   :  { %p8608_p8 = por %p8607_p7, %p8606_p6 }
  0x37   :  { %p8609_p9 = pnand %p8608_p8, %p8602_p5 }
  0x39   :  { %8612 = shalt.err (!%p8609_p9)
}
  0x3a   :  { %88 = dma.hbm_to_vmem [thread:$0]  %s9129_s6, 16, %s86_s17, [#allocation13]  }
  0x3b   :  { %s8613_s10 = scalar_lea.hbm %s9123_s0, 65536 }
  0x3c   :  { %p8614_p10 = scmp.ne.s32.totalorder %s9123_s0, %s8613_s10  ;;  %p8617_p11 = scmp.lt.u32.totalorder %s8613_s10, %s9123_s0 }
  0x3e   :  { %p8619_p12 = pnand %p8617_p11, %p8614_p10 }
  0x40   :  { %8622 = shalt.err (!%p8619_p12)
}
  0x41   :  { %s8623_s14 = scalar_lea.vmem %s8824_s19, 65536  ;;  %p8628_p0 = scmp.lt.s32.totalorder %s8824_s19, %s8824_s19 }
  0x42   :  { %p8624_p13 = scmp.ne.s32.totalorder %s8824_s19, %s8623_s14  ;;  %p8629_p1 = scmp.lt.s32.totalorder %s8623_s14, %s8623_s14 }
  0x44   :  { %p8630_p2 = por %p8629_p1, %p8628_p0 }
  0x46   :  { %p8631_p3 = pnand %p8630_p2, %p8624_p13 }
  0x48   :  { %8634 = shalt.err (!%p8631_p3)
}
  0x49   :  { %s8741_s6 = smov 4096   ;;  %s8742_s15 = smov 256  }
  0x4a   :  { %32 = dma.hbm_to_vmem [thread:$0]  %s9123_s0, 65536, %s8824_s19, [#allocation4], %s8741_s6, %s8741_s6, %s8742_s15  }
  0x4b   :  { %s8743_s18 = smov [#allocation8]   ;;  %s8744_s20 = smov [#allocation11]  }
  0x4c   :  { %s51_s8 = sshll.u32 %s8743_s18, 4  ;;  %s73_s21 = sshll.u32 %s8744_s20, 4  ;;  %s52_s8 = int_to_ptr.vmem [resolvable:$true] %s51_s8  ;;  %s74_s21 = int_to_ptr.vmem [resolvable:$true] %s73_s21 }
  0x4d   :  { %s8635_s24 = scalar_lea.hbm %s9125_s2, 32 }
  0x4e   :  { %p8636_p4 = scmp.ne.s32.totalorder %s9125_s2, %s8635_s24  ;;  %p8639_p5 = scmp.lt.u32.totalorder %s8635_s24, %s9125_s2 }
  0x50   :  { %p8641_p6 = pnand %p8639_p5, %p8636_p4 }
  0x52   :  { %8644 = shalt.err (!%p8641_p6)
}
  0x53   :  { %s8645_s0 = scalar_lea.vmem %s52_s8, 32  ;;  %p8650_p8 = scmp.lt.s32.totalorder %s52_s8, %s52_s8 }
  0x54   :  { %p8646_p7 = scmp.ne.s32.totalorder %s52_s8, %s8645_s0  ;;  %p8651_p9 = scmp.lt.s32.totalorder %s8645_s0, %s8645_s0 }
  0x56   :  { %p8652_p10 = por %p8651_p9, %p8650_p8 }
  0x58   :  { %p8653_p11 = pnand %p8652_p10, %p8646_p7 }
  0x5a   :  { %8656 = shalt.err (!%p8653_p11)
}
  0x5b   :  { %54 = dma.hbm_to_vmem [thread:$0]  %s9125_s2, 32, %s52_s8, [#allocation7]  }
  0x5c   :  { %s8657_s10 = scalar_lea.hbm %s9127_s4, 16 }
  0x5d   :  { %p8658_p12 = scmp.ne.s32.totalorder %s9127_s4, %s8657_s10  ;;  %p8661_p13 = scmp.lt.u32.totalorder %s8657_s10, %s9127_s4 }
  0x5f   :  { %p8663_p0 = pnand %p8661_p13, %p8658_p12 }
  0x61   :  { %8666 = shalt.err (!%p8663_p0)
}
  0x62   :  { %s8667_s14 = scalar_lea.vmem %s74_s21, 16  ;;  %s8671_s6 = scalar_lea.vmem %s74_s21, 32 }
  0x63   :  { %p8668_p1 = scmp.ne.s32.totalorder %s74_s21, %s8667_s14  ;;  %p8672_p2 = scmp.lt.s32.totalorder %s74_s21, %s74_s21 }
  0x64   :  { %p8673_p3 = scmp.lt.s32.totalorder %s8671_s6, %s8667_s14 }
  0x66   :  { %p8674_p4 = por %p8673_p3, %p8672_p2 }
  0x68   :  { %p8675_p5 = pnand %p8674_p4, %p8668_p1 }
  0x6a   :  { %8678 = shalt.err (!%p8675_p5)
}
  0x6b   :  { %76 = dma.hbm_to_vmem [thread:$0]  %s9127_s4, 16, %s74_s21, [#allocation10]  }
  0x6c   :  { %s8745_s16 = smov [#allocation14]   ;;  %s8679_s20 = scalar_lea.hbm %s9130_s7, 16 }
  0x6d   :  { %s95_s17 = sshll.u32 %s8745_s16, 4  ;;  %p8680_p6 = scmp.ne.s32.totalorder %s9130_s7, %s8679_s20  ;;  %s96_s17 = int_to_ptr.vmem [resolvable:$true] %s95_s17 }
  0x6e   :  { %p8683_p7 = scmp.lt.u32.totalorder %s8679_s20, %s9130_s7 }
  0x70   :  { %p8685_p8 = pnand %p8683_p7, %p8680_p6 }
  0x72   :  { %8688 = shalt.err (!%p8685_p8)
}
  0x73   :  { %s8689_s3 = scalar_lea.vmem %s96_s17, 16  ;;  %s8693_s4 = scalar_lea.vmem %s96_s17, 32 }
  0x74   :  { %p8690_p9 = scmp.ne.s32.totalorder %s96_s17, %s8689_s3  ;;  %p8694_p10 = scmp.lt.s32.totalorder %s96_s17, %s96_s17 }
  0x75   :  { %p8695_p11 = scmp.lt.s32.totalorder %s8693_s4, %s8689_s3 }
  0x77   :  { %p8696_p12 = por %p8695_p11, %p8694_p10 }
  0x79   :  { %p8697_p13 = pnand %p8696_p12, %p8690_p9 }
  0x7b   :  { %8700 = shalt.err (!%p8697_p13)
}
  0x7c   :  { %98 = dma.hbm_to_vmem [thread:$0]  %s9130_s7, 16, %s96_s17, [#allocation13]  }
  0x7d   :  { %8723 = dma.done.wait [#allocation4], 65536  }
  0x7e   :  { %8724 = vsyncadd [#allocation4], 4294901760 }
  0x7f   :  { %8725 = dma.done.wait [#allocation7], 65568  }
  0x80   :  { %8726 = vsyncadd [#allocation7], 4294901728 }
  0x81   :  { %8727 = dma.done.wait [#allocation10], 2064  }
  0x82   :  { %8728 = vsyncadd [#allocation10], 4294965232 }
  0x83   :  { %8729 = dma.done.wait [#allocation13], 32  }
  0x84   :  { %8730 = vsyncadd [#allocation13], 4294967264  ;;  %v7691_v1 = vld [vmem:[#allocation6 + $0x4] ss:$8 sps:$4 sm:$0xff]   ;;  %v7695_v3 = vld [vmem:[#allocation6] ss:$8 sps:$4 sm:$0xff]  }
  0x85   :  { %v7693_v2 = vld [vmem:[#allocation6 + $0x704] ss:$8 sps:$4 sm:$0xff]   ;;  %3975 = vmatprep.subr.bf16.mxu1 %v7691_v1  ;;  %v7696_v4 = vld [vmem:[#allocation6 + $0x700] ss:$8 sps:$4 sm:$0xff]   ;;  %v7697_v5 = vld [vmem:[#allocation6 + $0x14] ss:$8 sps:$4 sm:$0xff]  }
  0x86   :  { %4766 = vmatprep.subr.bf16.mxu0 %v7693_v2  ;;  %3976 = vmatpush1.bf16.msra.mxu1 %v7695_v3  ;;  %v7699_v6 = vld [vmem:[#allocation6 + $0x714] ss:$8 sps:$4 sm:$0xff]   ;;  %v7701_v7 = vld [vmem:[#allocation6 + $0x10] ss:$8 sps:$4 sm:$0xff]   ;;  %v7703_v9 = vld [vmem:[#allocation6 + $0x24] ss:$8 sps:$4 sm:$0xff]  }
  0x87   :  { %4767 = vmatpush1.bf16.msra.mxu0 %v7696_v4  ;;  %3977 = vmatprep.subr.bf16.mxu1 %v7697_v5  ;;  %v7702_v8 = vld [vmem:[#allocation6 + $0x710] ss:$8 sps:$4 sm:$0xff]   ;;  %v7705_v10 = vld [vmem:[#allocation6 + $0x724] ss:$8 sps:$4 sm:$0xff]   ;;  %v7707_v11 = vld [vmem:[#allocation6 + $0x20] ss:$8 sps:$4 sm:$0xff]  }
  0x88   :  { %4768 = vmatprep.subr.bf16.mxu0 %v7699_v6  ;;  %v7708_v12 = vld [vmem:[#allocation6 + $0x720] ss:$8 sps:$4 sm:$0xff]   ;;  %v7709_v13 = vld [vmem:[#allocation6 + $0x34] ss:$8 sps:$4 sm:$0xff]   ;;  %v7713_v15 = vld [vmem:[#allocation6 + $0x30] ss:$8 sps:$4 sm:$0xff]  }
  0x89   :  { %v7711_v14 = vld [vmem:[#allocation6 + $0x734] ss:$8 sps:$4 sm:$0xff]   ;;  %v7714_v16 = vld [vmem:[#allocation6 + $0x730] ss:$8 sps:$4 sm:$0xff]   ;;  %v7715_v17 = vld [vmem:[#allocation6 + $0x44] ss:$8 sps:$4 sm:$0xff]  }
  0x8a   :  { %3978 = vmatpush1.bf16.msra.mxu1 %v7701_v7  ;;  %v7717_v18 = vld [vmem:[#allocation6 + $0x744] ss:$8 sps:$4 sm:$0xff]   ;;  %v7719_v19 = vld [vmem:[#allocation6 + $0x40] ss:$8 sps:$4 sm:$0xff]   ;;  %v7721_v21 = vld [vmem:[#allocation6 + $0x54] ss:$8 sps:$4 sm:$0xff]  }
  0x8b   :  { %4769 = vmatpush1.bf16.msra.mxu0 %v7702_v8  ;;  %3979 = vmatprep.subr.bf16.mxu1 %v7703_v9  ;;  %v7720_v20 = vld [vmem:[#allocation6 + $0x740] ss:$8 sps:$4 sm:$0xff]   ;;  %v7723_v22 = vld [vmem:[#allocation6 + $0x754] ss:$8 sps:$4 sm:$0xff]   ;;  %v7725_v23 = vld [vmem:[#allocation6 + $0x50] ss:$8 sps:$4 sm:$0xff]  }
  0x8c   :  { %4770 = vmatprep.subr.bf16.mxu0 %v7705_v10  ;;  %v7726_v24 = vld [vmem:[#allocation6 + $0x750] ss:$8 sps:$4 sm:$0xff]   ;;  %v7727_v25 = vld [vmem:[#allocation6 + $0x64] ss:$8 sps:$4 sm:$0xff]   ;;  %v7731_v27 = vld [vmem:[#allocation6 + $0x60] ss:$8 sps:$4 sm:$0xff]  }
  0x8d   :  { %v7729_v26 = vld [vmem:[#allocation6 + $0x764] ss:$8 sps:$4 sm:$0xff]   ;;  %v7732_v28 = vld [vmem:[#allocation6 + $0x760] ss:$8 sps:$4 sm:$0xff]   ;;  %v7733_v29 = vld [vmem:[#allocation6 + $0x74] ss:$8 sps:$4 sm:$0xff]  }
  0x8e   :  { %3980 = vmatpush1.bf16.msra.mxu1 %v7707_v11  ;;  %v7735_v30 = vld [vmem:[#allocation6 + $0x774] ss:$8 sps:$4 sm:$0xff]   ;;  %v7737_v31 = vld [vmem:[#allocation6 + $0x70] ss:$8 sps:$4 sm:$0xff]   ;;  %v7739_v33 = vld [vmem:[#allocation6 + $0x84] ss:$8 sps:$4 sm:$0xff]  }
  0x8f   :  { %4771 = vmatpush1.bf16.msra.mxu0 %v7708_v12  ;;  %3981 = vmatprep.subr.bf16.mxu1 %v7709_v13  ;;  %v7738_v32 = vld [vmem:[#allocation6 + $0x770] ss:$8 sps:$4 sm:$0xff]   ;;  %v7741_v34 = vld [vmem:[#allocation6 + $0x784] ss:$8 sps:$4 sm:$0xff]   ;;  %v7743_v35 = vld [vmem:[#allocation6 + $0x80] ss:$8 sps:$4 sm:$0xff]  }
  0x90   :  { %4772 = vmatprep.subr.bf16.mxu0 %v7711_v14  ;;  %v7744_v36 = vld [vmem:[#allocation6 + $0x780] ss:$8 sps:$4 sm:$0xff]   ;;  %v7745_v37 = vld [vmem:[#allocation6 + $0x94] ss:$8 sps:$4 sm:$0xff]   ;;  %v7749_v39 = vld [vmem:[#allocation6 + $0x90] ss:$8 sps:$4 sm:$0xff]  }
  0x91   :  { %v7747_v38 = vld [vmem:[#allocation6 + $0x794] ss:$8 sps:$4 sm:$0xff]   ;;  %v7750_v40 = vld [vmem:[#allocation6 + $0x790] ss:$8 sps:$4 sm:$0xff]   ;;  %v7751_v41 = vld [vmem:[#allocation6 + $0xa4] ss:$8 sps:$4 sm:$0xff]  }
  0x92   :  { %3982 = vmatpush1.bf16.msra.mxu1 %v7713_v15  ;;  %v7753_v42 = vld [vmem:[#allocation6 + $0x7a4] ss:$8 sps:$4 sm:$0xff]   ;;  %v7755_v43 = vld [vmem:[#allocation6 + $0xa0] ss:$8 sps:$4 sm:$0xff]   ;;  %v7757_v45 = vld [vmem:[#allocation6 + $0xb4] ss:$8 sps:$4 sm:$0xff]  }
  0x93   :  { %4773 = vmatpush1.bf16.msra.mxu0 %v7714_v16  ;;  %3983 = vmatprep.subr.bf16.mxu1 %v7715_v17  ;;  %v7756_v44 = vld [vmem:[#allocation6 + $0x7a0] ss:$8 sps:$4 sm:$0xff]   ;;  %v7759_v46 = vld [vmem:[#allocation6 + $0x7b4] ss:$8 sps:$4 sm:$0xff]   ;;  %v7761_v51 = vld [vmem:[#allocation6 + $0xb0] ss:$8 sps:$4 sm:$0xff]  }
  0x94   :  { %4774 = vmatprep.subr.bf16.mxu0 %v7717_v18  ;;  %v124_v47 = vld [vmem:[#allocation3 + $0x8] sm:$0xff]  ;;  %v138_v49 = vld [vmem:[#allocation3 + $0x78] sm:$0xff]  ;;  %v123_v7 = vld [vmem:[#allocation3] sm:$0xff]  ;;  %vm6294_vm0 = vcmask 261120  }
  0x95   :  { %v156_v48 = vld [vmem:[#allocation3 + $0x108] sm:$0xff]  ;;  %v170_v50 = vld [vmem:[#allocation3 + $0x178] sm:$0xff]  ;;  %v155_v8 = vld [vmem:[#allocation3 + $0x100] sm:$0xff] }
  0x96   :  { %3984 = vmatpush1.bf16.msra.mxu1 %v7719_v19  ;;  %v7762_v52 = vld [vmem:[#allocation6 + $0x7b0] ss:$8 sps:$4 sm:$0xff]   ;;  %v636_v53 = vpack.c.bf16 %v156_v48, %v124_v47  ;;  %v650_v54 = vpack.c.bf16 %v170_v50, %v138_v49  ;;  %v7763_v55 = vld [vmem:[#allocation6 + $0xc4] ss:$8 sps:$4 sm:$0xff]   ;;  %v7767_v57 = vld [vmem:[#allocation6 + $0xc0] ss:$8 sps:$4 sm:$0xff]   ;;  %v635_v17 = vpack.c.bf16 %v155_v8, %v123_v7 }
  0x97   :  { %4775 = vmatpush1.bf16.msra.mxu0 %v7720_v20  ;;  %3985 = vmatprep.subr.bf16.mxu1 %v7721_v21  ;;  %v7765_v56 = vld [vmem:[#allocation6 + $0x7c4] ss:$8 sps:$4 sm:$0xff]   ;;  %v7768_v58 = vld [vmem:[#allocation6 + $0x7c0] ss:$8 sps:$4 sm:$0xff]   ;;  %v7769_v59 = vld [vmem:[#allocation6 + $0xd4] ss:$8 sps:$4 sm:$0xff]  }
  0x98   :  { %4776 = vmatprep.subr.bf16.mxu0 %v7723_v22  ;;  %4007 = vmatprep.mubr.bf16.mxu1 %v636_v53  ;;  %v7771_v60 = vld [vmem:[#allocation6 + $0x7d4] ss:$8 sps:$4 sm:$0xff]   ;;  %v7773_v61 = vld [vmem:[#allocation6 + $0xd0] ss:$8 sps:$4 sm:$0xff]   ;;  %v7775_v63 = vld [vmem:[#allocation6 + $0xe4] ss:$8 sps:$4 sm:$0xff]  }
  0x99   :  { %4798 = vmatprep.mubr.bf16.mxu0 %v650_v54  ;;  %v7774_v62 = vld [vmem:[#allocation6 + $0x7d0] ss:$8 sps:$4 sm:$0xff]   ;;  %v7777_v0 = vld [vmem:[#allocation6 + $0x7e4] ss:$8 sps:$4 sm:$0xff]   ;;  %v7779_v1 = vld [vmem:[#allocation6 + $0xe0] ss:$8 sps:$4 sm:$0xff]  }
  0x9a   :  { %3986 = vmatpush1.bf16.msra.mxu1 %v7725_v23  ;;  %v7780_v2 = vld [vmem:[#allocation6 + $0x7e0] ss:$8 sps:$4 sm:$0xff]   ;;  %v7781_v3 = vld [vmem:[#allocation6 + $0xf4] ss:$8 sps:$4 sm:$0xff]   ;;  %v7785_v5 = vld [vmem:[#allocation6 + $0xf0] ss:$8 sps:$4 sm:$0xff]  }
  0x9b   :  { %4777 = vmatpush1.bf16.msra.mxu0 %v7726_v24  ;;  %3987 = vmatprep.subr.bf16.mxu1 %v7727_v25  ;;  %v7783_v4 = vld [vmem:[#allocation6 + $0x7f4] ss:$8 sps:$4 sm:$0xff]   ;;  %v7786_v6 = vld [vmem:[#allocation6 + $0x7f0] ss:$8 sps:$4 sm:$0xff]   ;;  %v7789_v11 = vld [vmem:[#allocation6 + $0x104] ss:$8 sps:$4 sm:$0xff]  }
  0x9c   :  { %4778 = vmatprep.subr.bf16.mxu0 %v7729_v26  ;;  %v137_v9 = vld [vmem:[#allocation3 + $0x70] sm:$0xff]  ;;  %v7792_v12 = vld [vmem:[#allocation6 + $0x804] ss:$8 sps:$4 sm:$0xff]   ;;  %v7787_v13 = vld [vmem:[#allocation6 + $0x100] ss:$8 sps:$4 sm:$0xff]  }
  0x9d   :  { %v169_v10 = vld [vmem:[#allocation3 + $0x170] sm:$0xff]  ;;  %v7790_v14 = vld [vmem:[#allocation6 + $0x800] ss:$8 sps:$4 sm:$0xff]   ;;  %v202_v19 = vld [vmem:[#allocation3 + $0x278] sm:$0xff] }
  0x9e   :  { %3988 = vmatpush1.bf16.msra.mxu1 %v7731_v27  ;;  %v188_v15 = vld [vmem:[#allocation3 + $0x208] sm:$0xff]  ;;  %v649_v18 = vpack.c.bf16 %v169_v10, %v137_v9  ;;  %v234_v20 = vld [vmem:[#allocation3 + $0x378] sm:$0xff]  ;;  %v187_v27 = vld [vmem:[#allocation3 + $0x200] sm:$0xff] }
  0x9f   :  { %4779 = vmatpush1.bf16.msra.mxu0 %v7732_v28  ;;  %3989 = vmatprep.subr.bf16.mxu1 %v7733_v29  ;;  %v220_v16 = vld [vmem:[#allocation3 + $0x308] sm:$0xff]  ;;  %v7795_v21 = vld [vmem:[#allocation6 + $0x114] ss:$8 sps:$4 sm:$0xff]   ;;  %v7793_v23 = vld [vmem:[#allocation6 + $0x110] ss:$8 sps:$4 sm:$0xff]   ;;  %v682_v25 = vpack.c.bf16 %v234_v20, %v202_v19 }
  0xa0   :  { %4780 = vmatprep.subr.bf16.mxu0 %v7735_v30  ;;  %v7798_v22 = vld [vmem:[#allocation6 + $0x814] ss:$8 sps:$4 sm:$0xff]   ;;  %v668_v24 = vpack.c.bf16 %v220_v16, %v188_v15  ;;  %v7796_v26 = vld [vmem:[#allocation6 + $0x810] ss:$8 sps:$4 sm:$0xff]   ;;  %v219_v28 = vld [vmem:[#allocation3 + $0x300] sm:$0xff] }
  0xa1   :  { %v201_v29 = vld [vmem:[#allocation3 + $0x270] sm:$0xff]  ;;  %v251_v47 = vld [vmem:[#allocation3 + $0x400] sm:$0xff]  ;;  %v394_v15 = vld [vmem:[#allocation3 + $0x878] sm:$0xff] }
  0xa2   :  { %3990 = vmatpush1.bf16.msra.mxu1 %v7737_v31  ;;  %v233_v30 = vld [vmem:[#allocation3 + $0x370] sm:$0xff]  ;;  %v7801_v31 = vld [vmem:[#allocation6 + $0x124] ss:$8 sps:$4 sm:$0xff]   ;;  %v7811_v53 = vld [vmem:[#allocation6 + $0x140] ss:$8 sps:$4 sm:$0xff]  }
  0xa3   :  { %4781 = vmatpush1.bf16.msra.mxu0 %v7738_v32  ;;  %3991 = vmatprep.subr.bf16.mxu1 %v7739_v33  ;;  %v7804_v32 = vld [vmem:[#allocation6 + $0x824] ss:$8 sps:$4 sm:$0xff]   ;;  %v7799_v33 = vld [vmem:[#allocation6 + $0x120] ss:$8 sps:$4 sm:$0xff]   ;;  %v265_v49 = vld [vmem:[#allocation3 + $0x470] sm:$0xff] }
  0xa4   :  { %4782 = vmatprep.subr.bf16.mxu0 %v7741_v34  ;;  %v7802_v34 = vld [vmem:[#allocation6 + $0x820] ss:$8 sps:$4 sm:$0xff]   ;;  %v297_v50 = vld [vmem:[#allocation3 + $0x570] sm:$0xff]  ;;  %v7825_v7 = vld [vmem:[#allocation6 + $0x164] ss:$8 sps:$4 sm:$0xff]  }
  0xa5   :  { %v283_v48 = vld [vmem:[#allocation3 + $0x500] sm:$0xff]  ;;  %v426_v16 = vld [vmem:[#allocation3 + $0x978] sm:$0xff] }
  0xa6   :  { %3992 = vmatpush1.bf16.msra.mxu1 %v7743_v35  ;;  %v252_v35 = vld [vmem:[#allocation3 + $0x408] sm:$0xff]  ;;  %v7829_v19 = vld [vmem:[#allocation6 + $0x170] ss:$8 sps:$4 sm:$0xff]  }
  0xa7   :  { %4783 = vmatpush1.bf16.msra.mxu0 %v7744_v36  ;;  %3993 = vmatprep.subr.bf16.mxu1 %v7745_v37  ;;  %v284_v36 = vld [vmem:[#allocation3 + $0x508] sm:$0xff]  ;;  %v667_v37 = vpack.c.bf16 %v219_v28, %v187_v27 }
  0xa8   :  { %4784 = vmatprep.subr.bf16.mxu0 %v7747_v38  ;;  %v681_v38 = vpack.c.bf16 %v233_v30, %v201_v29  ;;  %v7814_v54 = vld [vmem:[#allocation6 + $0x840] ss:$8 sps:$4 sm:$0xff]   ;;  %v7828_v8 = vld [vmem:[#allocation6 + $0x864] ss:$8 sps:$4 sm:$0xff]  }
  0xa9   :  { %v7823_v9 = vld [vmem:[#allocation6 + $0x160] ss:$8 sps:$4 sm:$0xff]   ;;  %v7837_v27 = vld [vmem:[#allocation6 + $0x184] ss:$8 sps:$4 sm:$0xff]  }
  0xaa   :  { %3994 = vmatpush1.bf16.msra.mxu1 %v7749_v39  ;;  %v266_v39 = vld [vmem:[#allocation3 + $0x478] sm:$0xff]  ;;  %v7826_v10 = vld [vmem:[#allocation6 + $0x860] ss:$8 sps:$4 sm:$0xff]   ;;  %v7840_v28 = vld [vmem:[#allocation6 + $0x884] ss:$8 sps:$4 sm:$0xff]  }
  0xab   :  { %4785 = vmatpush1.bf16.msra.mxu0 %v7750_v40  ;;  %3995 = vmatprep.subr.bf16.mxu1 %v7751_v41  ;;  %v298_v40 = vld [vmem:[#allocation3 + $0x578] sm:$0xff]  ;;  %v7835_v29 = vld [vmem:[#allocation6 + $0x180] ss:$8 sps:$4 sm:$0xff]  }
  0xac   :  { %4786 = vmatprep.subr.bf16.mxu0 %v7753_v42  ;;  %v7807_v41 = vld [vmem:[#allocation6 + $0x134] ss:$8 sps:$4 sm:$0xff]   ;;  %v7838_v30 = vld [vmem:[#allocation6 + $0x880] ss:$8 sps:$4 sm:$0xff]  }
  0xad   :  { %v7810_v42 = vld [vmem:[#allocation6 + $0x834] ss:$8 sps:$4 sm:$0xff]  }
  0xae   :  { %3996 = vmatpush1.bf16.msra.mxu1 %v7755_v43  ;;  %v7805_v43 = vld [vmem:[#allocation6 + $0x130] ss:$8 sps:$4 sm:$0xff]  }
  0xaf   :  { %4787 = vmatpush1.bf16.msra.mxu0 %v7756_v44  ;;  %3997 = vmatprep.subr.bf16.mxu1 %v7757_v45  ;;  %v700_v44 = vpack.c.bf16 %v284_v36, %v252_v35  ;;  %v714_v45 = vpack.c.bf16 %v298_v40, %v266_v39  ;;  %v458_v35 = vld [vmem:[#allocation3 + $0xa78] sm:$0xff] }
  0xb0   :  { %4788 = vmatprep.subr.bf16.mxu0 %v7759_v46  ;;  %v7808_v46 = vld [vmem:[#allocation6 + $0x830] ss:$8 sps:$4 sm:$0xff]  }
  0xb1   :  { %v490_v36 = vld [vmem:[#allocation3 + $0xb78] sm:$0xff] }
  0xb2   :  { %3998 = vmatpush1.bf16.msra.mxu1 %v7761_v51  ;;  %v7813_v51 = vld [vmem:[#allocation6 + $0x144] ss:$8 sps:$4 sm:$0xff]   ;;  %v7841_v39 = vld [vmem:[#allocation6 + $0x190] ss:$8 sps:$4 sm:$0xff]  }
  0xb3   :  { %4789 = vmatpush1.bf16.msra.mxu0 %v7762_v52  ;;  %3999 = vmatprep.subr.bf16.mxu1 %v7763_v55  ;;  %v7816_v52 = vld [vmem:[#allocation6 + $0x844] ss:$8 sps:$4 sm:$0xff]  }
  0xb4   :  { %4790 = vmatprep.subr.bf16.mxu0 %v7765_v56  ;;  %v316_v55 = vld [vmem:[#allocation3 + $0x608] sm:$0xff] }
  0xb5   :  { %v348_v56 = vld [vmem:[#allocation3 + $0x708] sm:$0xff] }
  0xb6   :  { %4000 = vmatpush1.bf16.msra.mxu1 %v7767_v57  ;;  %v699_v57 = vpack.c.bf16 %v283_v48, %v251_v47  ;;  %v7849_v47 = vld [vmem:[#allocation6 + $0x1a4] ss:$8 sps:$4 sm:$0xff]  }
  0xb7   :  { %4791 = vmatpush1.bf16.msra.mxu0 %v7768_v58  ;;  %4001 = vmatprep.subr.bf16.mxu1 %v7769_v59  ;;  %v713_v58 = vpack.c.bf16 %v297_v50, %v265_v49  ;;  %v330_v59 = vld [vmem:[#allocation3 + $0x678] sm:$0xff]  ;;  %v7852_v48 = vld [vmem:[#allocation6 + $0x8a4] ss:$8 sps:$4 sm:$0xff]   ;;  %v7847_v49 = vld [vmem:[#allocation6 + $0x1a0] ss:$8 sps:$4 sm:$0xff]  }
  0xb8   :  { %4792 = vmatprep.subr.bf16.mxu0 %v7771_v60  ;;  %v362_v60 = vld [vmem:[#allocation3 + $0x778] sm:$0xff]  ;;  %v7850_v50 = vld [vmem:[#allocation6 + $0x8a0] ss:$8 sps:$4 sm:$0xff]  }
  0xba   :  { %4002 = vmatpush1.bf16.msra.mxu1 %v7773_v61  ;;  %v7819_v61 = vld [vmem:[#allocation6 + $0x154] ss:$8 sps:$4 sm:$0xff]  }
  0xbb   :  { %4793 = vmatpush1.bf16.msra.mxu0 %v7774_v62  ;;  %4003 = vmatprep.subr.bf16.mxu1 %v7775_v63  ;;  %v7822_v62 = vld [vmem:[#allocation6 + $0x854] ss:$8 sps:$4 sm:$0xff]   ;;  %v7817_v63 = vld [vmem:[#allocation6 + $0x150] ss:$8 sps:$4 sm:$0xff]  }
  0xbc   :  { %4794 = vmatprep.subr.bf16.mxu0 %v7777_v0  ;;  %v732_v0 = vpack.c.bf16 %v348_v56, %v316_v55  ;;  %v522_v55 = vld [vmem:[#allocation3 + $0xc78] sm:$0xff] }
  0xbd   :  { %v554_v56 = vld [vmem:[#allocation3 + $0xd78] sm:$0xff] }
  0xbe   :  { %4004 = vmatpush1.bf16.msra.mxu1 %v7779_v1  ;;  %v746_v1 = vpack.c.bf16 %v362_v60, %v330_v59  ;;  %v7853_v59 = vld [vmem:[#allocation6 + $0x1b0] ss:$8 sps:$4 sm:$0xff]  }
  0xbf   :  { %4795 = vmatpush1.bf16.msra.mxu0 %v7780_v2  ;;  %4005 = vmatprep.subr.bf16.mxu1 %v7781_v3  ;;  %v7820_v2 = vld [vmem:[#allocation6 + $0x850] ss:$8 sps:$4 sm:$0xff]   ;;  %v315_v3 = vld [vmem:[#allocation3 + $0x600] sm:$0xff] }
  0xc0   :  { %4796 = vmatprep.subr.bf16.mxu0 %v7783_v4  ;;  %v347_v4 = vld [vmem:[#allocation3 + $0x700] sm:$0xff] }
  0xc2   :  { %4006 = vmatpush1.bf16.msra.mxu1 %v7785_v5  ;;  %v329_v5 = vld [vmem:[#allocation3 + $0x670] sm:$0xff] }
  0xc3   :  { %4797 = vmatpush1.bf16.msra.mxu0 %v7786_v6  ;;  %4088 = vmatprep.subr.bf16.mxu1 %v7789_v11  ;;  %v361_v6 = vld [vmem:[#allocation3 + $0x770] sm:$0xff]  ;;  %v380_v11 = vld [vmem:[#allocation3 + $0x808] sm:$0xff] }
  0xc4   :  { %4879 = vmatprep.subr.bf16.mxu0 %v7792_v12  ;;  %v412_v12 = vld [vmem:[#allocation3 + $0x908] sm:$0xff] }
  0xc5   :  { %4008 = vmatmul.mubr.bf16.vlgmr.msra.gmra.mrb[0].mxu1 %v635_v17  ;;  %v7831_v17 = vld [vmem:[#allocation6 + $0x174] ss:$8 sps:$4 sm:$0xff]   ;;  %v764_v20 = vpack.c.bf16 %v412_v12, %v380_v11 }
  0xc6   :  { %4799 = vmatmul.mubr.bf16.vlgmr.msra.gmra.mrb[0].mxu0 %v649_v18  ;;  %4089 = vmatpush1.bf16.msra.mxu1 %v7787_v13  ;;  %v731_v13 = vpack.c.bf16 %v347_v4, %v315_v3  ;;  %v7834_v18 = vld [vmem:[#allocation6 + $0x874] ss:$8 sps:$4 sm:$0xff]   ;;  %v7861_v3 = vld [vmem:[#allocation6 + $0x1c4] ss:$8 sps:$4 sm:$0xff]  }
  0xc7   :  { %4880 = vmatpush1.bf16.msra.mxu0 %v7790_v14  ;;  %4090 = vmatprep.subr.bf16.mxu1 %v7795_v21  ;;  %v745_v14 = vpack.c.bf16 %v361_v6, %v329_v5  ;;  %v778_v21 = vpack.c.bf16 %v426_v16, %v394_v15  ;;  %v7864_v4 = vld [vmem:[#allocation6 + $0x8c4] ss:$8 sps:$4 sm:$0xff]   ;;  %v7859_v5 = vld [vmem:[#allocation6 + $0x1c0] ss:$8 sps:$4 sm:$0xff]   ;;  %v586_v11 = vld [vmem:[#allocation3 + $0xe78] sm:$0xff] }
  0xc8   :  { %4881 = vmatprep.subr.bf16.mxu0 %v7798_v22  ;;  %4017 = vmatprep.mubr.bf16.mxu1 %v668_v24  ;;  %v7832_v22 = vld [vmem:[#allocation6 + $0x870] ss:$8 sps:$4 sm:$0xff]   ;;  %v411_v24 = vld [vmem:[#allocation3 + $0x900] sm:$0xff] }
  0xc9   :  { %4808 = vmatprep.mubr.bf16.mxu0 %v682_v25  ;;  %v393_v25 = vld [vmem:[#allocation3 + $0x870] sm:$0xff]  ;;  %v7862_v6 = vld [vmem:[#allocation6 + $0x8c0] ss:$8 sps:$4 sm:$0xff]   ;;  %v618_v12 = vld [vmem:[#allocation3 + $0xf78] sm:$0xff] }
  0xca   :  { %4091 = vmatpush1.bf16.msra.mxu1 %v7793_v23  ;;  %v379_v23 = vld [vmem:[#allocation3 + $0x800] sm:$0xff]  ;;  %v7865_v15 = vld [vmem:[#allocation6 + $0x1d0] ss:$8 sps:$4 sm:$0xff]  }
  0xcb   :  { %4882 = vmatpush1.bf16.msra.mxu0 %v7796_v26  ;;  %4092 = vmatprep.subr.bf16.mxu1 %v7801_v31  ;;  %v425_v26 = vld [vmem:[#allocation3 + $0x970] sm:$0xff]  ;;  %v444_v31 = vld [vmem:[#allocation3 + $0xa08] sm:$0xff] }
  0xcc   :  { %4883 = vmatprep.subr.bf16.mxu0 %v7804_v32  ;;  %v476_v32 = vld [vmem:[#allocation3 + $0xb08] sm:$0xff] }
  0xcd   :  { %4018 = vmatmul.mubr.bf16.gmra.mrb[4].mxu1 %v667_v37  ;;  %v7843_v37 = vld [vmem:[#allocation6 + $0x194] ss:$8 sps:$4 sm:$0xff]   ;;  %v796_v40 = vpack.c.bf16 %v476_v32, %v444_v31  ;;  %v140_v31 = vld [vmem:[#allocation3 + $0x88] sm:$0xff] }
  0xce   :  { %4809 = vmatmul.mubr.bf16.gmra.mrb[4].mxu0 %v681_v38  ;;  %4093 = vmatpush1.bf16.msra.mxu1 %v7799_v33  ;;  %v763_v33 = vpack.c.bf16 %v411_v24, %v379_v23  ;;  %v7846_v38 = vld [vmem:[#allocation6 + $0x894] ss:$8 sps:$4 sm:$0xff]   ;;  %v7873_v23 = vld [vmem:[#allocation6 + $0x1e4] ss:$8 sps:$4 sm:$0xff]  }
  0xcf   :  { %4884 = vmatpush1.bf16.msra.mxu0 %v7802_v34  ;;  %4094 = vmatprep.subr.bf16.mxu1 %v7807_v41  ;;  %v777_v34 = vpack.c.bf16 %v425_v26, %v393_v25  ;;  %v810_v41 = vpack.c.bf16 %v490_v36, %v458_v35  ;;  %v7876_v24 = vld [vmem:[#allocation6 + $0x8e4] ss:$8 sps:$4 sm:$0xff]   ;;  %v7871_v25 = vld [vmem:[#allocation6 + $0x1e0] ss:$8 sps:$4 sm:$0xff]   ;;  %v7877_v35 = vld [vmem:[#allocation6 + $0x1f0] ss:$8 sps:$4 sm:$0xff]  }
  0xd0   :  { %4885 = vmatprep.subr.bf16.mxu0 %v7810_v42  ;;  %4027 = vmatprep.mubr.bf16.mxu1 %v700_v44  ;;  %v7844_v42 = vld [vmem:[#allocation6 + $0x890] ss:$8 sps:$4 sm:$0xff]   ;;  %v475_v44 = vld [vmem:[#allocation3 + $0xb00] sm:$0xff]  ;;  %v172_v32 = vld [vmem:[#allocation3 + $0x188] sm:$0xff] }
  0xd1   :  { %4818 = vmatprep.mubr.bf16.mxu0 %v714_v45  ;;  %v457_v45 = vld [vmem:[#allocation3 + $0xa70] sm:$0xff]  ;;  %v7874_v26 = vld [vmem:[#allocation6 + $0x8e0] ss:$8 sps:$4 sm:$0xff]  }
  0xd2   :  { %4095 = vmatpush1.bf16.msra.mxu1 %v7805_v43  ;;  %v443_v43 = vld [vmem:[#allocation3 + $0xa00] sm:$0xff] }
  0xd3   :  { %4886 = vmatpush1.bf16.msra.mxu0 %v7808_v46  ;;  %4096 = vmatprep.subr.bf16.mxu1 %v7813_v51  ;;  %v489_v46 = vld [vmem:[#allocation3 + $0xb70] sm:$0xff]  ;;  %v508_v51 = vld [vmem:[#allocation3 + $0xc08] sm:$0xff] }
  0xd4   :  { %4887 = vmatprep.subr.bf16.mxu0 %v7816_v52  ;;  %v540_v52 = vld [vmem:[#allocation3 + $0xd08] sm:$0xff] }
  0xd5   :  { %4028 = vmatmul.mubr.bf16.gmra.mrb[8].mxu1 %v699_v57  ;;  %v7855_v57 = vld [vmem:[#allocation6 + $0x1b4] ss:$8 sps:$4 sm:$0xff]   ;;  %v828_v60 = vpack.c.bf16 %v540_v52, %v508_v51  ;;  %v204_v51 = vld [vmem:[#allocation3 + $0x288] sm:$0xff] }
  0xd6   :  { %4819 = vmatmul.mubr.bf16.gmra.mrb[8].mxu0 %v713_v58  ;;  %4097 = vmatpush1.bf16.msra.mxu1 %v7811_v53  ;;  %v795_v53 = vpack.c.bf16 %v475_v44, %v443_v43  ;;  %v7858_v58 = vld [vmem:[#allocation6 + $0x8b4] ss:$8 sps:$4 sm:$0xff]   ;;  %v7885_v43 = vld [vmem:[#allocation6 + $0x204] ss:$8 sps:$4 sm:$0xff]  }
  0xd7   :  { %4888 = vmatpush1.bf16.msra.mxu0 %v7814_v54  ;;  %4098 = vmatprep.subr.bf16.mxu1 %v7819_v61  ;;  %v809_v54 = vpack.c.bf16 %v489_v46, %v457_v45  ;;  %v842_v61 = vpack.c.bf16 %v554_v56, %v522_v55  ;;  %v7888_v44 = vld [vmem:[#allocation6 + $0x904] ss:$8 sps:$4 sm:$0xff]   ;;  %v7883_v45 = vld [vmem:[#allocation6 + $0x200] ss:$8 sps:$4 sm:$0xff]   ;;  %v7889_v55 = vld [vmem:[#allocation6 + $0x210] ss:$8 sps:$4 sm:$0xff]  }
  0xd8   :  { %4889 = vmatprep.subr.bf16.mxu0 %v7822_v62  ;;  %4037 = vmatprep.mubr.bf16.mxu1 %v732_v0  ;;  %v7856_v62 = vld [vmem:[#allocation6 + $0x8b0] ss:$8 sps:$4 sm:$0xff]   ;;  %v539_v0 = vld [vmem:[#allocation3 + $0xd00] sm:$0xff]  ;;  %v236_v52 = vld [vmem:[#allocation3 + $0x388] sm:$0xff] }
  0xd9   :  { %4828 = vmatprep.mubr.bf16.mxu0 %v746_v1  ;;  %v521_v1 = vld [vmem:[#allocation3 + $0xc70] sm:$0xff]  ;;  %v7886_v46 = vld [vmem:[#allocation6 + $0x900] ss:$8 sps:$4 sm:$0xff]  }
  0xda   :  { %4099 = vmatpush1.bf16.msra.mxu1 %v7817_v63  ;;  %v507_v63 = vld [vmem:[#allocation3 + $0xc00] sm:$0xff] }
  0xdb   :  { %4890 = vmatpush1.bf16.msra.mxu0 %v7820_v2  ;;  %4100 = vmatprep.subr.bf16.mxu1 %v7825_v7  ;;  %v553_v2 = vld [vmem:[#allocation3 + $0xd70] sm:$0xff]  ;;  %v572_v7 = vld [vmem:[#allocation3 + $0xe08] sm:$0xff] }
  0xdc   :  { %4891 = vmatprep.subr.bf16.mxu0 %v7828_v8  ;;  %v604_v8 = vld [vmem:[#allocation3 + $0xf08] sm:$0xff] }
  0xdd   :  { %4038 = vmatmul.mubr.bf16.gmra.mrb[12].mxu1 %v731_v13  ;;  %v7867_v13 = vld [vmem:[#allocation6 + $0x1d4] ss:$8 sps:$4 sm:$0xff]   ;;  %v860_v16 = vpack.c.bf16 %v604_v8, %v572_v7  ;;  %v268_v7 = vld [vmem:[#allocation3 + $0x488] sm:$0xff] }
  0xde   :  { %4829 = vmatmul.mubr.bf16.gmra.mrb[12].mxu0 %v745_v14  ;;  %4101 = vmatpush1.bf16.msra.mxu1 %v7823_v9  ;;  %v827_v9 = vpack.c.bf16 %v539_v0, %v507_v63  ;;  %v7870_v14 = vld [vmem:[#allocation6 + $0x8d4] ss:$8 sps:$4 sm:$0xff]   ;;  %v7897_v63 = vld [vmem:[#allocation6 + $0x224] ss:$8 sps:$4 sm:$0xff]  }
  0xdf   :  { %4892 = vmatpush1.bf16.msra.mxu0 %v7826_v10  ;;  %4102 = vmatprep.subr.bf16.mxu1 %v7831_v17  ;;  %v841_v10 = vpack.c.bf16 %v553_v2, %v521_v1  ;;  %v874_v17 = vpack.c.bf16 %v618_v12, %v586_v11  ;;  %v7900_v0 = vld [vmem:[#allocation6 + $0x924] ss:$8 sps:$4 sm:$0xff]   ;;  %v7895_v1 = vld [vmem:[#allocation6 + $0x220] ss:$8 sps:$4 sm:$0xff]   ;;  %v7901_v11 = vld [vmem:[#allocation6 + $0x230] ss:$8 sps:$4 sm:$0xff]  }
  0xe0   :  { %4893 = vmatprep.subr.bf16.mxu0 %v7834_v18  ;;  %4047 = vmatprep.mubr.bf16.mxu1 %v764_v20  ;;  %v7868_v18 = vld [vmem:[#allocation6 + $0x8d0] ss:$8 sps:$4 sm:$0xff]   ;;  %v603_v20 = vld [vmem:[#allocation3 + $0xf00] sm:$0xff]  ;;  %v300_v8 = vld [vmem:[#allocation3 + $0x588] sm:$0xff] }
  0xe1   :  { %4838 = vmatprep.mubr.bf16.mxu0 %v778_v21  ;;  %v585_v21 = vld [vmem:[#allocation3 + $0xe70] sm:$0xff]  ;;  %v7898_v2 = vld [vmem:[#allocation6 + $0x920] ss:$8 sps:$4 sm:$0xff]  }
  0xe2   :  { %4103 = vmatpush1.bf16.msra.mxu1 %v7829_v19  ;;  %v571_v19 = vld [vmem:[#allocation3 + $0xe00] sm:$0xff] }
  0xe3   :  { %4894 = vmatpush1.bf16.msra.mxu0 %v7832_v22  ;;  %4104 = vmatprep.subr.bf16.mxu1 %v7837_v27  ;;  %v617_v22 = vld [vmem:[#allocation3 + $0xf70] sm:$0xff]  ;;  %v126_v27 = vld [vmem:[#allocation3 + $0x18] sm:$0xff] }
  0xe4   :  { %4895 = vmatprep.subr.bf16.mxu0 %v7840_v28  ;;  %v158_v28 = vld [vmem:[#allocation3 + $0x118] sm:$0xff] }
  0xe5   :  { %4048 = vmatmul.mubr.bf16.gmra.mrb[16].mxu1 %v763_v33  ;;  %v7879_v33 = vld [vmem:[#allocation6 + $0x1f4] ss:$8 sps:$4 sm:$0xff]   ;;  %v638_v36 = vpack.c.bf16 %v158_v28, %v126_v27  ;;  %v332_v27 = vld [vmem:[#allocation3 + $0x688] sm:$0xff] }
  0xe6   :  { %4839 = vmatmul.mubr.bf16.gmra.mrb[16].mxu0 %v777_v34  ;;  %4105 = vmatpush1.bf16.msra.mxu1 %v7835_v29  ;;  %v859_v29 = vpack.c.bf16 %v603_v20, %v571_v19  ;;  %v7882_v34 = vld [vmem:[#allocation6 + $0x8f4] ss:$8 sps:$4 sm:$0xff]   ;;  %v7909_v19 = vld [vmem:[#allocation6 + $0x244] ss:$8 sps:$4 sm:$0xff]  }
  0xe7   :  { %4896 = vmatpush1.bf16.msra.mxu0 %v7838_v30  ;;  %4106 = vmatprep.subr.bf16.mxu1 %v7843_v37  ;;  %v873_v30 = vpack.c.bf16 %v617_v22, %v585_v21  ;;  %v652_v37 = vpack.c.bf16 %v172_v32, %v140_v31  ;;  %v7912_v20 = vld [vmem:[#allocation6 + $0x944] ss:$8 sps:$4 sm:$0xff]   ;;  %v7907_v21 = vld [vmem:[#allocation6 + $0x240] ss:$8 sps:$4 sm:$0xff]   ;;  %v7913_v31 = vld [vmem:[#allocation6 + $0x250] ss:$8 sps:$4 sm:$0xff]  }
  0xe8   :  { %4897 = vmatprep.subr.bf16.mxu0 %v7846_v38  ;;  %4057 = vmatprep.mubr.bf16.mxu1 %v796_v40  ;;  %v7880_v38 = vld [vmem:[#allocation6 + $0x8f0] ss:$8 sps:$4 sm:$0xff]   ;;  %v7910_v22 = vld [vmem:[#allocation6 + $0x940] ss:$8 sps:$4 sm:$0xff]  }
  0xe9   :  { %4848 = vmatprep.mubr.bf16.mxu0 %v810_v41  ;;  %v157_v40 = vld [vmem:[#allocation3 + $0x110] sm:$0xff]  ;;  %v139_v41 = vld [vmem:[#allocation3 + $0x80] sm:$0xff]  ;;  %v364_v28 = vld [vmem:[#allocation3 + $0x788] sm:$0xff] }
  0xea   :  { %4107 = vmatpush1.bf16.msra.mxu1 %v7841_v39  ;;  %v125_v39 = vld [vmem:[#allocation3 + $0x10] sm:$0xff] }
  0xeb   :  { %4898 = vmatpush1.bf16.msra.mxu0 %v7844_v42  ;;  %4108 = vmatprep.subr.bf16.mxu1 %v7849_v47  ;;  %v171_v42 = vld [vmem:[#allocation3 + $0x180] sm:$0xff]  ;;  %v190_v47 = vld [vmem:[#allocation3 + $0x218] sm:$0xff] }
  0xec   :  { %4899 = vmatprep.subr.bf16.mxu0 %v7852_v48  ;;  %v222_v48 = vld [vmem:[#allocation3 + $0x318] sm:$0xff] }
  0xed   :  { %4058 = vmatmul.mubr.bf16.gmra.mrb[20].mxu1 %v795_v53  ;;  %v7891_v53 = vld [vmem:[#allocation6 + $0x214] ss:$8 sps:$4 sm:$0xff]   ;;  %v670_v56 = vpack.c.bf16 %v222_v48, %v190_v47  ;;  %v396_v47 = vld [vmem:[#allocation3 + $0x888] sm:$0xff] }
  0xee   :  { %4849 = vmatmul.mubr.bf16.gmra.mrb[20].mxu0 %v809_v54  ;;  %4109 = vmatpush1.bf16.msra.mxu1 %v7847_v49  ;;  %v637_v49 = vpack.c.bf16 %v157_v40, %v125_v39  ;;  %v7894_v54 = vld [vmem:[#allocation6 + $0x914] ss:$8 sps:$4 sm:$0xff]   ;;  %v7921_v39 = vld [vmem:[#allocation6 + $0x264] ss:$8 sps:$4 sm:$0xff]  }
  0xef   :  { %4900 = vmatpush1.bf16.msra.mxu0 %v7850_v50  ;;  %4110 = vmatprep.subr.bf16.mxu1 %v7855_v57  ;;  %v651_v50 = vpack.c.bf16 %v171_v42, %v139_v41  ;;  %v684_v57 = vpack.c.bf16 %v236_v52, %v204_v51  ;;  %v7924_v40 = vld [vmem:[#allocation6 + $0x964] ss:$8 sps:$4 sm:$0xff]   ;;  %v7919_v41 = vld [vmem:[#allocation6 + $0x260] ss:$8 sps:$4 sm:$0xff]   ;;  %v7925_v51 = vld [vmem:[#allocation6 + $0x270] ss:$8 sps:$4 sm:$0xff]  }
  0xf0   :  { %4901 = vmatprep.subr.bf16.mxu0 %v7858_v58  ;;  %4067 = vmatprep.mubr.bf16.mxu1 %v828_v60  ;;  %v7892_v58 = vld [vmem:[#allocation6 + $0x910] ss:$8 sps:$4 sm:$0xff]   ;;  %v7922_v42 = vld [vmem:[#allocation6 + $0x960] ss:$8 sps:$4 sm:$0xff]  }
  0xf1   :  { %4858 = vmatprep.mubr.bf16.mxu0 %v842_v61  ;;  %v221_v60 = vld [vmem:[#allocation3 + $0x310] sm:$0xff]  ;;  %v203_v61 = vld [vmem:[#allocation3 + $0x280] sm:$0xff]  ;;  %v428_v48 = vld [vmem:[#allocation3 + $0x988] sm:$0xff] }
  0xf2   :  { %4111 = vmatpush1.bf16.msra.mxu1 %v7853_v59  ;;  %v189_v59 = vld [vmem:[#allocation3 + $0x210] sm:$0xff] }
  0xf3   :  { %4902 = vmatpush1.bf16.msra.mxu0 %v7856_v62  ;;  %4112 = vmatprep.subr.bf16.mxu1 %v7861_v3  ;;  %v235_v62 = vld [vmem:[#allocation3 + $0x380] sm:$0xff]  ;;  %v254_v3 = vld [vmem:[#allocation3 + $0x418] sm:$0xff] }
  0xf4   :  { %4903 = vmatprep.subr.bf16.mxu0 %v7864_v4  ;;  %v286_v4 = vld [vmem:[#allocation3 + $0x518] sm:$0xff] }
  0xf5   :  { %4068 = vmatmul.mubr.bf16.gmra.mrb[24].mxu1 %v827_v9  ;;  %v7903_v9 = vld [vmem:[#allocation6 + $0x234] ss:$8 sps:$4 sm:$0xff]   ;;  %v702_v12 = vpack.c.bf16 %v286_v4, %v254_v3  ;;  %v460_v3 = vld [vmem:[#allocation3 + $0xa88] sm:$0xff] }
  0xf6   :  { %4859 = vmatmul.mubr.bf16.gmra.mrb[24].mxu0 %v841_v10  ;;  %4113 = vmatpush1.bf16.msra.mxu1 %v7859_v5  ;;  %v669_v5 = vpack.c.bf16 %v221_v60, %v189_v59  ;;  %v7906_v10 = vld [vmem:[#allocation6 + $0x934] ss:$8 sps:$4 sm:$0xff]   ;;  %v7933_v59 = vld [vmem:[#allocation6 + $0x284] ss:$8 sps:$4 sm:$0xff]  }
  0xf7   :  { %4904 = vmatpush1.bf16.msra.mxu0 %v7862_v6  ;;  %4114 = vmatprep.subr.bf16.mxu1 %v7867_v13  ;;  %v683_v6 = vpack.c.bf16 %v235_v62, %v203_v61  ;;  %v716_v13 = vpack.c.bf16 %v300_v8, %v268_v7  ;;  %v7936_v60 = vld [vmem:[#allocation6 + $0x984] ss:$8 sps:$4 sm:$0xff]   ;;  %v7931_v61 = vld [vmem:[#allocation6 + $0x280] ss:$8 sps:$4 sm:$0xff]   ;;  %v7937_v7 = vld [vmem:[#allocation6 + $0x290] ss:$8 sps:$4 sm:$0xff]  }
  0xf8   :  { %4905 = vmatprep.subr.bf16.mxu0 %v7870_v14  ;;  %4077 = vmatprep.mubr.bf16.mxu1 %v860_v16  ;;  %v7904_v14 = vld [vmem:[#allocation6 + $0x930] ss:$8 sps:$4 sm:$0xff]   ;;  %v7934_v62 = vld [vmem:[#allocation6 + $0x980] ss:$8 sps:$4 sm:$0xff]  }
  0xf9   :  { %4868 = vmatprep.mubr.bf16.mxu0 %v874_v17  ;;  %v285_v16 = vld [vmem:[#allocation3 + $0x510] sm:$0xff]  ;;  %v267_v17 = vld [vmem:[#allocation3 + $0x480] sm:$0xff]  ;;  %v492_v4 = vld [vmem:[#allocation3 + $0xb88] sm:$0xff] }
  0xfa   :  { %4115 = vmatpush1.bf16.msra.mxu1 %v7865_v15  ;;  %v253_v15 = vld [vmem:[#allocation3 + $0x410] sm:$0xff] }
  0xfb   :  { %4906 = vmatpush1.bf16.msra.mxu0 %v7868_v18  ;;  %4116 = vmatprep.subr.bf16.mxu1 %v7873_v23  ;;  %v299_v18 = vld [vmem:[#allocation3 + $0x580] sm:$0xff]  ;;  %v318_v23 = vld [vmem:[#allocation3 + $0x618] sm:$0xff] }
  0xfc   :  { %4907 = vmatprep.subr.bf16.mxu0 %v7876_v24  ;;  %v350_v24 = vld [vmem:[#allocation3 + $0x718] sm:$0xff] }
  0xfd   :  { %4078 = vmatmul.mubr.bf16.gmra.mrb[28].mxu1 %v859_v29  ;;  %v7915_v29 = vld [vmem:[#allocation6 + $0x254] ss:$8 sps:$4 sm:$0xff]   ;;  %v734_v32 = vpack.c.bf16 %v350_v24, %v318_v23  ;;  %v524_v23 = vld [vmem:[#allocation3 + $0xc88] sm:$0xff] }
  0xfe   :  { %4869 = vmatmul.mubr.bf16.gmra.mrb[28].mxu0 %v873_v30  ;;  %4117 = vmatpush1.bf16.msra.mxu1 %v7871_v25  ;;  %v701_v25 = vpack.c.bf16 %v285_v16, %v253_v15  ;;  %v7918_v30 = vld [vmem:[#allocation6 + $0x954] ss:$8 sps:$4 sm:$0xff]   ;;  %v7945_v15 = vld [vmem:[#allocation6 + $0x2a4] ss:$8 sps:$4 sm:$0xff]  }
  0xff   :  { %4908 = vmatpush1.bf16.msra.mxu0 %v7874_v26  ;;  %4118 = vmatprep.subr.bf16.mxu1 %v7879_v33  ;;  %v715_v26 = vpack.c.bf16 %v299_v18, %v267_v17  ;;  %v748_v33 = vpack.c.bf16 %v364_v28, %v332_v27  ;;  %v7948_v16 = vld [vmem:[#allocation6 + $0x9a4] ss:$8 sps:$4 sm:$0xff]   ;;  %v7943_v17 = vld [vmem:[#allocation6 + $0x2a0] ss:$8 sps:$4 sm:$0xff]   ;;  %v7949_v27 = vld [vmem:[#allocation6 + $0x2b0] ss:$8 sps:$4 sm:$0xff]  }
 0x100   :  { %4909 = vmatprep.subr.bf16.mxu0 %v7882_v34  ;;  %4120 = vmatprep.mubr.bf16.mxu1 %v638_v36  ;;  %v7916_v34 = vld [vmem:[#allocation6 + $0x950] ss:$8 sps:$4 sm:$0xff]   ;;  %v7946_v18 = vld [vmem:[#allocation6 + $0x9a0] ss:$8 sps:$4 sm:$0xff]  }
 0x101   :  { %4911 = vmatprep.mubr.bf16.mxu0 %v652_v37  ;;  %v349_v36 = vld [vmem:[#allocation3 + $0x710] sm:$0xff]  ;;  %v331_v37 = vld [vmem:[#allocation3 + $0x680] sm:$0xff]  ;;  %v556_v24 = vld [vmem:[#allocation3 + $0xd88] sm:$0xff] }
 0x102   :  { %4119 = vmatpush1.bf16.msra.mxu1 %v7877_v35  ;;  %v317_v35 = vld [vmem:[#allocation3 + $0x610] sm:$0xff] }
 0x103   :  { %4910 = vmatpush1.bf16.msra.mxu0 %v7880_v38  ;;  %4201 = vmatprep.subr.bf16.mxu1 %v7885_v43  ;;  %v363_v38 = vld [vmem:[#allocation3 + $0x780] sm:$0xff]  ;;  %v382_v43 = vld [vmem:[#allocation3 + $0x818] sm:$0xff] }
 0x104   :  { %4992 = vmatprep.subr.bf16.mxu0 %v7888_v44  ;;  %v414_v44 = vld [vmem:[#allocation3 + $0x918] sm:$0xff] }
 0x105   :  { %4121 = vmatmul.mubr.bf16.vlgmr.msra.gmra.mrb[0].mxu1 %v637_v49  ;;  %v7927_v49 = vld [vmem:[#allocation6 + $0x274] ss:$8 sps:$4 sm:$0xff]   ;;  %v766_v52 = vpack.c.bf16 %v414_v44, %v382_v43  ;;  %v588_v43 = vld [vmem:[#allocation3 + $0xe88] sm:$0xff] }
 0x106   :  { %4912 = vmatmul.mubr.bf16.vlgmr.msra.gmra.mrb[0].mxu0 %v651_v50  ;;  %4202 = vmatpush1.bf16.msra.mxu1 %v7883_v45  ;;  %v733_v45 = vpack.c.bf16 %v349_v36, %v317_v35  ;;  %v7930_v50 = vld [vmem:[#allocation6 + $0x974] ss:$8 sps:$4 sm:$0xff]   ;;  %v7957_v35 = vld [vmem:[#allocation6 + $0x2c4] ss:$8 sps:$4 sm:$0xff]  }
 0x107   :  { %4993 = vmatpush1.bf16.msra.mxu0 %v7886_v46  ;;  %4203 = vmatprep.subr.bf16.mxu1 %v7891_v53  ;;  %v747_v46 = vpack.c.bf16 %v363_v38, %v331_v37  ;;  %v780_v53 = vpack.c.bf16 %v428_v48, %v396_v47  ;;  %v7960_v36 = vld [vmem:[#allocation6 + $0x9c4] ss:$8 sps:$4 sm:$0xff]   ;;  %v7955_v37 = vld [vmem:[#allocation6 + $0x2c0] ss:$8 sps:$4 sm:$0xff]   ;;  %v7961_v47 = vld [vmem:[#allocation6 + $0x2d0] ss:$8 sps:$4 sm:$0xff]  }
 0x108   :  { %4994 = vmatprep.subr.bf16.mxu0 %v7894_v54  ;;  %4130 = vmatprep.mubr.bf16.mxu1 %v670_v56  ;;  %v7928_v54 = vld [vmem:[#allocation6 + $0x970] ss:$8 sps:$4 sm:$0xff]   ;;  %v7958_v38 = vld [vmem:[#allocation6 + $0x9c0] ss:$8 sps:$4 sm:$0xff]  }
 0x109   :  { %4921 = vmatprep.mubr.bf16.mxu0 %v684_v57  ;;  %v413_v56 = vld [vmem:[#allocation3 + $0x910] sm:$0xff]  ;;  %v395_v57 = vld [vmem:[#allocation3 + $0x880] sm:$0xff]  ;;  %v620_v44 = vld [vmem:[#allocation3 + $0xf88] sm:$0xff] }
 0x10a   :  { %4204 = vmatpush1.bf16.msra.mxu1 %v7889_v55  ;;  %v381_v55 = vld [vmem:[#allocation3 + $0x810] sm:$0xff] }
 0x10b   :  { %4995 = vmatpush1.bf16.msra.mxu0 %v7892_v58  ;;  %4205 = vmatprep.subr.bf16.mxu1 %v7897_v63  ;;  %v427_v58 = vld [vmem:[#allocation3 + $0x980] sm:$0xff]  ;;  %v446_v63 = vld [vmem:[#allocation3 + $0xa18] sm:$0xff] }
 0x10c   :  { %4996 = vmatprep.subr.bf16.mxu0 %v7900_v0  ;;  %v478_v0 = vld [vmem:[#allocation3 + $0xb18] sm:$0xff] }
 0x10d   :  { %4131 = vmatmul.mubr.bf16.gmra.mrb[4].mxu1 %v669_v5  ;;  %v7939_v5 = vld [vmem:[#allocation6 + $0x294] ss:$8 sps:$4 sm:$0xff]   ;;  %v798_v8 = vpack.c.bf16 %v478_v0, %v446_v63 }
 0x10e   :  { %4922 = vmatmul.mubr.bf16.gmra.mrb[4].mxu0 %v683_v6  ;;  %4206 = vmatpush1.bf16.msra.mxu1 %v7895_v1  ;;  %v765_v1 = vpack.c.bf16 %v413_v56, %v381_v55  ;;  %v7942_v6 = vld [vmem:[#allocation6 + $0x994] ss:$8 sps:$4 sm:$0xff]   ;;  %v7969_v55 = vld [vmem:[#allocation6 + $0x2e4] ss:$8 sps:$4 sm:$0xff]  }
 0x10f   :  { %4997 = vmatpush1.bf16.msra.mxu0 %v7898_v2  ;;  %4207 = vmatprep.subr.bf16.mxu1 %v7903_v9  ;;  %v779_v2 = vpack.c.bf16 %v427_v58, %v395_v57  ;;  %v812_v9 = vpack.c.bf16 %v492_v4, %v460_v3  ;;  %v7972_v56 = vld [vmem:[#allocation6 + $0x9e4] ss:$8 sps:$4 sm:$0xff]   ;;  %v7967_v57 = vld [vmem:[#allocation6 + $0x2e0] ss:$8 sps:$4 sm:$0xff]   ;;  %v142_v63 = vld [vmem:[#allocation3 + $0x98] sm:$0xff] }
 0x110   :  { %4998 = vmatprep.subr.bf16.mxu0 %v7906_v10  ;;  %4140 = vmatprep.mubr.bf16.mxu1 %v702_v12  ;;  %v7940_v10 = vld [vmem:[#allocation6 + $0x990] ss:$8 sps:$4 sm:$0xff]   ;;  %v7970_v58 = vld [vmem:[#allocation6 + $0x9e0] ss:$8 sps:$4 sm:$0xff]  }
 0x111   :  { %4931 = vmatprep.mubr.bf16.mxu0 %v716_v13  ;;  %v477_v12 = vld [vmem:[#allocation3 + $0xb10] sm:$0xff]  ;;  %v459_v13 = vld [vmem:[#allocation3 + $0xa80] sm:$0xff]  ;;  %v174_v0 = vld [vmem:[#allocation3 + $0x198] sm:$0xff] }
 0x112   :  { %4208 = vmatpush1.bf16.msra.mxu1 %v7901_v11  ;;  %v445_v11 = vld [vmem:[#allocation3 + $0xa10] sm:$0xff] }
 0x113   :  { %4999 = vmatpush1.bf16.msra.mxu0 %v7904_v14  ;;  %4209 = vmatprep.subr.bf16.mxu1 %v7909_v19  ;;  %v491_v14 = vld [vmem:[#allocation3 + $0xb80] sm:$0xff]  ;;  %v510_v19 = vld [vmem:[#allocation3 + $0xc18] sm:$0xff] }
 0x114   :  { %5000 = vmatprep.subr.bf16.mxu0 %v7912_v20  ;;  %v542_v20 = vld [vmem:[#allocation3 + $0xd18] sm:$0xff] }
 0x115   :  { %4141 = vmatmul.mubr.bf16.gmra.mrb[8].mxu1 %v701_v25  ;;  %v7951_v25 = vld [vmem:[#allocation6 + $0x2b4] ss:$8 sps:$4 sm:$0xff]   ;;  %v830_v28 = vpack.c.bf16 %v542_v20, %v510_v19  ;;  %v7973_v3 = vld [vmem:[#allocation6 + $0x2f0] ss:$8 sps:$4 sm:$0xff]  }
 0x116   :  { %4932 = vmatmul.mubr.bf16.gmra.mrb[8].mxu0 %v715_v26  ;;  %4210 = vmatpush1.bf16.msra.mxu1 %v7907_v21  ;;  %v797_v21 = vpack.c.bf16 %v477_v12, %v445_v11  ;;  %v7954_v26 = vld [vmem:[#allocation6 + $0x9b4] ss:$8 sps:$4 sm:$0xff]   ;;  %v7981_v11 = vld [vmem:[#allocation6 + $0x304] ss:$8 sps:$4 sm:$0xff]  }
 0x117   :  { %5001 = vmatpush1.bf16.msra.mxu0 %v7910_v22  ;;  %4211 = vmatprep.subr.bf16.mxu1 %v7915_v29  ;;  %v811_v22 = vpack.c.bf16 %v491_v14, %v459_v13  ;;  %v844_v29 = vpack.c.bf16 %v556_v24, %v524_v23  ;;  %v7984_v12 = vld [vmem:[#allocation6 + $0xa04] ss:$8 sps:$4 sm:$0xff]   ;;  %v7979_v13 = vld [vmem:[#allocation6 + $0x300] ss:$8 sps:$4 sm:$0xff]   ;;  %v206_v19 = vld [vmem:[#allocation3 + $0x298] sm:$0xff] }
 0x118   :  { %5002 = vmatprep.subr.bf16.mxu0 %v7918_v30  ;;  %4150 = vmatprep.mubr.bf16.mxu1 %v734_v32  ;;  %v7952_v30 = vld [vmem:[#allocation6 + $0x9b0] ss:$8 sps:$4 sm:$0xff]   ;;  %v7982_v14 = vld [vmem:[#allocation6 + $0xa00] ss:$8 sps:$4 sm:$0xff]  }
 0x119   :  { %4941 = vmatprep.mubr.bf16.mxu0 %v748_v33  ;;  %v541_v32 = vld [vmem:[#allocation3 + $0xd10] sm:$0xff]  ;;  %v523_v33 = vld [vmem:[#allocation3 + $0xc80] sm:$0xff]  ;;  %v238_v20 = vld [vmem:[#allocation3 + $0x398] sm:$0xff] }
 0x11a   :  { %4212 = vmatpush1.bf16.msra.mxu1 %v7913_v31  ;;  %v509_v31 = vld [vmem:[#allocation3 + $0xc10] sm:$0xff] }
 0x11b   :  { %5003 = vmatpush1.bf16.msra.mxu0 %v7916_v34  ;;  %4213 = vmatprep.subr.bf16.mxu1 %v7921_v39  ;;  %v555_v34 = vld [vmem:[#allocation3 + $0xd80] sm:$0xff]  ;;  %v574_v39 = vld [vmem:[#allocation3 + $0xe18] sm:$0xff] }
 0x11c   :  { %5004 = vmatprep.subr.bf16.mxu0 %v7924_v40  ;;  %v606_v40 = vld [vmem:[#allocation3 + $0xf18] sm:$0xff] }
 0x11d   :  { %4151 = vmatmul.mubr.bf16.gmra.mrb[12].mxu1 %v733_v45  ;;  %v7963_v45 = vld [vmem:[#allocation6 + $0x2d4] ss:$8 sps:$4 sm:$0xff]   ;;  %v862_v48 = vpack.c.bf16 %v606_v40, %v574_v39  ;;  %v7985_v23 = vld [vmem:[#allocation6 + $0x310] ss:$8 sps:$4 sm:$0xff]  }
 0x11e   :  { %4942 = vmatmul.mubr.bf16.gmra.mrb[12].mxu0 %v747_v46  ;;  %4214 = vmatpush1.bf16.msra.mxu1 %v7919_v41  ;;  %v829_v41 = vpack.c.bf16 %v541_v32, %v509_v31  ;;  %v7966_v46 = vld [vmem:[#allocation6 + $0x9d4] ss:$8 sps:$4 sm:$0xff]   ;;  %v7993_v31 = vld [vmem:[#allocation6 + $0x324] ss:$8 sps:$4 sm:$0xff]  }
 0x11f   :  { %5005 = vmatpush1.bf16.msra.mxu0 %v7922_v42  ;;  %4215 = vmatprep.subr.bf16.mxu1 %v7927_v49  ;;  %v843_v42 = vpack.c.bf16 %v555_v34, %v523_v33  ;;  %v876_v49 = vpack.c.bf16 %v620_v44, %v588_v43  ;;  %v7996_v32 = vld [vmem:[#allocation6 + $0xa24] ss:$8 sps:$4 sm:$0xff]   ;;  %v7991_v33 = vld [vmem:[#allocation6 + $0x320] ss:$8 sps:$4 sm:$0xff]   ;;  %v270_v39 = vld [vmem:[#allocation3 + $0x498] sm:$0xff] }
 0x120   :  { %5006 = vmatprep.subr.bf16.mxu0 %v7930_v50  ;;  %4160 = vmatprep.mubr.bf16.mxu1 %v766_v52  ;;  %v7964_v50 = vld [vmem:[#allocation6 + $0x9d0] ss:$8 sps:$4 sm:$0xff]   ;;  %v7994_v34 = vld [vmem:[#allocation6 + $0xa20] ss:$8 sps:$4 sm:$0xff]  }
 0x121   :  { %4951 = vmatprep.mubr.bf16.mxu0 %v780_v53  ;;  %v605_v52 = vld [vmem:[#allocation3 + $0xf10] sm:$0xff]  ;;  %v587_v53 = vld [vmem:[#allocation3 + $0xe80] sm:$0xff]  ;;  %v302_v40 = vld [vmem:[#allocation3 + $0x598] sm:$0xff] }
 0x122   :  { %4216 = vmatpush1.bf16.msra.mxu1 %v7925_v51  ;;  %v573_v51 = vld [vmem:[#allocation3 + $0xe10] sm:$0xff] }
 0x123   :  { %5007 = vmatpush1.bf16.msra.mxu0 %v7928_v54  ;;  %4217 = vmatprep.subr.bf16.mxu1 %v7933_v59  ;;  %v619_v54 = vld [vmem:[#allocation3 + $0xf80] sm:$0xff]  ;;  %v128_v59 = vld [vmem:[#allocation3 + $0x28] sm:$0xff]  ;;  %v7997_v43 = vld [vmem:[#allocation6 + $0x330] ss:$8 sps:$4 sm:$0xff]  }
 0x124   :  { %5008 = vmatprep.subr.bf16.mxu0 %v7936_v60  ;;  %v160_v60 = vld [vmem:[#allocation3 + $0x128] sm:$0xff] }
 0x125   :  { %4161 = vmatmul.mubr.bf16.gmra.mrb[16].mxu1 %v765_v1  ;;  %v7975_v1 = vld [vmem:[#allocation6 + $0x2f4] ss:$8 sps:$4 sm:$0xff]   ;;  %v640_v4 = vpack.c.bf16 %v160_v60, %v128_v59 }
 0x126   :  { %4952 = vmatmul.mubr.bf16.gmra.mrb[16].mxu0 %v779_v2  ;;  %4218 = vmatpush1.bf16.msra.mxu1 %v7931_v61  ;;  %v861_v61 = vpack.c.bf16 %v605_v52, %v573_v51  ;;  %v7978_v2 = vld [vmem:[#allocation6 + $0x9f4] ss:$8 sps:$4 sm:$0xff]   ;;  %v8005_v51 = vld [vmem:[#allocation6 + $0x344] ss:$8 sps:$4 sm:$0xff]  }
 0x127   :  { %5009 = vmatpush1.bf16.msra.mxu0 %v7934_v62  ;;  %4219 = vmatprep.subr.bf16.mxu1 %v7939_v5  ;;  %v875_v62 = vpack.c.bf16 %v619_v54, %v587_v53  ;;  %v654_v5 = vpack.c.bf16 %v174_v0, %v142_v63  ;;  %v8008_v52 = vld [vmem:[#allocation6 + $0xa44] ss:$8 sps:$4 sm:$0xff]   ;;  %v8003_v53 = vld [vmem:[#allocation6 + $0x340] ss:$8 sps:$4 sm:$0xff]   ;;  %v334_v59 = vld [vmem:[#allocation3 + $0x698] sm:$0xff] }
 0x128   :  { %5010 = vmatprep.subr.bf16.mxu0 %v7942_v6  ;;  %4170 = vmatprep.mubr.bf16.mxu1 %v798_v8  ;;  %v7976_v6 = vld [vmem:[#allocation6 + $0x9f0] ss:$8 sps:$4 sm:$0xff]   ;;  %v159_v8 = vld [vmem:[#allocation3 + $0x120] sm:$0xff] }
 0x129   :  { %4961 = vmatprep.mubr.bf16.mxu0 %v812_v9  ;;  %v141_v9 = vld [vmem:[#allocation3 + $0x90] sm:$0xff]  ;;  %v8006_v54 = vld [vmem:[#allocation6 + $0xa40] ss:$8 sps:$4 sm:$0xff]   ;;  %v366_v60 = vld [vmem:[#allocation3 + $0x798] sm:$0xff] }
 0x12a   :  { %4220 = vmatpush1.bf16.msra.mxu1 %v7937_v7  ;;  %v127_v7 = vld [vmem:[#allocation3 + $0x20] sm:$0xff]  ;;  %v8009_v63 = vld [vmem:[#allocation6 + $0x350] ss:$8 sps:$4 sm:$0xff]  }
 0x12b   :  { %5011 = vmatpush1.bf16.msra.mxu0 %v7940_v10  ;;  %4221 = vmatprep.subr.bf16.mxu1 %v7945_v15  ;;  %v173_v10 = vld [vmem:[#allocation3 + $0x190] sm:$0xff]  ;;  %v192_v15 = vld [vmem:[#allocation3 + $0x228] sm:$0xff] }
 0x12c   :  { %5012 = vmatprep.subr.bf16.mxu0 %v7948_v16  ;;  %v224_v16 = vld [vmem:[#allocation3 + $0x328] sm:$0xff] }
 0x12d   :  { %4171 = vmatmul.mubr.bf16.gmra.mrb[20].mxu1 %v797_v21  ;;  %v7987_v21 = vld [vmem:[#allocation6 + $0x314] ss:$8 sps:$4 sm:$0xff]   ;;  %v672_v24 = vpack.c.bf16 %v224_v16, %v192_v15 }
 0x12e   :  { %4962 = vmatmul.mubr.bf16.gmra.mrb[20].mxu0 %v811_v22  ;;  %4222 = vmatpush1.bf16.msra.mxu1 %v7943_v17  ;;  %v639_v17 = vpack.c.bf16 %v159_v8, %v127_v7  ;;  %v7990_v22 = vld [vmem:[#allocation6 + $0xa14] ss:$8 sps:$4 sm:$0xff]   ;;  %v8017_v7 = vld [vmem:[#allocation6 + $0x364] ss:$8 sps:$4 sm:$0xff]  }
 0x12f   :  { %5013 = vmatpush1.bf16.msra.mxu0 %v7946_v18  ;;  %4223 = vmatprep.subr.bf16.mxu1 %v7951_v25  ;;  %v653_v18 = vpack.c.bf16 %v173_v10, %v141_v9  ;;  %v686_v25 = vpack.c.bf16 %v238_v20, %v206_v19  ;;  %v8020_v8 = vld [vmem:[#allocation6 + $0xa64] ss:$8 sps:$4 sm:$0xff]   ;;  %v8015_v9 = vld [vmem:[#allocation6 + $0x360] ss:$8 sps:$4 sm:$0xff]   ;;  %v398_v15 = vld [vmem:[#allocation3 + $0x898] sm:$0xff] }
 0x130   :  { %5014 = vmatprep.subr.bf16.mxu0 %v7954_v26  ;;  %4180 = vmatprep.mubr.bf16.mxu1 %v830_v28  ;;  %v7988_v26 = vld [vmem:[#allocation6 + $0xa10] ss:$8 sps:$4 sm:$0xff]   ;;  %v223_v28 = vld [vmem:[#allocation3 + $0x320] sm:$0xff] }
 0x131   :  { %4971 = vmatprep.mubr.bf16.mxu0 %v844_v29  ;;  %v205_v29 = vld [vmem:[#allocation3 + $0x290] sm:$0xff]  ;;  %v8018_v10 = vld [vmem:[#allocation6 + $0xa60] ss:$8 sps:$4 sm:$0xff]   ;;  %v430_v16 = vld [vmem:[#allocation3 + $0x998] sm:$0xff] }
 0x132   :  { %4224 = vmatpush1.bf16.msra.mxu1 %v7949_v27  ;;  %v191_v27 = vld [vmem:[#allocation3 + $0x220] sm:$0xff]  ;;  %v8021_v19 = vld [vmem:[#allocation6 + $0x370] ss:$8 sps:$4 sm:$0xff]  }
 0x133   :  { %5015 = vmatpush1.bf16.msra.mxu0 %v7952_v30  ;;  %4225 = vmatprep.subr.bf16.mxu1 %v7957_v35  ;;  %v237_v30 = vld [vmem:[#allocation3 + $0x390] sm:$0xff]  ;;  %v256_v35 = vld [vmem:[#allocation3 + $0x428] sm:$0xff] }
 0x134   :  { %5016 = vmatprep.subr.bf16.mxu0 %v7960_v36  ;;  %v288_v36 = vld [vmem:[#allocation3 + $0x528] sm:$0xff] }
 0x135   :  { %4181 = vmatmul.mubr.bf16.gmra.mrb[24].mxu1 %v829_v41  ;;  %v7999_v41 = vld [vmem:[#allocation6 + $0x334] ss:$8 sps:$4 sm:$0xff]   ;;  %v704_v44 = vpack.c.bf16 %v288_v36, %v256_v35 }
 0x136   :  { %4972 = vmatmul.mubr.bf16.gmra.mrb[24].mxu0 %v843_v42  ;;  %4226 = vmatpush1.bf16.msra.mxu1 %v7955_v37  ;;  %v671_v37 = vpack.c.bf16 %v223_v28, %v191_v27  ;;  %v8002_v42 = vld [vmem:[#allocation6 + $0xa34] ss:$8 sps:$4 sm:$0xff]   ;;  %v8029_v27 = vld [vmem:[#allocation6 + $0x384] ss:$8 sps:$4 sm:$0xff]  }
 0x137   :  { %5017 = vmatpush1.bf16.msra.mxu0 %v7958_v38  ;;  %4227 = vmatprep.subr.bf16.mxu1 %v7963_v45  ;;  %v685_v38 = vpack.c.bf16 %v237_v30, %v205_v29  ;;  %v718_v45 = vpack.c.bf16 %v302_v40, %v270_v39  ;;  %v8032_v28 = vld [vmem:[#allocation6 + $0xa84] ss:$8 sps:$4 sm:$0xff]   ;;  %v8027_v29 = vld [vmem:[#allocation6 + $0x380] ss:$8 sps:$4 sm:$0xff]   ;;  %v462_v35 = vld [vmem:[#allocation3 + $0xa98] sm:$0xff] }
 0x138   :  { %5018 = vmatprep.subr.bf16.mxu0 %v7966_v46  ;;  %4190 = vmatprep.mubr.bf16.mxu1 %v862_v48  ;;  %v8000_v46 = vld [vmem:[#allocation6 + $0xa30] ss:$8 sps:$4 sm:$0xff]   ;;  %v287_v48 = vld [vmem:[#allocation3 + $0x520] sm:$0xff] }
 0x139   :  { %4981 = vmatprep.mubr.bf16.mxu0 %v876_v49  ;;  %v269_v49 = vld [vmem:[#allocation3 + $0x490] sm:$0xff]  ;;  %v8030_v30 = vld [vmem:[#allocation6 + $0xa80] ss:$8 sps:$4 sm:$0xff]   ;;  %v494_v36 = vld [vmem:[#allocation3 + $0xb98] sm:$0xff] }
 0x13a   :  { %4228 = vmatpush1.bf16.msra.mxu1 %v7961_v47  ;;  %v255_v47 = vld [vmem:[#allocation3 + $0x420] sm:$0xff]  ;;  %v8033_v39 = vld [vmem:[#allocation6 + $0x390] ss:$8 sps:$4 sm:$0xff]  }
 0x13b   :  { %5019 = vmatpush1.bf16.msra.mxu0 %v7964_v50  ;;  %4229 = vmatprep.subr.bf16.mxu1 %v7969_v55  ;;  %v301_v50 = vld [vmem:[#allocation3 + $0x590] sm:$0xff]  ;;  %v320_v55 = vld [vmem:[#allocation3 + $0x628] sm:$0xff] }
 0x13c   :  { %5020 = vmatprep.subr.bf16.mxu0 %v7972_v56  ;;  %v352_v56 = vld [vmem:[#allocation3 + $0x728] sm:$0xff] }
 0x13d   :  { %4191 = vmatmul.mubr.bf16.gmra.mrb[28].mxu1 %v861_v61  ;;  %v8011_v61 = vld [vmem:[#allocation6 + $0x354] ss:$8 sps:$4 sm:$0xff]   ;;  %v736_v0 = vpack.c.bf16 %v352_v56, %v320_v55 }
 0x13e   :  { %4982 = vmatmul.mubr.bf16.gmra.mrb[28].mxu0 %v875_v62  ;;  %4230 = vmatpush1.bf16.msra.mxu1 %v7967_v57  ;;  %v703_v57 = vpack.c.bf16 %v287_v48, %v255_v47  ;;  %v8014_v62 = vld [vmem:[#allocation6 + $0xa54] ss:$8 sps:$4 sm:$0xff]   ;;  %v8041_v47 = vld [vmem:[#allocation6 + $0x3a4] ss:$8 sps:$4 sm:$0xff]  }
 0x13f   :  { %5021 = vmatpush1.bf16.msra.mxu0 %v7970_v58  ;;  %4231 = vmatprep.subr.bf16.mxu1 %v7975_v1  ;;  %v717_v58 = vpack.c.bf16 %v301_v50, %v269_v49  ;;  %v750_v1 = vpack.c.bf16 %v366_v60, %v334_v59  ;;  %v8044_v48 = vld [vmem:[#allocation6 + $0xaa4] ss:$8 sps:$4 sm:$0xff]   ;;  %v8039_v49 = vld [vmem:[#allocation6 + $0x3a0] ss:$8 sps:$4 sm:$0xff]   ;;  %v526_v55 = vld [vmem:[#allocation3 + $0xc98] sm:$0xff] }
 0x140   :  { %5022 = vmatprep.subr.bf16.mxu0 %v7978_v2  ;;  %4233 = vmatprep.mubr.bf16.mxu1 %v640_v4  ;;  %v8012_v2 = vld [vmem:[#allocation6 + $0xa50] ss:$8 sps:$4 sm:$0xff]   ;;  %v351_v4 = vld [vmem:[#allocation3 + $0x720] sm:$0xff] }
 0x141   :  { %5024 = vmatprep.mubr.bf16.mxu0 %v654_v5  ;;  %v333_v5 = vld [vmem:[#allocation3 + $0x690] sm:$0xff]  ;;  %v8042_v50 = vld [vmem:[#allocation6 + $0xaa0] ss:$8 sps:$4 sm:$0xff]   ;;  %v558_v56 = vld [vmem:[#allocation3 + $0xd98] sm:$0xff] }
 0x142   :  { %4232 = vmatpush1.bf16.msra.mxu1 %v7973_v3  ;;  %v319_v3 = vld [vmem:[#allocation3 + $0x620] sm:$0xff]  ;;  %v8045_v59 = vld [vmem:[#allocation6 + $0x3b0] ss:$8 sps:$4 sm:$0xff]  }
 0x143   :  { %5023 = vmatpush1.bf16.msra.mxu0 %v7976_v6  ;;  %4314 = vmatprep.subr.bf16.mxu1 %v7981_v11  ;;  %v365_v6 = vld [vmem:[#allocation3 + $0x790] sm:$0xff]  ;;  %v384_v11 = vld [vmem:[#allocation3 + $0x828] sm:$0xff] }
 0x144   :  { %5105 = vmatprep.subr.bf16.mxu0 %v7984_v12  ;;  %v416_v12 = vld [vmem:[#allocation3 + $0x928] sm:$0xff] }
 0x145   :  { %4234 = vmatmul.mubr.bf16.vlgmr.msra.gmra.mrb[0].mxu1 %v639_v17  ;;  %v8023_v17 = vld [vmem:[#allocation6 + $0x374] ss:$8 sps:$4 sm:$0xff]   ;;  %v768_v20 = vpack.c.bf16 %v416_v12, %v384_v11 }
 0x146   :  { %5025 = vmatmul.mubr.bf16.vlgmr.msra.gmra.mrb[0].mxu0 %v653_v18  ;;  %4315 = vmatpush1.bf16.msra.mxu1 %v7979_v13  ;;  %v735_v13 = vpack.c.bf16 %v351_v4, %v319_v3  ;;  %v8026_v18 = vld [vmem:[#allocation6 + $0xa74] ss:$8 sps:$4 sm:$0xff]   ;;  %v8053_v3 = vld [vmem:[#allocation6 + $0x3c4] ss:$8 sps:$4 sm:$0xff]  }
 0x147   :  { %5106 = vmatpush1.bf16.msra.mxu0 %v7982_v14  ;;  %4316 = vmatprep.subr.bf16.mxu1 %v7987_v21  ;;  %v749_v14 = vpack.c.bf16 %v365_v6, %v333_v5  ;;  %v782_v21 = vpack.c.bf16 %v430_v16, %v398_v15  ;;  %v8056_v4 = vld [vmem:[#allocation6 + $0xac4] ss:$8 sps:$4 sm:$0xff]   ;;  %v8051_v5 = vld [vmem:[#allocation6 + $0x3c0] ss:$8 sps:$4 sm:$0xff]   ;;  %v590_v11 = vld [vmem:[#allocation3 + $0xe98] sm:$0xff] }
 0x148   :  { %5107 = vmatprep.subr.bf16.mxu0 %v7990_v22  ;;  %4243 = vmatprep.mubr.bf16.mxu1 %v672_v24  ;;  %v8024_v22 = vld [vmem:[#allocation6 + $0xa70] ss:$8 sps:$4 sm:$0xff]   ;;  %v415_v24 = vld [vmem:[#allocation3 + $0x920] sm:$0xff] }
 0x149   :  { %5034 = vmatprep.mubr.bf16.mxu0 %v686_v25  ;;  %v397_v25 = vld [vmem:[#allocation3 + $0x890] sm:$0xff]  ;;  %v8054_v6 = vld [vmem:[#allocation6 + $0xac0] ss:$8 sps:$4 sm:$0xff]   ;;  %v622_v12 = vld [vmem:[#allocation3 + $0xf98] sm:$0xff] }
 0x14a   :  { %4317 = vmatpush1.bf16.msra.mxu1 %v7985_v23  ;;  %v383_v23 = vld [vmem:[#allocation3 + $0x820] sm:$0xff]  ;;  %v8057_v15 = vld [vmem:[#allocation6 + $0x3d0] ss:$8 sps:$4 sm:$0xff]  }
 0x14b   :  { %5108 = vmatpush1.bf16.msra.mxu0 %v7988_v26  ;;  %4318 = vmatprep.subr.bf16.mxu1 %v7993_v31  ;;  %v429_v26 = vld [vmem:[#allocation3 + $0x990] sm:$0xff]  ;;  %v448_v31 = vld [vmem:[#allocation3 + $0xa28] sm:$0xff] }
 0x14c   :  { %5109 = vmatprep.subr.bf16.mxu0 %v7996_v32  ;;  %v480_v32 = vld [vmem:[#allocation3 + $0xb28] sm:$0xff] }
 0x14d   :  { %4244 = vmatmul.mubr.bf16.gmra.mrb[4].mxu1 %v671_v37  ;;  %v8035_v37 = vld [vmem:[#allocation6 + $0x394] ss:$8 sps:$4 sm:$0xff]   ;;  %v800_v40 = vpack.c.bf16 %v480_v32, %v448_v31  ;;  %v144_v31 = vld [vmem:[#allocation3 + $0xa8] sm:$0xff] }
 0x14e   :  { %5035 = vmatmul.mubr.bf16.gmra.mrb[4].mxu0 %v685_v38  ;;  %4319 = vmatpush1.bf16.msra.mxu1 %v7991_v33  ;;  %v767_v33 = vpack.c.bf16 %v415_v24, %v383_v23  ;;  %v8038_v38 = vld [vmem:[#allocation6 + $0xa94] ss:$8 sps:$4 sm:$0xff]   ;;  %v8065_v23 = vld [vmem:[#allocation6 + $0x3e4] ss:$8 sps:$4 sm:$0xff]  }
 0x14f   :  { %5110 = vmatpush1.bf16.msra.mxu0 %v7994_v34  ;;  %4320 = vmatprep.subr.bf16.mxu1 %v7999_v41  ;;  %v781_v34 = vpack.c.bf16 %v429_v26, %v397_v25  ;;  %v814_v41 = vpack.c.bf16 %v494_v36, %v462_v35  ;;  %v8068_v24 = vld [vmem:[#allocation6 + $0xae4] ss:$8 sps:$4 sm:$0xff]   ;;  %v8063_v25 = vld [vmem:[#allocation6 + $0x3e0] ss:$8 sps:$4 sm:$0xff]   ;;  %v8069_v35 = vld [vmem:[#allocation6 + $0x3f0] ss:$8 sps:$4 sm:$0xff]  }
 0x150   :  { %5111 = vmatprep.subr.bf16.mxu0 %v8002_v42  ;;  %4253 = vmatprep.mubr.bf16.mxu1 %v704_v44  ;;  %v8036_v42 = vld [vmem:[#allocation6 + $0xa90] ss:$8 sps:$4 sm:$0xff]   ;;  %v479_v44 = vld [vmem:[#allocation3 + $0xb20] sm:$0xff]  ;;  %v176_v32 = vld [vmem:[#allocation3 + $0x1a8] sm:$0xff] }
 0x151   :  { %5044 = vmatprep.mubr.bf16.mxu0 %v718_v45  ;;  %v461_v45 = vld [vmem:[#allocation3 + $0xa90] sm:$0xff]  ;;  %v8066_v26 = vld [vmem:[#allocation6 + $0xae0] ss:$8 sps:$4 sm:$0xff]  }
 0x152   :  { %4321 = vmatpush1.bf16.msra.mxu1 %v7997_v43  ;;  %v447_v43 = vld [vmem:[#allocation3 + $0xa20] sm:$0xff] }
 0x153   :  { %5112 = vmatpush1.bf16.msra.mxu0 %v8000_v46  ;;  %4322 = vmatprep.subr.bf16.mxu1 %v8005_v51  ;;  %v493_v46 = vld [vmem:[#allocation3 + $0xb90] sm:$0xff]  ;;  %v512_v51 = vld [vmem:[#allocation3 + $0xc28] sm:$0xff] }
 0x154   :  { %5113 = vmatprep.subr.bf16.mxu0 %v8008_v52  ;;  %v544_v52 = vld [vmem:[#allocation3 + $0xd28] sm:$0xff] }
 0x155   :  { %4254 = vmatmul.mubr.bf16.gmra.mrb[8].mxu1 %v703_v57  ;;  %v8047_v57 = vld [vmem:[#allocation6 + $0x3b4] ss:$8 sps:$4 sm:$0xff]   ;;  %v832_v60 = vpack.c.bf16 %v544_v52, %v512_v51  ;;  %v208_v51 = vld [vmem:[#allocation3 + $0x2a8] sm:$0xff] }
 0x156   :  { %5045 = vmatmul.mubr.bf16.gmra.mrb[8].mxu0 %v717_v58  ;;  %4323 = vmatpush1.bf16.msra.mxu1 %v8003_v53  ;;  %v799_v53 = vpack.c.bf16 %v479_v44, %v447_v43  ;;  %v8050_v58 = vld [vmem:[#allocation6 + $0xab4] ss:$8 sps:$4 sm:$0xff]   ;;  %v8077_v43 = vld [vmem:[#allocation6 + $0x404] ss:$8 sps:$4 sm:$0xff]  }
 0x157   :  { %5114 = vmatpush1.bf16.msra.mxu0 %v8006_v54  ;;  %4324 = vmatprep.subr.bf16.mxu1 %v8011_v61  ;;  %v813_v54 = vpack.c.bf16 %v493_v46, %v461_v45  ;;  %v846_v61 = vpack.c.bf16 %v558_v56, %v526_v55  ;;  %v8080_v44 = vld [vmem:[#allocation6 + $0xb04] ss:$8 sps:$4 sm:$0xff]   ;;  %v8075_v45 = vld [vmem:[#allocation6 + $0x400] ss:$8 sps:$4 sm:$0xff]   ;;  %v8081_v55 = vld [vmem:[#allocation6 + $0x410] ss:$8 sps:$4 sm:$0xff]  }
 0x158   :  { %5115 = vmatprep.subr.bf16.mxu0 %v8014_v62  ;;  %4263 = vmatprep.mubr.bf16.mxu1 %v736_v0  ;;  %v8048_v62 = vld [vmem:[#allocation6 + $0xab0] ss:$8 sps:$4 sm:$0xff]   ;;  %v543_v0 = vld [vmem:[#allocation3 + $0xd20] sm:$0xff]  ;;  %v240_v52 = vld [vmem:[#allocation3 + $0x3a8] sm:$0xff] }
 0x159   :  { %5054 = vmatprep.mubr.bf16.mxu0 %v750_v1  ;;  %v525_v1 = vld [vmem:[#allocation3 + $0xc90] sm:$0xff]  ;;  %v8078_v46 = vld [vmem:[#allocation6 + $0xb00] ss:$8 sps:$4 sm:$0xff]  }
 0x15a   :  { %4325 = vmatpush1.bf16.msra.mxu1 %v8009_v63  ;;  %v511_v63 = vld [vmem:[#allocation3 + $0xc20] sm:$0xff] }
 0x15b   :  { %5116 = vmatpush1.bf16.msra.mxu0 %v8012_v2  ;;  %4326 = vmatprep.subr.bf16.mxu1 %v8017_v7  ;;  %v557_v2 = vld [vmem:[#allocation3 + $0xd90] sm:$0xff]  ;;  %v576_v7 = vld [vmem:[#allocation3 + $0xe28] sm:$0xff] }
 0x15c   :  { %5117 = vmatprep.subr.bf16.mxu0 %v8020_v8  ;;  %v608_v8 = vld [vmem:[#allocation3 + $0xf28] sm:$0xff] }
 0x15d   :  { %4264 = vmatmul.mubr.bf16.gmra.mrb[12].mxu1 %v735_v13  ;;  %v8059_v13 = vld [vmem:[#allocation6 + $0x3d4] ss:$8 sps:$4 sm:$0xff]   ;;  %v864_v16 = vpack.c.bf16 %v608_v8, %v576_v7  ;;  %v272_v7 = vld [vmem:[#allocation3 + $0x4a8] sm:$0xff] }
 0x15e   :  { %5055 = vmatmul.mubr.bf16.gmra.mrb[12].mxu0 %v749_v14  ;;  %4327 = vmatpush1.bf16.msra.mxu1 %v8015_v9  ;;  %v831_v9 = vpack.c.bf16 %v543_v0, %v511_v63  ;;  %v8062_v14 = vld [vmem:[#allocation6 + $0xad4] ss:$8 sps:$4 sm:$0xff]   ;;  %v8089_v63 = vld [vmem:[#allocation6 + $0x424] ss:$8 sps:$4 sm:$0xff]  }
 0x15f   :  { %5118 = vmatpush1.bf16.msra.mxu0 %v8018_v10  ;;  %4328 = vmatprep.subr.bf16.mxu1 %v8023_v17  ;;  %v845_v10 = vpack.c.bf16 %v557_v2, %v525_v1  ;;  %v878_v17 = vpack.c.bf16 %v622_v12, %v590_v11  ;;  %v8092_v0 = vld [vmem:[#allocation6 + $0xb24] ss:$8 sps:$4 sm:$0xff]   ;;  %v8087_v1 = vld [vmem:[#allocation6 + $0x420] ss:$8 sps:$4 sm:$0xff]   ;;  %v8093_v11 = vld [vmem:[#allocation6 + $0x430] ss:$8 sps:$4 sm:$0xff]  }
 0x160   :  { %5119 = vmatprep.subr.bf16.mxu0 %v8026_v18  ;;  %4273 = vmatprep.mubr.bf16.mxu1 %v768_v20  ;;  %v8060_v18 = vld [vmem:[#allocation6 + $0xad0] ss:$8 sps:$4 sm:$0xff]   ;;  %v607_v20 = vld [vmem:[#allocation3 + $0xf20] sm:$0xff]  ;;  %v304_v8 = vld [vmem:[#allocation3 + $0x5a8] sm:$0xff] }
 0x161   :  { %5064 = vmatprep.mubr.bf16.mxu0 %v782_v21  ;;  %v589_v21 = vld [vmem:[#allocation3 + $0xe90] sm:$0xff]  ;;  %v8090_v2 = vld [vmem:[#allocation6 + $0xb20] ss:$8 sps:$4 sm:$0xff]  }
 0x162   :  { %4329 = vmatpush1.bf16.msra.mxu1 %v8021_v19  ;;  %v575_v19 = vld [vmem:[#allocation3 + $0xe20] sm:$0xff] }
 0x163   :  { %5120 = vmatpush1.bf16.msra.mxu0 %v8024_v22  ;;  %4330 = vmatprep.subr.bf16.mxu1 %v8029_v27  ;;  %v621_v22 = vld [vmem:[#allocation3 + $0xf90] sm:$0xff]  ;;  %v130_v27 = vld [vmem:[#allocation3 + $0x38] sm:$0xff] }
 0x164   :  { %5121 = vmatprep.subr.bf16.mxu0 %v8032_v28  ;;  %v162_v28 = vld [vmem:[#allocation3 + $0x138] sm:$0xff] }
 0x165   :  { %4274 = vmatmul.mubr.bf16.gmra.mrb[16].mxu1 %v767_v33  ;;  %v8071_v33 = vld [vmem:[#allocation6 + $0x3f4] ss:$8 sps:$4 sm:$0xff]   ;;  %v642_v36 = vpack.c.bf16 %v162_v28, %v130_v27  ;;  %v336_v27 = vld [vmem:[#allocation3 + $0x6a8] sm:$0xff] }
 0x166   :  { %5065 = vmatmul.mubr.bf16.gmra.mrb[16].mxu0 %v781_v34  ;;  %4331 = vmatpush1.bf16.msra.mxu1 %v8027_v29  ;;  %v863_v29 = vpack.c.bf16 %v607_v20, %v575_v19  ;;  %v8074_v34 = vld [vmem:[#allocation6 + $0xaf4] ss:$8 sps:$4 sm:$0xff]   ;;  %v8101_v19 = vld [vmem:[#allocation6 + $0x444] ss:$8 sps:$4 sm:$0xff]  }
 0x167   :  { %5122 = vmatpush1.bf16.msra.mxu0 %v8030_v30  ;;  %4332 = vmatprep.subr.bf16.mxu1 %v8035_v37  ;;  %v877_v30 = vpack.c.bf16 %v621_v22, %v589_v21  ;;  %v656_v37 = vpack.c.bf16 %v176_v32, %v144_v31  ;;  %v8104_v20 = vld [vmem:[#allocation6 + $0xb44] ss:$8 sps:$4 sm:$0xff]   ;;  %v8099_v21 = vld [vmem:[#allocation6 + $0x440] ss:$8 sps:$4 sm:$0xff]   ;;  %v8105_v31 = vld [vmem:[#allocation6 + $0x450] ss:$8 sps:$4 sm:$0xff]  }
 0x168   :  { %5123 = vmatprep.subr.bf16.mxu0 %v8038_v38  ;;  %4283 = vmatprep.mubr.bf16.mxu1 %v800_v40  ;;  %v8072_v38 = vld [vmem:[#allocation6 + $0xaf0] ss:$8 sps:$4 sm:$0xff]   ;;  %v8102_v22 = vld [vmem:[#allocation6 + $0xb40] ss:$8 sps:$4 sm:$0xff]  }
 0x169   :  { %5074 = vmatprep.mubr.bf16.mxu0 %v814_v41  ;;  %v161_v40 = vld [vmem:[#allocation3 + $0x130] sm:$0xff]  ;;  %v143_v41 = vld [vmem:[#allocation3 + $0xa0] sm:$0xff]  ;;  %v368_v28 = vld [vmem:[#allocation3 + $0x7a8] sm:$0xff] }
 0x16a   :  { %4333 = vmatpush1.bf16.msra.mxu1 %v8033_v39  ;;  %v129_v39 = vld [vmem:[#allocation3 + $0x30] sm:$0xff] }
 0x16b   :  { %5124 = vmatpush1.bf16.msra.mxu0 %v8036_v42  ;;  %4334 = vmatprep.subr.bf16.mxu1 %v8041_v47  ;;  %v175_v42 = vld [vmem:[#allocation3 + $0x1a0] sm:$0xff]  ;;  %v194_v47 = vld [vmem:[#allocation3 + $0x238] sm:$0xff] }
 0x16c   :  { %5125 = vmatprep.subr.bf16.mxu0 %v8044_v48  ;;  %v226_v48 = vld [vmem:[#allocation3 + $0x338] sm:$0xff] }
 0x16d   :  { %4284 = vmatmul.mubr.bf16.gmra.mrb[20].mxu1 %v799_v53  ;;  %v8083_v53 = vld [vmem:[#allocation6 + $0x414] ss:$8 sps:$4 sm:$0xff]   ;;  %v674_v56 = vpack.c.bf16 %v226_v48, %v194_v47  ;;  %v400_v47 = vld [vmem:[#allocation3 + $0x8a8] sm:$0xff] }
 0x16e   :  { %5075 = vmatmul.mubr.bf16.gmra.mrb[20].mxu0 %v813_v54  ;;  %4335 = vmatpush1.bf16.msra.mxu1 %v8039_v49  ;;  %v641_v49 = vpack.c.bf16 %v161_v40, %v129_v39  ;;  %v8086_v54 = vld [vmem:[#allocation6 + $0xb14] ss:$8 sps:$4 sm:$0xff]   ;;  %v8113_v39 = vld [vmem:[#allocation6 + $0x464] ss:$8 sps:$4 sm:$0xff]  }
 0x16f   :  { %5126 = vmatpush1.bf16.msra.mxu0 %v8042_v50  ;;  %4336 = vmatprep.subr.bf16.mxu1 %v8047_v57  ;;  %v655_v50 = vpack.c.bf16 %v175_v42, %v143_v41  ;;  %v688_v57 = vpack.c.bf16 %v240_v52, %v208_v51  ;;  %v8116_v40 = vld [vmem:[#allocation6 + $0xb64] ss:$8 sps:$4 sm:$0xff]   ;;  %v8111_v41 = vld [vmem:[#allocation6 + $0x460] ss:$8 sps:$4 sm:$0xff]   ;;  %v8117_v51 = vld [vmem:[#allocation6 + $0x470] ss:$8 sps:$4 sm:$0xff]  }
 0x170   :  { %5127 = vmatprep.subr.bf16.mxu0 %v8050_v58  ;;  %4293 = vmatprep.mubr.bf16.mxu1 %v832_v60  ;;  %v8084_v58 = vld [vmem:[#allocation6 + $0xb10] ss:$8 sps:$4 sm:$0xff]   ;;  %v8114_v42 = vld [vmem:[#allocation6 + $0xb60] ss:$8 sps:$4 sm:$0xff]  }
 0x171   :  { %5084 = vmatprep.mubr.bf16.mxu0 %v846_v61  ;;  %v225_v60 = vld [vmem:[#allocation3 + $0x330] sm:$0xff]  ;;  %v207_v61 = vld [vmem:[#allocation3 + $0x2a0] sm:$0xff]  ;;  %v432_v48 = vld [vmem:[#allocation3 + $0x9a8] sm:$0xff] }
 0x172   :  { %4337 = vmatpush1.bf16.msra.mxu1 %v8045_v59  ;;  %v193_v59 = vld [vmem:[#allocation3 + $0x230] sm:$0xff] }
 0x173   :  { %5128 = vmatpush1.bf16.msra.mxu0 %v8048_v62  ;;  %4338 = vmatprep.subr.bf16.mxu1 %v8053_v3  ;;  %v239_v62 = vld [vmem:[#allocation3 + $0x3a0] sm:$0xff]  ;;  %v258_v3 = vld [vmem:[#allocation3 + $0x438] sm:$0xff] }
 0x174   :  { %5129 = vmatprep.subr.bf16.mxu0 %v8056_v4  ;;  %v290_v4 = vld [vmem:[#allocation3 + $0x538] sm:$0xff] }
 0x175   :  { %4294 = vmatmul.mubr.bf16.gmra.mrb[24].mxu1 %v831_v9  ;;  %v8095_v9 = vld [vmem:[#allocation6 + $0x434] ss:$8 sps:$4 sm:$0xff]   ;;  %v706_v12 = vpack.c.bf16 %v290_v4, %v258_v3  ;;  %v464_v3 = vld [vmem:[#allocation3 + $0xaa8] sm:$0xff] }
 0x176   :  { %5085 = vmatmul.mubr.bf16.gmra.mrb[24].mxu0 %v845_v10  ;;  %4339 = vmatpush1.bf16.msra.mxu1 %v8051_v5  ;;  %v673_v5 = vpack.c.bf16 %v225_v60, %v193_v59  ;;  %v8098_v10 = vld [vmem:[#allocation6 + $0xb34] ss:$8 sps:$4 sm:$0xff]   ;;  %v8125_v59 = vld [vmem:[#allocation6 + $0x484] ss:$8 sps:$4 sm:$0xff]  }
 0x177   :  { %5130 = vmatpush1.bf16.msra.mxu0 %v8054_v6  ;;  %4340 = vmatprep.subr.bf16.mxu1 %v8059_v13  ;;  %v687_v6 = vpack.c.bf16 %v239_v62, %v207_v61  ;;  %v720_v13 = vpack.c.bf16 %v304_v8, %v272_v7  ;;  %v8128_v60 = vld [vmem:[#allocation6 + $0xb84] ss:$8 sps:$4 sm:$0xff]   ;;  %v8123_v61 = vld [vmem:[#allocation6 + $0x480] ss:$8 sps:$4 sm:$0xff]   ;;  %v8129_v7 = vld [vmem:[#allocation6 + $0x490] ss:$8 sps:$4 sm:$0xff]  }
 0x178   :  { %5131 = vmatprep.subr.bf16.mxu0 %v8062_v14  ;;  %4303 = vmatprep.mubr.bf16.mxu1 %v864_v16  ;;  %v8096_v14 = vld [vmem:[#allocation6 + $0xb30] ss:$8 sps:$4 sm:$0xff]   ;;  %v8126_v62 = vld [vmem:[#allocation6 + $0xb80] ss:$8 sps:$4 sm:$0xff]  }
 0x179   :  { %5094 = vmatprep.mubr.bf16.mxu0 %v878_v17  ;;  %v289_v16 = vld [vmem:[#allocation3 + $0x530] sm:$0xff]  ;;  %v271_v17 = vld [vmem:[#allocation3 + $0x4a0] sm:$0xff]  ;;  %v496_v4 = vld [vmem:[#allocation3 + $0xba8] sm:$0xff] }
 0x17a   :  { %4341 = vmatpush1.bf16.msra.mxu1 %v8057_v15  ;;  %v257_v15 = vld [vmem:[#allocation3 + $0x430] sm:$0xff] }
 0x17b   :  { %5132 = vmatpush1.bf16.msra.mxu0 %v8060_v18  ;;  %4342 = vmatprep.subr.bf16.mxu1 %v8065_v23  ;;  %v303_v18 = vld [vmem:[#allocation3 + $0x5a0] sm:$0xff]  ;;  %v322_v23 = vld [vmem:[#allocation3 + $0x638] sm:$0xff] }
 0x17c   :  { %5133 = vmatprep.subr.bf16.mxu0 %v8068_v24  ;;  %v354_v24 = vld [vmem:[#allocation3 + $0x738] sm:$0xff] }
 0x17d   :  { %4304 = vmatmul.mubr.bf16.gmra.mrb[28].mxu1 %v863_v29  ;;  %v8107_v29 = vld [vmem:[#allocation6 + $0x454] ss:$8 sps:$4 sm:$0xff]   ;;  %v738_v32 = vpack.c.bf16 %v354_v24, %v322_v23  ;;  %v528_v23 = vld [vmem:[#allocation3 + $0xca8] sm:$0xff] }
 0x17e   :  { %5095 = vmatmul.mubr.bf16.gmra.mrb[28].mxu0 %v877_v30  ;;  %4343 = vmatpush1.bf16.msra.mxu1 %v8063_v25  ;;  %v705_v25 = vpack.c.bf16 %v289_v16, %v257_v15  ;;  %v8110_v30 = vld [vmem:[#allocation6 + $0xb54] ss:$8 sps:$4 sm:$0xff]   ;;  %v8137_v15 = vld [vmem:[#allocation6 + $0x4a4] ss:$8 sps:$4 sm:$0xff]  }
 0x17f   :  { %5134 = vmatpush1.bf16.msra.mxu0 %v8066_v26  ;;  %4344 = vmatprep.subr.bf16.mxu1 %v8071_v33  ;;  %v719_v26 = vpack.c.bf16 %v303_v18, %v271_v17  ;;  %v752_v33 = vpack.c.bf16 %v368_v28, %v336_v27  ;;  %v8140_v16 = vld [vmem:[#allocation6 + $0xba4] ss:$8 sps:$4 sm:$0xff]   ;;  %v8135_v17 = vld [vmem:[#allocation6 + $0x4a0] ss:$8 sps:$4 sm:$0xff]   ;;  %v8141_v27 = vld [vmem:[#allocation6 + $0x4b0] ss:$8 sps:$4 sm:$0xff]  }
 0x180   :  { %5135 = vmatprep.subr.bf16.mxu0 %v8074_v34  ;;  %4346 = vmatprep.mubr.bf16.mxu1 %v642_v36  ;;  %v8108_v34 = vld [vmem:[#allocation6 + $0xb50] ss:$8 sps:$4 sm:$0xff]   ;;  %v8138_v18 = vld [vmem:[#allocation6 + $0xba0] ss:$8 sps:$4 sm:$0xff]  }
 0x181   :  { %5137 = vmatprep.mubr.bf16.mxu0 %v656_v37  ;;  %v353_v36 = vld [vmem:[#allocation3 + $0x730] sm:$0xff]  ;;  %v335_v37 = vld [vmem:[#allocation3 + $0x6a0] sm:$0xff]  ;;  %v560_v24 = vld [vmem:[#allocation3 + $0xda8] sm:$0xff] }
 0x182   :  { %4345 = vmatpush1.bf16.msra.mxu1 %v8069_v35  ;;  %v321_v35 = vld [vmem:[#allocation3 + $0x630] sm:$0xff] }
 0x183   :  { %5136 = vmatpush1.bf16.msra.mxu0 %v8072_v38  ;;  %4427 = vmatprep.subr.bf16.mxu1 %v8077_v43  ;;  %v367_v38 = vld [vmem:[#allocation3 + $0x7a0] sm:$0xff]  ;;  %v386_v43 = vld [vmem:[#allocation3 + $0x838] sm:$0xff] }
 0x184   :  { %5218 = vmatprep.subr.bf16.mxu0 %v8080_v44  ;;  %v418_v44 = vld [vmem:[#allocation3 + $0x938] sm:$0xff] }
 0x185   :  { %4347 = vmatmul.mubr.bf16.vlgmr.msra.gmra.mrb[0].mxu1 %v641_v49  ;;  %v8119_v49 = vld [vmem:[#allocation6 + $0x474] ss:$8 sps:$4 sm:$0xff]   ;;  %v770_v52 = vpack.c.bf16 %v418_v44, %v386_v43  ;;  %v592_v43 = vld [vmem:[#allocation3 + $0xea8] sm:$0xff] }
 0x186   :  { %5138 = vmatmul.mubr.bf16.vlgmr.msra.gmra.mrb[0].mxu0 %v655_v50  ;;  %4428 = vmatpush1.bf16.msra.mxu1 %v8075_v45  ;;  %v737_v45 = vpack.c.bf16 %v353_v36, %v321_v35  ;;  %v8122_v50 = vld [vmem:[#allocation6 + $0xb74] ss:$8 sps:$4 sm:$0xff]   ;;  %v8149_v35 = vld [vmem:[#allocation6 + $0x4c4] ss:$8 sps:$4 sm:$0xff]  }
 0x187   :  { %5219 = vmatpush1.bf16.msra.mxu0 %v8078_v46  ;;  %4429 = vmatprep.subr.bf16.mxu1 %v8083_v53  ;;  %v751_v46 = vpack.c.bf16 %v367_v38, %v335_v37  ;;  %v784_v53 = vpack.c.bf16 %v432_v48, %v400_v47  ;;  %v8152_v36 = vld [vmem:[#allocation6 + $0xbc4] ss:$8 sps:$4 sm:$0xff]   ;;  %v8147_v37 = vld [vmem:[#allocation6 + $0x4c0] ss:$8 sps:$4 sm:$0xff]   ;;  %v8153_v47 = vld [vmem:[#allocation6 + $0x4d0] ss:$8 sps:$4 sm:$0xff]  }
 0x188   :  { %5220 = vmatprep.subr.bf16.mxu0 %v8086_v54  ;;  %4356 = vmatprep.mubr.bf16.mxu1 %v674_v56  ;;  %v8120_v54 = vld [vmem:[#allocation6 + $0xb70] ss:$8 sps:$4 sm:$0xff]   ;;  %v8150_v38 = vld [vmem:[#allocation6 + $0xbc0] ss:$8 sps:$4 sm:$0xff]  }
 0x189   :  { %5147 = vmatprep.mubr.bf16.mxu0 %v688_v57  ;;  %v417_v56 = vld [vmem:[#allocation3 + $0x930] sm:$0xff]  ;;  %v399_v57 = vld [vmem:[#allocation3 + $0x8a0] sm:$0xff]  ;;  %v624_v44 = vld [vmem:[#allocation3 + $0xfa8] sm:$0xff] }
 0x18a   :  { %4430 = vmatpush1.bf16.msra.mxu1 %v8081_v55  ;;  %v385_v55 = vld [vmem:[#allocation3 + $0x830] sm:$0xff] }
 0x18b   :  { %5221 = vmatpush1.bf16.msra.mxu0 %v8084_v58  ;;  %4431 = vmatprep.subr.bf16.mxu1 %v8089_v63  ;;  %v431_v58 = vld [vmem:[#allocation3 + $0x9a0] sm:$0xff]  ;;  %v450_v63 = vld [vmem:[#allocation3 + $0xa38] sm:$0xff] }
 0x18c   :  { %5222 = vmatprep.subr.bf16.mxu0 %v8092_v0  ;;  %v482_v0 = vld [vmem:[#allocation3 + $0xb38] sm:$0xff] }
 0x18d   :  { %4357 = vmatmul.mubr.bf16.gmra.mrb[4].mxu1 %v673_v5  ;;  %v8131_v5 = vld [vmem:[#allocation6 + $0x494] ss:$8 sps:$4 sm:$0xff]   ;;  %v802_v8 = vpack.c.bf16 %v482_v0, %v450_v63 }
 0x18e   :  { %5148 = vmatmul.mubr.bf16.gmra.mrb[4].mxu0 %v687_v6  ;;  %4432 = vmatpush1.bf16.msra.mxu1 %v8087_v1  ;;  %v769_v1 = vpack.c.bf16 %v417_v56, %v385_v55  ;;  %v8134_v6 = vld [vmem:[#allocation6 + $0xb94] ss:$8 sps:$4 sm:$0xff]   ;;  %v8161_v55 = vld [vmem:[#allocation6 + $0x4e4] ss:$8 sps:$4 sm:$0xff]  }
 0x18f   :  { %5223 = vmatpush1.bf16.msra.mxu0 %v8090_v2  ;;  %4433 = vmatprep.subr.bf16.mxu1 %v8095_v9  ;;  %v783_v2 = vpack.c.bf16 %v431_v58, %v399_v57  ;;  %v816_v9 = vpack.c.bf16 %v496_v4, %v464_v3  ;;  %v8164_v56 = vld [vmem:[#allocation6 + $0xbe4] ss:$8 sps:$4 sm:$0xff]   ;;  %v8159_v57 = vld [vmem:[#allocation6 + $0x4e0] ss:$8 sps:$4 sm:$0xff]   ;;  %v146_v63 = vld [vmem:[#allocation3 + $0xb8] sm:$0xff] }
 0x190   :  { %5224 = vmatprep.subr.bf16.mxu0 %v8098_v10  ;;  %4366 = vmatprep.mubr.bf16.mxu1 %v706_v12  ;;  %v8132_v10 = vld [vmem:[#allocation6 + $0xb90] ss:$8 sps:$4 sm:$0xff]   ;;  %v8162_v58 = vld [vmem:[#allocation6 + $0xbe0] ss:$8 sps:$4 sm:$0xff]  }
 0x191   :  { %5157 = vmatprep.mubr.bf16.mxu0 %v720_v13  ;;  %v481_v12 = vld [vmem:[#allocation3 + $0xb30] sm:$0xff]  ;;  %v463_v13 = vld [vmem:[#allocation3 + $0xaa0] sm:$0xff]  ;;  %v178_v0 = vld [vmem:[#allocation3 + $0x1b8] sm:$0xff] }
 0x192   :  { %4434 = vmatpush1.bf16.msra.mxu1 %v8093_v11  ;;  %v449_v11 = vld [vmem:[#allocation3 + $0xa30] sm:$0xff] }
 0x193   :  { %5225 = vmatpush1.bf16.msra.mxu0 %v8096_v14  ;;  %4435 = vmatprep.subr.bf16.mxu1 %v8101_v19  ;;  %v495_v14 = vld [vmem:[#allocation3 + $0xba0] sm:$0xff]  ;;  %v514_v19 = vld [vmem:[#allocation3 + $0xc38] sm:$0xff] }
 0x194   :  { %5226 = vmatprep.subr.bf16.mxu0 %v8104_v20  ;;  %v546_v20 = vld [vmem:[#allocation3 + $0xd38] sm:$0xff] }
 0x195   :  { %4367 = vmatmul.mubr.bf16.gmra.mrb[8].mxu1 %v705_v25  ;;  %v8143_v25 = vld [vmem:[#allocation6 + $0x4b4] ss:$8 sps:$4 sm:$0xff]   ;;  %v834_v28 = vpack.c.bf16 %v546_v20, %v514_v19  ;;  %v8165_v3 = vld [vmem:[#allocation6 + $0x4f0] ss:$8 sps:$4 sm:$0xff]  }
 0x196   :  { %5158 = vmatmul.mubr.bf16.gmra.mrb[8].mxu0 %v719_v26  ;;  %4436 = vmatpush1.bf16.msra.mxu1 %v8099_v21  ;;  %v801_v21 = vpack.c.bf16 %v481_v12, %v449_v11  ;;  %v8146_v26 = vld [vmem:[#allocation6 + $0xbb4] ss:$8 sps:$4 sm:$0xff]   ;;  %v8173_v11 = vld [vmem:[#allocation6 + $0x504] ss:$8 sps:$4 sm:$0xff]  }
 0x197   :  { %5227 = vmatpush1.bf16.msra.mxu0 %v8102_v22  ;;  %4437 = vmatprep.subr.bf16.mxu1 %v8107_v29  ;;  %v815_v22 = vpack.c.bf16 %v495_v14, %v463_v13  ;;  %v848_v29 = vpack.c.bf16 %v560_v24, %v528_v23  ;;  %v8176_v12 = vld [vmem:[#allocation6 + $0xc04] ss:$8 sps:$4 sm:$0xff]   ;;  %v8171_v13 = vld [vmem:[#allocation6 + $0x500] ss:$8 sps:$4 sm:$0xff]   ;;  %v210_v19 = vld [vmem:[#allocation3 + $0x2b8] sm:$0xff] }
 0x198   :  { %5228 = vmatprep.subr.bf16.mxu0 %v8110_v30  ;;  %4376 = vmatprep.mubr.bf16.mxu1 %v738_v32  ;;  %v8144_v30 = vld [vmem:[#allocation6 + $0xbb0] ss:$8 sps:$4 sm:$0xff]   ;;  %v8174_v14 = vld [vmem:[#allocation6 + $0xc00] ss:$8 sps:$4 sm:$0xff]  }
 0x199   :  { %5167 = vmatprep.mubr.bf16.mxu0 %v752_v33  ;;  %v545_v32 = vld [vmem:[#allocation3 + $0xd30] sm:$0xff]  ;;  %v527_v33 = vld [vmem:[#allocation3 + $0xca0] sm:$0xff]  ;;  %v242_v20 = vld [vmem:[#allocation3 + $0x3b8] sm:$0xff] }
 0x19a   :  { %4438 = vmatpush1.bf16.msra.mxu1 %v8105_v31  ;;  %v513_v31 = vld [vmem:[#allocation3 + $0xc30] sm:$0xff] }
 0x19b   :  { %5229 = vmatpush1.bf16.msra.mxu0 %v8108_v34  ;;  %4439 = vmatprep.subr.bf16.mxu1 %v8113_v39  ;;  %v559_v34 = vld [vmem:[#allocation3 + $0xda0] sm:$0xff]  ;;  %v578_v39 = vld [vmem:[#allocation3 + $0xe38] sm:$0xff] }
 0x19c   :  { %5230 = vmatprep.subr.bf16.mxu0 %v8116_v40  ;;  %v610_v40 = vld [vmem:[#allocation3 + $0xf38] sm:$0xff] }
 0x19d   :  { %4377 = vmatmul.mubr.bf16.gmra.mrb[12].mxu1 %v737_v45  ;;  %v8155_v45 = vld [vmem:[#allocation6 + $0x4d4] ss:$8 sps:$4 sm:$0xff]   ;;  %v866_v48 = vpack.c.bf16 %v610_v40, %v578_v39  ;;  %v8177_v23 = vld [vmem:[#allocation6 + $0x510] ss:$8 sps:$4 sm:$0xff]  }
 0x19e   :  { %5168 = vmatmul.mubr.bf16.gmra.mrb[12].mxu0 %v751_v46  ;;  %4440 = vmatpush1.bf16.msra.mxu1 %v8111_v41  ;;  %v833_v41 = vpack.c.bf16 %v545_v32, %v513_v31  ;;  %v8158_v46 = vld [vmem:[#allocation6 + $0xbd4] ss:$8 sps:$4 sm:$0xff]   ;;  %v8185_v31 = vld [vmem:[#allocation6 + $0x524] ss:$8 sps:$4 sm:$0xff]  }
 0x19f   :  { %5231 = vmatpush1.bf16.msra.mxu0 %v8114_v42  ;;  %4441 = vmatprep.subr.bf16.mxu1 %v8119_v49  ;;  %v847_v42 = vpack.c.bf16 %v559_v34, %v527_v33  ;;  %v880_v49 = vpack.c.bf16 %v624_v44, %v592_v43  ;;  %v8188_v32 = vld [vmem:[#allocation6 + $0xc24] ss:$8 sps:$4 sm:$0xff]   ;;  %v8183_v33 = vld [vmem:[#allocation6 + $0x520] ss:$8 sps:$4 sm:$0xff]   ;;  %v274_v39 = vld [vmem:[#allocation3 + $0x4b8] sm:$0xff] }
 0x1a0   :  { %5232 = vmatprep.subr.bf16.mxu0 %v8122_v50  ;;  %4386 = vmatprep.mubr.bf16.mxu1 %v770_v52  ;;  %v8156_v50 = vld [vmem:[#allocation6 + $0xbd0] ss:$8 sps:$4 sm:$0xff]   ;;  %v8186_v34 = vld [vmem:[#allocation6 + $0xc20] ss:$8 sps:$4 sm:$0xff]  }
 0x1a1   :  { %5177 = vmatprep.mubr.bf16.mxu0 %v784_v53  ;;  %v609_v52 = vld [vmem:[#allocation3 + $0xf30] sm:$0xff]  ;;  %v591_v53 = vld [vmem:[#allocation3 + $0xea0] sm:$0xff]  ;;  %v306_v40 = vld [vmem:[#allocation3 + $0x5b8] sm:$0xff] }
 0x1a2   :  { %4442 = vmatpush1.bf16.msra.mxu1 %v8117_v51  ;;  %v577_v51 = vld [vmem:[#allocation3 + $0xe30] sm:$0xff] }
 0x1a3   :  { %5233 = vmatpush1.bf16.msra.mxu0 %v8120_v54  ;;  %4443 = vmatprep.subr.bf16.mxu1 %v8125_v59  ;;  %v623_v54 = vld [vmem:[#allocation3 + $0xfa0] sm:$0xff]  ;;  %v132_v59 = vld [vmem:[#allocation3 + $0x48] sm:$0xff]  ;;  %v8189_v43 = vld [vmem:[#allocation6 + $0x530] ss:$8 sps:$4 sm:$0xff]  }
 0x1a4   :  { %5234 = vmatprep.subr.bf16.mxu0 %v8128_v60  ;;  %v164_v60 = vld [vmem:[#allocation3 + $0x148] sm:$0xff] }
 0x1a5   :  { %4387 = vmatmul.mubr.bf16.gmra.mrb[16].mxu1 %v769_v1  ;;  %v8167_v1 = vld [vmem:[#allocation6 + $0x4f4] ss:$8 sps:$4 sm:$0xff]   ;;  %v644_v4 = vpack.c.bf16 %v164_v60, %v132_v59 }
 0x1a6   :  { %5178 = vmatmul.mubr.bf16.gmra.mrb[16].mxu0 %v783_v2  ;;  %4444 = vmatpush1.bf16.msra.mxu1 %v8123_v61  ;;  %v865_v61 = vpack.c.bf16 %v609_v52, %v577_v51  ;;  %v8170_v2 = vld [vmem:[#allocation6 + $0xbf4] ss:$8 sps:$4 sm:$0xff]   ;;  %v8197_v51 = vld [vmem:[#allocation6 + $0x544] ss:$8 sps:$4 sm:$0xff]  }
 0x1a7   :  { %5235 = vmatpush1.bf16.msra.mxu0 %v8126_v62  ;;  %4445 = vmatprep.subr.bf16.mxu1 %v8131_v5  ;;  %v879_v62 = vpack.c.bf16 %v623_v54, %v591_v53  ;;  %v658_v5 = vpack.c.bf16 %v178_v0, %v146_v63  ;;  %v8200_v52 = vld [vmem:[#allocation6 + $0xc44] ss:$8 sps:$4 sm:$0xff]   ;;  %v8195_v53 = vld [vmem:[#allocation6 + $0x540] ss:$8 sps:$4 sm:$0xff]   ;;  %v338_v59 = vld [vmem:[#allocation3 + $0x6b8] sm:$0xff] }
 0x1a8   :  { %5236 = vmatprep.subr.bf16.mxu0 %v8134_v6  ;;  %4396 = vmatprep.mubr.bf16.mxu1 %v802_v8  ;;  %v8168_v6 = vld [vmem:[#allocation6 + $0xbf0] ss:$8 sps:$4 sm:$0xff]   ;;  %v163_v8 = vld [vmem:[#allocation3 + $0x140] sm:$0xff] }
 0x1a9   :  { %5187 = vmatprep.mubr.bf16.mxu0 %v816_v9  ;;  %v145_v9 = vld [vmem:[#allocation3 + $0xb0] sm:$0xff]  ;;  %v8198_v54 = vld [vmem:[#allocation6 + $0xc40] ss:$8 sps:$4 sm:$0xff]   ;;  %v370_v60 = vld [vmem:[#allocation3 + $0x7b8] sm:$0xff] }
 0x1aa   :  { %4446 = vmatpush1.bf16.msra.mxu1 %v8129_v7  ;;  %v131_v7 = vld [vmem:[#allocation3 + $0x40] sm:$0xff]  ;;  %v8201_v63 = vld [vmem:[#allocation6 + $0x550] ss:$8 sps:$4 sm:$0xff]  }
 0x1ab   :  { %5237 = vmatpush1.bf16.msra.mxu0 %v8132_v10  ;;  %4447 = vmatprep.subr.bf16.mxu1 %v8137_v15  ;;  %v177_v10 = vld [vmem:[#allocation3 + $0x1b0] sm:$0xff]  ;;  %v196_v15 = vld [vmem:[#allocation3 + $0x248] sm:$0xff] }
 0x1ac   :  { %5238 = vmatprep.subr.bf16.mxu0 %v8140_v16  ;;  %v228_v16 = vld [vmem:[#allocation3 + $0x348] sm:$0xff] }
 0x1ad   :  { %4397 = vmatmul.mubr.bf16.gmra.mrb[20].mxu1 %v801_v21  ;;  %v8179_v21 = vld [vmem:[#allocation6 + $0x514] ss:$8 sps:$4 sm:$0xff]   ;;  %v676_v24 = vpack.c.bf16 %v228_v16, %v196_v15 }
 0x1ae   :  { %5188 = vmatmul.mubr.bf16.gmra.mrb[20].mxu0 %v815_v22  ;;  %4448 = vmatpush1.bf16.msra.mxu1 %v8135_v17  ;;  %v643_v17 = vpack.c.bf16 %v163_v8, %v131_v7  ;;  %v8182_v22 = vld [vmem:[#allocation6 + $0xc14] ss:$8 sps:$4 sm:$0xff]   ;;  %v8209_v7 = vld [vmem:[#allocation6 + $0x564] ss:$8 sps:$4 sm:$0xff]  }
 0x1af   :  { %5239 = vmatpush1.bf16.msra.mxu0 %v8138_v18  ;;  %4449 = vmatprep.subr.bf16.mxu1 %v8143_v25  ;;  %v657_v18 = vpack.c.bf16 %v177_v10, %v145_v9  ;;  %v690_v25 = vpack.c.bf16 %v242_v20, %v210_v19  ;;  %v8212_v8 = vld [vmem:[#allocation6 + $0xc64] ss:$8 sps:$4 sm:$0xff]   ;;  %v8207_v9 = vld [vmem:[#allocation6 + $0x560] ss:$8 sps:$4 sm:$0xff]   ;;  %v402_v15 = vld [vmem:[#allocation3 + $0x8b8] sm:$0xff] }
 0x1b0   :  { %5240 = vmatprep.subr.bf16.mxu0 %v8146_v26  ;;  %4406 = vmatprep.mubr.bf16.mxu1 %v834_v28  ;;  %v8180_v26 = vld [vmem:[#allocation6 + $0xc10] ss:$8 sps:$4 sm:$0xff]   ;;  %v227_v28 = vld [vmem:[#allocation3 + $0x340] sm:$0xff] }
 0x1b1   :  { %5197 = vmatprep.mubr.bf16.mxu0 %v848_v29  ;;  %v209_v29 = vld [vmem:[#allocation3 + $0x2b0] sm:$0xff]  ;;  %v8210_v10 = vld [vmem:[#allocation6 + $0xc60] ss:$8 sps:$4 sm:$0xff]   ;;  %v434_v16 = vld [vmem:[#allocation3 + $0x9b8] sm:$0xff] }
 0x1b2   :  { %4450 = vmatpush1.bf16.msra.mxu1 %v8141_v27  ;;  %v195_v27 = vld [vmem:[#allocation3 + $0x240] sm:$0xff]  ;;  %v8213_v19 = vld [vmem:[#allocation6 + $0x570] ss:$8 sps:$4 sm:$0xff]  }
 0x1b3   :  { %5241 = vmatpush1.bf16.msra.mxu0 %v8144_v30  ;;  %4451 = vmatprep.subr.bf16.mxu1 %v8149_v35  ;;  %v241_v30 = vld [vmem:[#allocation3 + $0x3b0] sm:$0xff]  ;;  %v260_v35 = vld [vmem:[#allocation3 + $0x448] sm:$0xff] }
 0x1b4   :  { %5242 = vmatprep.subr.bf16.mxu0 %v8152_v36  ;;  %v292_v36 = vld [vmem:[#allocation3 + $0x548] sm:$0xff] }
 0x1b5   :  { %4407 = vmatmul.mubr.bf16.gmra.mrb[24].mxu1 %v833_v41  ;;  %v8191_v41 = vld [vmem:[#allocation6 + $0x534] ss:$8 sps:$4 sm:$0xff]   ;;  %v708_v44 = vpack.c.bf16 %v292_v36, %v260_v35 }
 0x1b6   :  { %5198 = vmatmul.mubr.bf16.gmra.mrb[24].mxu0 %v847_v42  ;;  %4452 = vmatpush1.bf16.msra.mxu1 %v8147_v37  ;;  %v675_v37 = vpack.c.bf16 %v227_v28, %v195_v27  ;;  %v8194_v42 = vld [vmem:[#allocation6 + $0xc34] ss:$8 sps:$4 sm:$0xff]   ;;  %v8221_v27 = vld [vmem:[#allocation6 + $0x584] ss:$8 sps:$4 sm:$0xff]  }
 0x1b7   :  { %5243 = vmatpush1.bf16.msra.mxu0 %v8150_v38  ;;  %4453 = vmatprep.subr.bf16.mxu1 %v8155_v45  ;;  %v689_v38 = vpack.c.bf16 %v241_v30, %v209_v29  ;;  %v722_v45 = vpack.c.bf16 %v306_v40, %v274_v39  ;;  %v8224_v28 = vld [vmem:[#allocation6 + $0xc84] ss:$8 sps:$4 sm:$0xff]   ;;  %v8219_v29 = vld [vmem:[#allocation6 + $0x580] ss:$8 sps:$4 sm:$0xff]   ;;  %v466_v35 = vld [vmem:[#allocation3 + $0xab8] sm:$0xff] }
 0x1b8   :  { %5244 = vmatprep.subr.bf16.mxu0 %v8158_v46  ;;  %4416 = vmatprep.mubr.bf16.mxu1 %v866_v48  ;;  %v8192_v46 = vld [vmem:[#allocation6 + $0xc30] ss:$8 sps:$4 sm:$0xff]   ;;  %v291_v48 = vld [vmem:[#allocation3 + $0x540] sm:$0xff] }
 0x1b9   :  { %5207 = vmatprep.mubr.bf16.mxu0 %v880_v49  ;;  %v273_v49 = vld [vmem:[#allocation3 + $0x4b0] sm:$0xff]  ;;  %v8222_v30 = vld [vmem:[#allocation6 + $0xc80] ss:$8 sps:$4 sm:$0xff]   ;;  %v498_v36 = vld [vmem:[#allocation3 + $0xbb8] sm:$0xff] }
 0x1ba   :  { %4454 = vmatpush1.bf16.msra.mxu1 %v8153_v47  ;;  %v259_v47 = vld [vmem:[#allocation3 + $0x440] sm:$0xff]  ;;  %v8225_v39 = vld [vmem:[#allocation6 + $0x590] ss:$8 sps:$4 sm:$0xff]  }
 0x1bb   :  { %5245 = vmatpush1.bf16.msra.mxu0 %v8156_v50  ;;  %4455 = vmatprep.subr.bf16.mxu1 %v8161_v55  ;;  %v305_v50 = vld [vmem:[#allocation3 + $0x5b0] sm:$0xff]  ;;  %v324_v55 = vld [vmem:[#allocation3 + $0x648] sm:$0xff] }
 0x1bc   :  { %5246 = vmatprep.subr.bf16.mxu0 %v8164_v56  ;;  %v356_v56 = vld [vmem:[#allocation3 + $0x748] sm:$0xff] }
 0x1bd   :  { %4417 = vmatmul.mubr.bf16.gmra.mrb[28].mxu1 %v865_v61  ;;  %v8203_v61 = vld [vmem:[#allocation6 + $0x554] ss:$8 sps:$4 sm:$0xff]   ;;  %v740_v0 = vpack.c.bf16 %v356_v56, %v324_v55 }
 0x1be   :  { %5208 = vmatmul.mubr.bf16.gmra.mrb[28].mxu0 %v879_v62  ;;  %4456 = vmatpush1.bf16.msra.mxu1 %v8159_v57  ;;  %v707_v57 = vpack.c.bf16 %v291_v48, %v259_v47  ;;  %v8206_v62 = vld [vmem:[#allocation6 + $0xc54] ss:$8 sps:$4 sm:$0xff]   ;;  %v8233_v47 = vld [vmem:[#allocation6 + $0x5a4] ss:$8 sps:$4 sm:$0xff]  }
 0x1bf   :  { %5247 = vmatpush1.bf16.msra.mxu0 %v8162_v58  ;;  %4457 = vmatprep.subr.bf16.mxu1 %v8167_v1  ;;  %v721_v58 = vpack.c.bf16 %v305_v50, %v273_v49  ;;  %v754_v1 = vpack.c.bf16 %v370_v60, %v338_v59  ;;  %v8236_v48 = vld [vmem:[#allocation6 + $0xca4] ss:$8 sps:$4 sm:$0xff]   ;;  %v8231_v49 = vld [vmem:[#allocation6 + $0x5a0] ss:$8 sps:$4 sm:$0xff]   ;;  %v530_v55 = vld [vmem:[#allocation3 + $0xcb8] sm:$0xff] }
 0x1c0   :  { %5248 = vmatprep.subr.bf16.mxu0 %v8170_v2  ;;  %4459 = vmatprep.mubr.bf16.mxu1 %v644_v4  ;;  %v8204_v2 = vld [vmem:[#allocation6 + $0xc50] ss:$8 sps:$4 sm:$0xff]   ;;  %v355_v4 = vld [vmem:[#allocation3 + $0x740] sm:$0xff] }
 0x1c1   :  { %5250 = vmatprep.mubr.bf16.mxu0 %v658_v5  ;;  %v337_v5 = vld [vmem:[#allocation3 + $0x6b0] sm:$0xff]  ;;  %v8234_v50 = vld [vmem:[#allocation6 + $0xca0] ss:$8 sps:$4 sm:$0xff]   ;;  %v562_v56 = vld [vmem:[#allocation3 + $0xdb8] sm:$0xff] }
 0x1c2   :  { %4458 = vmatpush1.bf16.msra.mxu1 %v8165_v3  ;;  %v323_v3 = vld [vmem:[#allocation3 + $0x640] sm:$0xff]  ;;  %v8237_v59 = vld [vmem:[#allocation6 + $0x5b0] ss:$8 sps:$4 sm:$0xff]  }
 0x1c3   :  { %5249 = vmatpush1.bf16.msra.mxu0 %v8168_v6  ;;  %4540 = vmatprep.subr.bf16.mxu1 %v8173_v11  ;;  %v369_v6 = vld [vmem:[#allocation3 + $0x7b0] sm:$0xff]  ;;  %v388_v11 = vld [vmem:[#allocation3 + $0x848] sm:$0xff] }
 0x1c4   :  { %5331 = vmatprep.subr.bf16.mxu0 %v8176_v12  ;;  %v420_v12 = vld [vmem:[#allocation3 + $0x948] sm:$0xff] }
 0x1c5   :  { %4460 = vmatmul.mubr.bf16.vlgmr.msra.gmra.mrb[0].mxu1 %v643_v17  ;;  %v8215_v17 = vld [vmem:[#allocation6 + $0x574] ss:$8 sps:$4 sm:$0xff]   ;;  %v772_v20 = vpack.c.bf16 %v420_v12, %v388_v11 }
 0x1c6   :  { %5251 = vmatmul.mubr.bf16.vlgmr.msra.gmra.mrb[0].mxu0 %v657_v18  ;;  %4541 = vmatpush1.bf16.msra.mxu1 %v8171_v13  ;;  %v739_v13 = vpack.c.bf16 %v355_v4, %v323_v3  ;;  %v8218_v18 = vld [vmem:[#allocation6 + $0xc74] ss:$8 sps:$4 sm:$0xff]   ;;  %v8245_v3 = vld [vmem:[#allocation6 + $0x5c4] ss:$8 sps:$4 sm:$0xff]  }
 0x1c7   :  { %5332 = vmatpush1.bf16.msra.mxu0 %v8174_v14  ;;  %4542 = vmatprep.subr.bf16.mxu1 %v8179_v21  ;;  %v753_v14 = vpack.c.bf16 %v369_v6, %v337_v5  ;;  %v786_v21 = vpack.c.bf16 %v434_v16, %v402_v15  ;;  %v8248_v4 = vld [vmem:[#allocation6 + $0xcc4] ss:$8 sps:$4 sm:$0xff]   ;;  %v8243_v5 = vld [vmem:[#allocation6 + $0x5c0] ss:$8 sps:$4 sm:$0xff]   ;;  %v594_v11 = vld [vmem:[#allocation3 + $0xeb8] sm:$0xff] }
 0x1c8   :  { %5333 = vmatprep.subr.bf16.mxu0 %v8182_v22  ;;  %4469 = vmatprep.mubr.bf16.mxu1 %v676_v24  ;;  %v8216_v22 = vld [vmem:[#allocation6 + $0xc70] ss:$8 sps:$4 sm:$0xff]   ;;  %v419_v24 = vld [vmem:[#allocation3 + $0x940] sm:$0xff] }
 0x1c9   :  { %5260 = vmatprep.mubr.bf16.mxu0 %v690_v25  ;;  %v401_v25 = vld [vmem:[#allocation3 + $0x8b0] sm:$0xff]  ;;  %v8246_v6 = vld [vmem:[#allocation6 + $0xcc0] ss:$8 sps:$4 sm:$0xff]   ;;  %v626_v12 = vld [vmem:[#allocation3 + $0xfb8] sm:$0xff] }
 0x1ca   :  { %4543 = vmatpush1.bf16.msra.mxu1 %v8177_v23  ;;  %v387_v23 = vld [vmem:[#allocation3 + $0x840] sm:$0xff]  ;;  %v8249_v15 = vld [vmem:[#allocation6 + $0x5d0] ss:$8 sps:$4 sm:$0xff]  }
 0x1cb   :  { %5334 = vmatpush1.bf16.msra.mxu0 %v8180_v26  ;;  %4544 = vmatprep.subr.bf16.mxu1 %v8185_v31  ;;  %v433_v26 = vld [vmem:[#allocation3 + $0x9b0] sm:$0xff]  ;;  %v452_v31 = vld [vmem:[#allocation3 + $0xa48] sm:$0xff] }
 0x1cc   :  { %5335 = vmatprep.subr.bf16.mxu0 %v8188_v32  ;;  %v484_v32 = vld [vmem:[#allocation3 + $0xb48] sm:$0xff] }
 0x1cd   :  { %4470 = vmatmul.mubr.bf16.gmra.mrb[4].mxu1 %v675_v37  ;;  %v8227_v37 = vld [vmem:[#allocation6 + $0x594] ss:$8 sps:$4 sm:$0xff]   ;;  %v804_v40 = vpack.c.bf16 %v484_v32, %v452_v31  ;;  %v148_v31 = vld [vmem:[#allocation3 + $0xc8] sm:$0xff] }
 0x1ce   :  { %5261 = vmatmul.mubr.bf16.gmra.mrb[4].mxu0 %v689_v38  ;;  %4545 = vmatpush1.bf16.msra.mxu1 %v8183_v33  ;;  %v771_v33 = vpack.c.bf16 %v419_v24, %v387_v23  ;;  %v8230_v38 = vld [vmem:[#allocation6 + $0xc94] ss:$8 sps:$4 sm:$0xff]   ;;  %v8257_v23 = vld [vmem:[#allocation6 + $0x5e4] ss:$8 sps:$4 sm:$0xff]  }
 0x1cf   :  { %5336 = vmatpush1.bf16.msra.mxu0 %v8186_v34  ;;  %4546 = vmatprep.subr.bf16.mxu1 %v8191_v41  ;;  %v785_v34 = vpack.c.bf16 %v433_v26, %v401_v25  ;;  %v818_v41 = vpack.c.bf16 %v498_v36, %v466_v35  ;;  %v8260_v24 = vld [vmem:[#allocation6 + $0xce4] ss:$8 sps:$4 sm:$0xff]   ;;  %v8255_v25 = vld [vmem:[#allocation6 + $0x5e0] ss:$8 sps:$4 sm:$0xff]   ;;  %v8261_v35 = vld [vmem:[#allocation6 + $0x5f0] ss:$8 sps:$4 sm:$0xff]  }
 0x1d0   :  { %5337 = vmatprep.subr.bf16.mxu0 %v8194_v42  ;;  %4479 = vmatprep.mubr.bf16.mxu1 %v708_v44  ;;  %v8228_v42 = vld [vmem:[#allocation6 + $0xc90] ss:$8 sps:$4 sm:$0xff]   ;;  %v483_v44 = vld [vmem:[#allocation3 + $0xb40] sm:$0xff]  ;;  %v180_v32 = vld [vmem:[#allocation3 + $0x1c8] sm:$0xff] }
 0x1d1   :  { %5270 = vmatprep.mubr.bf16.mxu0 %v722_v45  ;;  %v465_v45 = vld [vmem:[#allocation3 + $0xab0] sm:$0xff]  ;;  %v8258_v26 = vld [vmem:[#allocation6 + $0xce0] ss:$8 sps:$4 sm:$0xff]  }
 0x1d2   :  { %4547 = vmatpush1.bf16.msra.mxu1 %v8189_v43  ;;  %v451_v43 = vld [vmem:[#allocation3 + $0xa40] sm:$0xff] }
 0x1d3   :  { %5338 = vmatpush1.bf16.msra.mxu0 %v8192_v46  ;;  %4548 = vmatprep.subr.bf16.mxu1 %v8197_v51  ;;  %v497_v46 = vld [vmem:[#allocation3 + $0xbb0] sm:$0xff]  ;;  %v516_v51 = vld [vmem:[#allocation3 + $0xc48] sm:$0xff] }
 0x1d4   :  { %5339 = vmatprep.subr.bf16.mxu0 %v8200_v52  ;;  %v548_v52 = vld [vmem:[#allocation3 + $0xd48] sm:$0xff] }
 0x1d5   :  { %4480 = vmatmul.mubr.bf16.gmra.mrb[8].mxu1 %v707_v57  ;;  %v8239_v57 = vld [vmem:[#allocation6 + $0x5b4] ss:$8 sps:$4 sm:$0xff]   ;;  %v836_v60 = vpack.c.bf16 %v548_v52, %v516_v51  ;;  %v212_v51 = vld [vmem:[#allocation3 + $0x2c8] sm:$0xff] }
 0x1d6   :  { %5271 = vmatmul.mubr.bf16.gmra.mrb[8].mxu0 %v721_v58  ;;  %4549 = vmatpush1.bf16.msra.mxu1 %v8195_v53  ;;  %v803_v53 = vpack.c.bf16 %v483_v44, %v451_v43  ;;  %v8242_v58 = vld [vmem:[#allocation6 + $0xcb4] ss:$8 sps:$4 sm:$0xff]   ;;  %v8269_v43 = vld [vmem:[#allocation6 + $0x604] ss:$8 sps:$4 sm:$0xff]  }
 0x1d7   :  { %5340 = vmatpush1.bf16.msra.mxu0 %v8198_v54  ;;  %4550 = vmatprep.subr.bf16.mxu1 %v8203_v61  ;;  %v817_v54 = vpack.c.bf16 %v497_v46, %v465_v45  ;;  %v850_v61 = vpack.c.bf16 %v562_v56, %v530_v55  ;;  %v8272_v44 = vld [vmem:[#allocation6 + $0xd04] ss:$8 sps:$4 sm:$0xff]   ;;  %v8267_v45 = vld [vmem:[#allocation6 + $0x600] ss:$8 sps:$4 sm:$0xff]   ;;  %v8273_v55 = vld [vmem:[#allocation6 + $0x610] ss:$8 sps:$4 sm:$0xff]  }
 0x1d8   :  { %5341 = vmatprep.subr.bf16.mxu0 %v8206_v62  ;;  %4489 = vmatprep.mubr.bf16.mxu1 %v740_v0  ;;  %v8240_v62 = vld [vmem:[#allocation6 + $0xcb0] ss:$8 sps:$4 sm:$0xff]   ;;  %v547_v0 = vld [vmem:[#allocation3 + $0xd40] sm:$0xff]  ;;  %v244_v52 = vld [vmem:[#allocation3 + $0x3c8] sm:$0xff] }
 0x1d9   :  { %5280 = vmatprep.mubr.bf16.mxu0 %v754_v1  ;;  %v529_v1 = vld [vmem:[#allocation3 + $0xcb0] sm:$0xff]  ;;  %v8270_v46 = vld [vmem:[#allocation6 + $0xd00] ss:$8 sps:$4 sm:$0xff]  }
 0x1da   :  { %4551 = vmatpush1.bf16.msra.mxu1 %v8201_v63  ;;  %v515_v63 = vld [vmem:[#allocation3 + $0xc40] sm:$0xff] }
 0x1db   :  { %5342 = vmatpush1.bf16.msra.mxu0 %v8204_v2  ;;  %4552 = vmatprep.subr.bf16.mxu1 %v8209_v7  ;;  %v561_v2 = vld [vmem:[#allocation3 + $0xdb0] sm:$0xff]  ;;  %v580_v7 = vld [vmem:[#allocation3 + $0xe48] sm:$0xff] }
 0x1dc   :  { %5343 = vmatprep.subr.bf16.mxu0 %v8212_v8  ;;  %v612_v8 = vld [vmem:[#allocation3 + $0xf48] sm:$0xff] }
 0x1dd   :  { %4490 = vmatmul.mubr.bf16.gmra.mrb[12].mxu1 %v739_v13  ;;  %v8251_v13 = vld [vmem:[#allocation6 + $0x5d4] ss:$8 sps:$4 sm:$0xff]   ;;  %v868_v16 = vpack.c.bf16 %v612_v8, %v580_v7  ;;  %v276_v7 = vld [vmem:[#allocation3 + $0x4c8] sm:$0xff] }
 0x1de   :  { %5281 = vmatmul.mubr.bf16.gmra.mrb[12].mxu0 %v753_v14  ;;  %4553 = vmatpush1.bf16.msra.mxu1 %v8207_v9  ;;  %v835_v9 = vpack.c.bf16 %v547_v0, %v515_v63  ;;  %v8254_v14 = vld [vmem:[#allocation6 + $0xcd4] ss:$8 sps:$4 sm:$0xff]   ;;  %v8281_v63 = vld [vmem:[#allocation6 + $0x624] ss:$8 sps:$4 sm:$0xff]  }
 0x1df   :  { %5344 = vmatpush1.bf16.msra.mxu0 %v8210_v10  ;;  %4554 = vmatprep.subr.bf16.mxu1 %v8215_v17  ;;  %v849_v10 = vpack.c.bf16 %v561_v2, %v529_v1  ;;  %v882_v17 = vpack.c.bf16 %v626_v12, %v594_v11  ;;  %v8284_v0 = vld [vmem:[#allocation6 + $0xd24] ss:$8 sps:$4 sm:$0xff]   ;;  %v8279_v1 = vld [vmem:[#allocation6 + $0x620] ss:$8 sps:$4 sm:$0xff]   ;;  %v8285_v11 = vld [vmem:[#allocation6 + $0x630] ss:$8 sps:$4 sm:$0xff]  }
 0x1e0   :  { %5345 = vmatprep.subr.bf16.mxu0 %v8218_v18  ;;  %4499 = vmatprep.mubr.bf16.mxu1 %v772_v20  ;;  %v8252_v18 = vld [vmem:[#allocation6 + $0xcd0] ss:$8 sps:$4 sm:$0xff]   ;;  %v611_v20 = vld [vmem:[#allocation3 + $0xf40] sm:$0xff]  ;;  %v308_v8 = vld [vmem:[#allocation3 + $0x5c8] sm:$0xff] }
 0x1e1   :  { %5290 = vmatprep.mubr.bf16.mxu0 %v786_v21  ;;  %v593_v21 = vld [vmem:[#allocation3 + $0xeb0] sm:$0xff]  ;;  %v8282_v2 = vld [vmem:[#allocation6 + $0xd20] ss:$8 sps:$4 sm:$0xff]  }
 0x1e2   :  { %4555 = vmatpush1.bf16.msra.mxu1 %v8213_v19  ;;  %v579_v19 = vld [vmem:[#allocation3 + $0xe40] sm:$0xff] }
 0x1e3   :  { %5346 = vmatpush1.bf16.msra.mxu0 %v8216_v22  ;;  %4556 = vmatprep.subr.bf16.mxu1 %v8221_v27  ;;  %v625_v22 = vld [vmem:[#allocation3 + $0xfb0] sm:$0xff]  ;;  %v134_v27 = vld [vmem:[#allocation3 + $0x58] sm:$0xff] }
 0x1e4   :  { %5347 = vmatprep.subr.bf16.mxu0 %v8224_v28  ;;  %v166_v28 = vld [vmem:[#allocation3 + $0x158] sm:$0xff] }
 0x1e5   :  { %4500 = vmatmul.mubr.bf16.gmra.mrb[16].mxu1 %v771_v33  ;;  %v8263_v33 = vld [vmem:[#allocation6 + $0x5f4] ss:$8 sps:$4 sm:$0xff]   ;;  %v646_v36 = vpack.c.bf16 %v166_v28, %v134_v27  ;;  %v340_v27 = vld [vmem:[#allocation3 + $0x6c8] sm:$0xff] }
 0x1e6   :  { %5291 = vmatmul.mubr.bf16.gmra.mrb[16].mxu0 %v785_v34  ;;  %4557 = vmatpush1.bf16.msra.mxu1 %v8219_v29  ;;  %v867_v29 = vpack.c.bf16 %v611_v20, %v579_v19  ;;  %v8266_v34 = vld [vmem:[#allocation6 + $0xcf4] ss:$8 sps:$4 sm:$0xff]   ;;  %v8293_v19 = vld [vmem:[#allocation6 + $0x644] ss:$8 sps:$4 sm:$0xff]  }
 0x1e7   :  { %5348 = vmatpush1.bf16.msra.mxu0 %v8222_v30  ;;  %4558 = vmatprep.subr.bf16.mxu1 %v8227_v37  ;;  %v881_v30 = vpack.c.bf16 %v625_v22, %v593_v21  ;;  %v660_v37 = vpack.c.bf16 %v180_v32, %v148_v31  ;;  %v8296_v20 = vld [vmem:[#allocation6 + $0xd44] ss:$8 sps:$4 sm:$0xff]   ;;  %v8291_v21 = vld [vmem:[#allocation6 + $0x640] ss:$8 sps:$4 sm:$0xff]   ;;  %v8297_v31 = vld [vmem:[#allocation6 + $0x650] ss:$8 sps:$4 sm:$0xff]  }
 0x1e8   :  { %5349 = vmatprep.subr.bf16.mxu0 %v8230_v38  ;;  %4509 = vmatprep.mubr.bf16.mxu1 %v804_v40  ;;  %v8264_v38 = vld [vmem:[#allocation6 + $0xcf0] ss:$8 sps:$4 sm:$0xff]   ;;  %v8294_v22 = vld [vmem:[#allocation6 + $0xd40] ss:$8 sps:$4 sm:$0xff]  }
 0x1e9   :  { %5300 = vmatprep.mubr.bf16.mxu0 %v818_v41  ;;  %v165_v40 = vld [vmem:[#allocation3 + $0x150] sm:$0xff]  ;;  %v147_v41 = vld [vmem:[#allocation3 + $0xc0] sm:$0xff]  ;;  %v372_v28 = vld [vmem:[#allocation3 + $0x7c8] sm:$0xff] }
 0x1ea   :  { %4559 = vmatpush1.bf16.msra.mxu1 %v8225_v39  ;;  %v133_v39 = vld [vmem:[#allocation3 + $0x50] sm:$0xff] }
 0x1eb   :  { %5350 = vmatpush1.bf16.msra.mxu0 %v8228_v42  ;;  %4560 = vmatprep.subr.bf16.mxu1 %v8233_v47  ;;  %v179_v42 = vld [vmem:[#allocation3 + $0x1c0] sm:$0xff]  ;;  %v198_v47 = vld [vmem:[#allocation3 + $0x258] sm:$0xff] }
 0x1ec   :  { %5351 = vmatprep.subr.bf16.mxu0 %v8236_v48  ;;  %v230_v48 = vld [vmem:[#allocation3 + $0x358] sm:$0xff] }
 0x1ed   :  { %4510 = vmatmul.mubr.bf16.gmra.mrb[20].mxu1 %v803_v53  ;;  %v8275_v53 = vld [vmem:[#allocation6 + $0x614] ss:$8 sps:$4 sm:$0xff]   ;;  %v678_v56 = vpack.c.bf16 %v230_v48, %v198_v47  ;;  %v404_v47 = vld [vmem:[#allocation3 + $0x8c8] sm:$0xff] }
 0x1ee   :  { %5301 = vmatmul.mubr.bf16.gmra.mrb[20].mxu0 %v817_v54  ;;  %4561 = vmatpush1.bf16.msra.mxu1 %v8231_v49  ;;  %v645_v49 = vpack.c.bf16 %v165_v40, %v133_v39  ;;  %v8278_v54 = vld [vmem:[#allocation6 + $0xd14] ss:$8 sps:$4 sm:$0xff]   ;;  %v8305_v39 = vld [vmem:[#allocation6 + $0x664] ss:$8 sps:$4 sm:$0xff]  }
 0x1ef   :  { %5352 = vmatpush1.bf16.msra.mxu0 %v8234_v50  ;;  %4562 = vmatprep.subr.bf16.mxu1 %v8239_v57  ;;  %v659_v50 = vpack.c.bf16 %v179_v42, %v147_v41  ;;  %v692_v57 = vpack.c.bf16 %v244_v52, %v212_v51  ;;  %v8308_v40 = vld [vmem:[#allocation6 + $0xd64] ss:$8 sps:$4 sm:$0xff]   ;;  %v8303_v41 = vld [vmem:[#allocation6 + $0x660] ss:$8 sps:$4 sm:$0xff]   ;;  %v8309_v51 = vld [vmem:[#allocation6 + $0x670] ss:$8 sps:$4 sm:$0xff]  }
 0x1f0   :  { %5353 = vmatprep.subr.bf16.mxu0 %v8242_v58  ;;  %4519 = vmatprep.mubr.bf16.mxu1 %v836_v60  ;;  %v8276_v58 = vld [vmem:[#allocation6 + $0xd10] ss:$8 sps:$4 sm:$0xff]   ;;  %v8306_v42 = vld [vmem:[#allocation6 + $0xd60] ss:$8 sps:$4 sm:$0xff]  }
 0x1f1   :  { %5310 = vmatprep.mubr.bf16.mxu0 %v850_v61  ;;  %v229_v60 = vld [vmem:[#allocation3 + $0x350] sm:$0xff]  ;;  %v211_v61 = vld [vmem:[#allocation3 + $0x2c0] sm:$0xff]  ;;  %v436_v48 = vld [vmem:[#allocation3 + $0x9c8] sm:$0xff] }
 0x1f2   :  { %4563 = vmatpush1.bf16.msra.mxu1 %v8237_v59  ;;  %v197_v59 = vld [vmem:[#allocation3 + $0x250] sm:$0xff] }
 0x1f3   :  { %5354 = vmatpush1.bf16.msra.mxu0 %v8240_v62  ;;  %4564 = vmatprep.subr.bf16.mxu1 %v8245_v3  ;;  %v243_v62 = vld [vmem:[#allocation3 + $0x3c0] sm:$0xff]  ;;  %v262_v3 = vld [vmem:[#allocation3 + $0x458] sm:$0xff] }
 0x1f4   :  { %5355 = vmatprep.subr.bf16.mxu0 %v8248_v4  ;;  %v294_v4 = vld [vmem:[#allocation3 + $0x558] sm:$0xff] }
 0x1f5   :  { %4520 = vmatmul.mubr.bf16.gmra.mrb[24].mxu1 %v835_v9  ;;  %v8287_v9 = vld [vmem:[#allocation6 + $0x634] ss:$8 sps:$4 sm:$0xff]   ;;  %v710_v12 = vpack.c.bf16 %v294_v4, %v262_v3  ;;  %v468_v3 = vld [vmem:[#allocation3 + $0xac8] sm:$0xff] }
 0x1f6   :  { %5311 = vmatmul.mubr.bf16.gmra.mrb[24].mxu0 %v849_v10  ;;  %4565 = vmatpush1.bf16.msra.mxu1 %v8243_v5  ;;  %v677_v5 = vpack.c.bf16 %v229_v60, %v197_v59  ;;  %v8290_v10 = vld [vmem:[#allocation6 + $0xd34] ss:$8 sps:$4 sm:$0xff]   ;;  %v8317_v59 = vld [vmem:[#allocation6 + $0x684] ss:$8 sps:$4 sm:$0xff]  }
 0x1f7   :  { %5356 = vmatpush1.bf16.msra.mxu0 %v8246_v6  ;;  %4566 = vmatprep.subr.bf16.mxu1 %v8251_v13  ;;  %v691_v6 = vpack.c.bf16 %v243_v62, %v211_v61  ;;  %v724_v13 = vpack.c.bf16 %v308_v8, %v276_v7  ;;  %v8320_v60 = vld [vmem:[#allocation6 + $0xd84] ss:$8 sps:$4 sm:$0xff]   ;;  %v8315_v61 = vld [vmem:[#allocation6 + $0x680] ss:$8 sps:$4 sm:$0xff]   ;;  %v8321_v7 = vld [vmem:[#allocation6 + $0x690] ss:$8 sps:$4 sm:$0xff]  }
 0x1f8   :  { %5357 = vmatprep.subr.bf16.mxu0 %v8254_v14  ;;  %4529 = vmatprep.mubr.bf16.mxu1 %v868_v16  ;;  %v8288_v14 = vld [vmem:[#allocation6 + $0xd30] ss:$8 sps:$4 sm:$0xff]   ;;  %v8318_v62 = vld [vmem:[#allocation6 + $0xd80] ss:$8 sps:$4 sm:$0xff]  }
 0x1f9   :  { %5320 = vmatprep.mubr.bf16.mxu0 %v882_v17  ;;  %v293_v16 = vld [vmem:[#allocation3 + $0x550] sm:$0xff]  ;;  %v275_v17 = vld [vmem:[#allocation3 + $0x4c0] sm:$0xff]  ;;  %v500_v4 = vld [vmem:[#allocation3 + $0xbc8] sm:$0xff] }
 0x1fa   :  { %4567 = vmatpush1.bf16.msra.mxu1 %v8249_v15  ;;  %v261_v15 = vld [vmem:[#allocation3 + $0x450] sm:$0xff] }
 0x1fb   :  { %5358 = vmatpush1.bf16.msra.mxu0 %v8252_v18  ;;  %4568 = vmatprep.subr.bf16.mxu1 %v8257_v23  ;;  %v307_v18 = vld [vmem:[#allocation3 + $0x5c0] sm:$0xff]  ;;  %v326_v23 = vld [vmem:[#allocation3 + $0x658] sm:$0xff] }
 0x1fc   :  { %5359 = vmatprep.subr.bf16.mxu0 %v8260_v24  ;;  %v358_v24 = vld [vmem:[#allocation3 + $0x758] sm:$0xff] }
 0x1fd   :  { %4530 = vmatmul.mubr.bf16.gmra.mrb[28].mxu1 %v867_v29  ;;  %v8299_v29 = vld [vmem:[#allocation6 + $0x654] ss:$8 sps:$4 sm:$0xff]   ;;  %v742_v32 = vpack.c.bf16 %v358_v24, %v326_v23  ;;  %v532_v23 = vld [vmem:[#allocation3 + $0xcc8] sm:$0xff] }
 0x1fe   :  { %5321 = vmatmul.mubr.bf16.gmra.mrb[28].mxu0 %v881_v30  ;;  %4569 = vmatpush1.bf16.msra.mxu1 %v8255_v25  ;;  %v709_v25 = vpack.c.bf16 %v293_v16, %v261_v15  ;;  %v8302_v30 = vld [vmem:[#allocation6 + $0xd54] ss:$8 sps:$4 sm:$0xff]   ;;  %v8329_v15 = vld [vmem:[#allocation6 + $0x6a4] ss:$8 sps:$4 sm:$0xff]  }
 0x1ff   :  { %5360 = vmatpush1.bf16.msra.mxu0 %v8258_v26  ;;  %4570 = vmatprep.subr.bf16.mxu1 %v8263_v33  ;;  %v723_v26 = vpack.c.bf16 %v307_v18, %v275_v17  ;;  %v756_v33 = vpack.c.bf16 %v372_v28, %v340_v27  ;;  %v8332_v16 = vld [vmem:[#allocation6 + $0xda4] ss:$8 sps:$4 sm:$0xff]   ;;  %v8327_v17 = vld [vmem:[#allocation6 + $0x6a0] ss:$8 sps:$4 sm:$0xff]   ;;  %v8333_v27 = vld [vmem:[#allocation6 + $0x6b0] ss:$8 sps:$4 sm:$0xff]  }
 0x200   :  { %5361 = vmatprep.subr.bf16.mxu0 %v8266_v34  ;;  %4572 = vmatprep.mubr.bf16.mxu1 %v646_v36  ;;  %v8300_v34 = vld [vmem:[#allocation6 + $0xd50] ss:$8 sps:$4 sm:$0xff]   ;;  %v8330_v18 = vld [vmem:[#allocation6 + $0xda0] ss:$8 sps:$4 sm:$0xff]  }
 0x201   :  { %5363 = vmatprep.mubr.bf16.mxu0 %v660_v37  ;;  %v357_v36 = vld [vmem:[#allocation3 + $0x750] sm:$0xff]  ;;  %v339_v37 = vld [vmem:[#allocation3 + $0x6c0] sm:$0xff]  ;;  %v564_v24 = vld [vmem:[#allocation3 + $0xdc8] sm:$0xff] }
 0x202   :  { %4571 = vmatpush1.bf16.msra.mxu1 %v8261_v35  ;;  %v325_v35 = vld [vmem:[#allocation3 + $0x650] sm:$0xff] }
 0x203   :  { %5362 = vmatpush1.bf16.msra.mxu0 %v8264_v38  ;;  %4653 = vmatprep.subr.bf16.mxu1 %v8269_v43  ;;  %v371_v38 = vld [vmem:[#allocation3 + $0x7c0] sm:$0xff]  ;;  %v390_v43 = vld [vmem:[#allocation3 + $0x858] sm:$0xff] }
 0x204   :  { %5444 = vmatprep.subr.bf16.mxu0 %v8272_v44  ;;  %v422_v44 = vld [vmem:[#allocation3 + $0x958] sm:$0xff] }
 0x205   :  { %4573 = vmatmul.mubr.bf16.vlgmr.msra.gmra.mrb[0].mxu1 %v645_v49  ;;  %v8311_v49 = vld [vmem:[#allocation6 + $0x674] ss:$8 sps:$4 sm:$0xff]   ;;  %v774_v52 = vpack.c.bf16 %v422_v44, %v390_v43  ;;  %v8339_v43 = vld [vmem:[#allocation6 + $0x6c0] ss:$8 sps:$4 sm:$0xff]  }
 0x206   :  { %5364 = vmatmul.mubr.bf16.vlgmr.msra.gmra.mrb[0].mxu0 %v659_v50  ;;  %4654 = vmatpush1.bf16.msra.mxu1 %v8267_v45  ;;  %v741_v45 = vpack.c.bf16 %v357_v36, %v325_v35  ;;  %v8314_v50 = vld [vmem:[#allocation6 + $0xd74] ss:$8 sps:$4 sm:$0xff]   ;;  %v563_v35 = vld [vmem:[#allocation3 + $0xdc0] sm:$0xff] }
 0x207   :  { %5445 = vmatpush1.bf16.msra.mxu0 %v8270_v46  ;;  %4655 = vmatprep.subr.bf16.mxu1 %v8275_v53  ;;  %v755_v46 = vpack.c.bf16 %v371_v38, %v339_v37  ;;  %v788_v53 = vpack.c.bf16 %v436_v48, %v404_v47  ;;  %v8344_v36 = vld [vmem:[#allocation6 + $0xdc4] ss:$8 sps:$4 sm:$0xff]   ;;  %v582_v37 = vld [vmem:[#allocation3 + $0xe58] sm:$0xff]  ;;  %v8342_v44 = vld [vmem:[#allocation6 + $0xdc0] ss:$8 sps:$4 sm:$0xff]  }
 0x208   :  { %5446 = vmatprep.subr.bf16.mxu0 %v8278_v54  ;;  %4582 = vmatprep.mubr.bf16.mxu1 %v678_v56  ;;  %v8312_v54 = vld [vmem:[#allocation6 + $0xd70] ss:$8 sps:$4 sm:$0xff]  }
 0x209   :  { %5373 = vmatprep.mubr.bf16.mxu0 %v692_v57  ;;  %v421_v56 = vld [vmem:[#allocation3 + $0x950] sm:$0xff]  ;;  %v403_v57 = vld [vmem:[#allocation3 + $0x8c0] sm:$0xff]  ;;  %v614_v38 = vld [vmem:[#allocation3 + $0xf58] sm:$0xff] }
 0x20a   :  { %4656 = vmatpush1.bf16.msra.mxu1 %v8273_v55  ;;  %v389_v55 = vld [vmem:[#allocation3 + $0x850] sm:$0xff] }
 0x20b   :  { %5447 = vmatpush1.bf16.msra.mxu0 %v8276_v58  ;;  %4657 = vmatprep.subr.bf16.mxu1 %v8281_v63  ;;  %v435_v58 = vld [vmem:[#allocation3 + $0x9c0] sm:$0xff]  ;;  %v454_v63 = vld [vmem:[#allocation3 + $0xa58] sm:$0xff] }
 0x20c   :  { %5448 = vmatprep.subr.bf16.mxu0 %v8284_v0  ;;  %v486_v0 = vld [vmem:[#allocation3 + $0xb58] sm:$0xff] }
 0x20d   :  { %4583 = vmatmul.mubr.bf16.gmra.mrb[4].mxu1 %v677_v5  ;;  %v8323_v5 = vld [vmem:[#allocation6 + $0x694] ss:$8 sps:$4 sm:$0xff]   ;;  %v806_v8 = vpack.c.bf16 %v486_v0, %v454_v63  ;;  %v8345_v47 = vld [vmem:[#allocation6 + $0x6d0] ss:$8 sps:$4 sm:$0xff]  }
 0x20e   :  { %5374 = vmatmul.mubr.bf16.gmra.mrb[4].mxu0 %v691_v6  ;;  %4658 = vmatpush1.bf16.msra.mxu1 %v8279_v1  ;;  %v773_v1 = vpack.c.bf16 %v421_v56, %v389_v55  ;;  %v8326_v6 = vld [vmem:[#allocation6 + $0xd94] ss:$8 sps:$4 sm:$0xff]   ;;  %v8348_v48 = vld [vmem:[#allocation6 + $0xdd0] ss:$8 sps:$4 sm:$0xff]   ;;  %v8353_v55 = vld [vmem:[#allocation6 + $0x6e4] ss:$8 sps:$4 sm:$0xff]  }
 0x20f   :  { %5449 = vmatpush1.bf16.msra.mxu0 %v8282_v2  ;;  %4659 = vmatprep.subr.bf16.mxu1 %v8287_v9  ;;  %v787_v2 = vpack.c.bf16 %v435_v58, %v403_v57  ;;  %v820_v9 = vpack.c.bf16 %v500_v4, %v468_v3  ;;  %v8356_v56 = vld [vmem:[#allocation6 + $0xde4] ss:$8 sps:$4 sm:$0xff]   ;;  %v8351_v57 = vld [vmem:[#allocation6 + $0x6e0] ss:$8 sps:$4 sm:$0xff]   ;;  %v150_v63 = vld [vmem:[#allocation3 + $0xd8] sm:$0xff] }
 0x210   :  { %5450 = vmatprep.subr.bf16.mxu0 %v8290_v10  ;;  %4592 = vmatprep.mubr.bf16.mxu1 %v710_v12  ;;  %v8324_v10 = vld [vmem:[#allocation6 + $0xd90] ss:$8 sps:$4 sm:$0xff]   ;;  %v8354_v58 = vld [vmem:[#allocation6 + $0xde0] ss:$8 sps:$4 sm:$0xff]  }
 0x211   :  { %5383 = vmatprep.mubr.bf16.mxu0 %v724_v13  ;;  %v485_v12 = vld [vmem:[#allocation3 + $0xb50] sm:$0xff]  ;;  %v467_v13 = vld [vmem:[#allocation3 + $0xac0] sm:$0xff]  ;;  %v182_v0 = vld [vmem:[#allocation3 + $0x1d8] sm:$0xff] }
 0x212   :  { %4660 = vmatpush1.bf16.msra.mxu1 %v8285_v11  ;;  %v453_v11 = vld [vmem:[#allocation3 + $0xa50] sm:$0xff] }
 0x213   :  { %5451 = vmatpush1.bf16.msra.mxu0 %v8288_v14  ;;  %4661 = vmatprep.subr.bf16.mxu1 %v8293_v19  ;;  %v499_v14 = vld [vmem:[#allocation3 + $0xbc0] sm:$0xff]  ;;  %v518_v19 = vld [vmem:[#allocation3 + $0xc58] sm:$0xff] }
 0x214   :  { %5452 = vmatprep.subr.bf16.mxu0 %v8296_v20  ;;  %v550_v20 = vld [vmem:[#allocation3 + $0xd58] sm:$0xff] }
 0x215   :  { %4593 = vmatmul.mubr.bf16.gmra.mrb[8].mxu1 %v709_v25  ;;  %v8335_v25 = vld [vmem:[#allocation6 + $0x6b4] ss:$8 sps:$4 sm:$0xff]   ;;  %v838_v28 = vpack.c.bf16 %v550_v20, %v518_v19  ;;  %v8357_v3 = vld [vmem:[#allocation6 + $0x6f0] ss:$8 sps:$4 sm:$0xff]  }
 0x216   :  { %5384 = vmatmul.mubr.bf16.gmra.mrb[8].mxu0 %v723_v26  ;;  %4662 = vmatpush1.bf16.msra.mxu1 %v8291_v21  ;;  %v805_v21 = vpack.c.bf16 %v485_v12, %v453_v11  ;;  %v8338_v26 = vld [vmem:[#allocation6 + $0xdb4] ss:$8 sps:$4 sm:$0xff]   ;;  %v8360_v4 = vld [vmem:[#allocation6 + $0xdf0] ss:$8 sps:$4 sm:$0xff]   ;;  %v8365_v11 = vld [vmem:[#allocation6 + $0xe04] ss:$8 sps:$4 sm:$0xff]  }
 0x217   :  { %5453 = vmatpush1.bf16.msra.mxu0 %v8294_v22  ;;  %4663 = vmatprep.subr.bf16.mxu1 %v8299_v29  ;;  %v819_v22 = vpack.c.bf16 %v499_v14, %v467_v13  ;;  %v852_v29 = vpack.c.bf16 %v564_v24, %v532_v23  ;;  %v200_v12 = vld [vmem:[#allocation3 + $0x268] sm:$0xff]  ;;  %v214_v14 = vld [vmem:[#allocation3 + $0x2d8] sm:$0xff]  ;;  %v199_v23 = vld [vmem:[#allocation3 + $0x260] sm:$0xff] }
 0x218   :  { %5454 = vmatprep.subr.bf16.mxu0 %v8302_v30  ;;  %4602 = vmatprep.mubr.bf16.mxu1 %v742_v32  ;;  %v8336_v30 = vld [vmem:[#allocation6 + $0xdb0] ss:$8 sps:$4 sm:$0xff]   ;;  %v232_v13 = vld [vmem:[#allocation3 + $0x368] sm:$0xff]  ;;  %v8368_v20 = vld [vmem:[#allocation6 + $0xe14] ss:$8 sps:$4 sm:$0xff]  }
 0x219   :  { %5393 = vmatprep.mubr.bf16.mxu0 %v756_v33  ;;  %v549_v32 = vld [vmem:[#allocation3 + $0xd50] sm:$0xff]  ;;  %v8341_v33 = vld [vmem:[#allocation6 + $0x6c4] ss:$8 sps:$4 sm:$0xff]   ;;  %v680_v19 = vpack.c.bf16 %v232_v13, %v200_v12 }
 0x21a   :  { %4664 = vmatpush1.bf16.msra.mxu1 %v8297_v31  ;;  %v517_v31 = vld [vmem:[#allocation3 + $0xc50] sm:$0xff]  ;;  %v231_v24 = vld [vmem:[#allocation3 + $0x360] sm:$0xff]  ;;  %v456_v12 = vld [vmem:[#allocation3 + $0xa68] sm:$0xff] }
 0x21b   :  { %5455 = vmatpush1.bf16.msra.mxu0 %v8300_v34  ;;  %4665 = vmatprep.subr.bf16.mxu1 %v8305_v39  ;;  %v531_v34 = vld [vmem:[#allocation3 + $0xcc0] sm:$0xff]  ;;  %v837_v39 = vpack.c.bf16 %v549_v32, %v517_v31  ;;  %v310_v31 = vld [vmem:[#allocation3 + $0x5d8] sm:$0xff]  ;;  %v679_v32 = vpack.c.bf16 %v231_v24, %v199_v23  ;;  %v488_v13 = vld [vmem:[#allocation3 + $0xb68] sm:$0xff] }
 0x21c   :  { %5456 = vmatprep.subr.bf16.mxu0 %v8308_v40  ;;  %v851_v40 = vpack.c.bf16 %v563_v35, %v531_v34  ;;  %v8369_v34 = vld [vmem:[#allocation6 + $0xe20] ss:$8 sps:$4 sm:$0xff]  }
 0x21d   :  { %4603 = vmatmul.mubr.bf16.gmra.mrb[12].mxu1 %v741_v45  ;;  %v8347_v45 = vld [vmem:[#allocation6 + $0x6d4] ss:$8 sps:$4 sm:$0xff]   ;;  %v455_v23 = vld [vmem:[#allocation3 + $0xa60] sm:$0xff] }
 0x21e   :  { %5394 = vmatmul.mubr.bf16.gmra.mrb[12].mxu0 %v755_v46  ;;  %4666 = vmatpush1.bf16.msra.mxu1 %v8303_v41  ;;  %v596_v41 = vld [vmem:[#allocation3 + $0xec8] sm:$0xff]  ;;  %v8350_v46 = vld [vmem:[#allocation6 + $0xdd4] ss:$8 sps:$4 sm:$0xff]   ;;  %v487_v24 = vld [vmem:[#allocation3 + $0xb60] sm:$0xff] }
 0x21f   :  { %5457 = vmatpush1.bf16.msra.mxu0 %v8306_v42  ;;  %4667 = vmatprep.subr.bf16.mxu1 %v8311_v49  ;;  %v628_v42 = vld [vmem:[#allocation3 + $0xfc8] sm:$0xff]  ;;  %v870_v49 = vpack.c.bf16 %v614_v38, %v582_v37  ;;  %v8372_v38 = vld [vmem:[#allocation6 + $0xe30] ss:$8 sps:$4 sm:$0xff]  }
 0x220   :  { %5458 = vmatprep.subr.bf16.mxu0 %v8314_v50  ;;  %4612 = vmatprep.mubr.bf16.mxu1 %v774_v52  ;;  %v884_v50 = vpack.c.bf16 %v628_v42, %v596_v41  ;;  %v613_v52 = vld [vmem:[#allocation3 + $0xf50] sm:$0xff] }
 0x221   :  { %5403 = vmatprep.mubr.bf16.mxu0 %v788_v53  ;;  %v595_v53 = vld [vmem:[#allocation3 + $0xec0] sm:$0xff]  ;;  %v277_v41 = vld [vmem:[#allocation3 + $0x4d0] sm:$0xff] }
 0x222   :  { %4668 = vmatpush1.bf16.msra.mxu1 %v8309_v51  ;;  %v581_v51 = vld [vmem:[#allocation3 + $0xe50] sm:$0xff] }
 0x223   :  { %5459 = vmatpush1.bf16.msra.mxu0 %v8312_v54  ;;  %4669 = vmatprep.subr.bf16.mxu1 %v8317_v59  ;;  %v627_v54 = vld [vmem:[#allocation3 + $0xfc0] sm:$0xff]  ;;  %v136_v59 = vld [vmem:[#allocation3 + $0x68] sm:$0xff]  ;;  %v309_v42 = vld [vmem:[#allocation3 + $0x5d0] sm:$0xff] }
 0x224   :  { %5460 = vmatprep.subr.bf16.mxu0 %v8320_v60  ;;  %v869_v60 = vpack.c.bf16 %v613_v52, %v581_v51  ;;  %v8380_v52 = vld [vmem:[#allocation6 + $0xe54] ss:$8 sps:$4 sm:$0xff]  }
 0x225   :  { %4613 = vmatmul.mubr.bf16.gmra.mrb[16].mxu1 %v773_v1  ;;  %v8359_v1 = vld [vmem:[#allocation6 + $0x6f4] ss:$8 sps:$4 sm:$0xff]  }
 0x226   :  { %5404 = vmatmul.mubr.bf16.gmra.mrb[16].mxu0 %v787_v2  ;;  %4670 = vmatpush1.bf16.msra.mxu1 %v8315_v61  ;;  %v883_v61 = vpack.c.bf16 %v627_v54, %v595_v53  ;;  %v8362_v2 = vld [vmem:[#allocation6 + $0xdf4] ss:$8 sps:$4 sm:$0xff]   ;;  %v8378_v54 = vld [vmem:[#allocation6 + $0xe50] ss:$8 sps:$4 sm:$0xff]  }
 0x227   :  { %5461 = vmatpush1.bf16.msra.mxu0 %v8318_v62  ;;  %4671 = vmatprep.subr.bf16.mxu1 %v8323_v5  ;;  %v168_v62 = vld [vmem:[#allocation3 + $0x168] sm:$0xff] }
 0x228   :  { %5462 = vmatprep.subr.bf16.mxu0 %v8326_v6  ;;  %4622 = vmatprep.mubr.bf16.mxu1 %v806_v8  ;;  %v648_v5 = vpack.c.bf16 %v168_v62, %v136_v59  ;;  %v662_v6 = vpack.c.bf16 %v182_v0, %v150_v63  ;;  %v167_v8 = vld [vmem:[#allocation3 + $0x160] sm:$0xff]  ;;  %v406_v62 = vld [vmem:[#allocation3 + $0x8d8] sm:$0xff] }
 0x229   :  { %5413 = vmatprep.mubr.bf16.mxu0 %v820_v9  ;;  %v149_v9 = vld [vmem:[#allocation3 + $0xd0] sm:$0xff]  ;;  %v8383_v59 = vld [vmem:[#allocation6 + $0xe64] ss:$8 sps:$4 sm:$0xff]   ;;  %v438_v63 = vld [vmem:[#allocation3 + $0x9d8] sm:$0xff] }
 0x22a   :  { %4672 = vmatpush1.bf16.msra.mxu1 %v8321_v7  ;;  %v135_v7 = vld [vmem:[#allocation3 + $0x60] sm:$0xff] }
 0x22b   :  { %5463 = vmatpush1.bf16.msra.mxu0 %v8324_v10  ;;  %4673 = vmatprep.subr.bf16.mxu1 %v8329_v15  ;;  %v181_v10 = vld [vmem:[#allocation3 + $0x1d0] sm:$0xff]  ;;  %v246_v15 = vld [vmem:[#allocation3 + $0x3d8] sm:$0xff] }
 0x22c   :  { %5464 = vmatprep.subr.bf16.mxu0 %v8332_v16  ;;  %v647_v16 = vpack.c.bf16 %v167_v8, %v135_v7  ;;  %v391_v7 = vld [vmem:[#allocation3 + $0x860] sm:$0xff] }
 0x22d   :  { %4623 = vmatmul.mubr.bf16.gmra.mrb[20].mxu1 %v805_v21  ;;  %v694_v21 = vpack.c.bf16 %v246_v15, %v214_v14  ;;  %v423_v8 = vld [vmem:[#allocation3 + $0x960] sm:$0xff]  ;;  %v470_v14 = vld [vmem:[#allocation3 + $0xad8] sm:$0xff] }
 0x22e   :  { %5414 = vmatmul.mubr.bf16.gmra.mrb[20].mxu0 %v819_v22  ;;  %4674 = vmatpush1.bf16.msra.mxu1 %v8327_v17  ;;  %v661_v17 = vpack.c.bf16 %v181_v10, %v149_v9  ;;  %v8366_v22 = vld [vmem:[#allocation6 + $0xe10] ss:$8 sps:$4 sm:$0xff]  }
 0x22f   :  { %5465 = vmatpush1.bf16.msra.mxu0 %v8330_v18  ;;  %4675 = vmatprep.subr.bf16.mxu1 %v8335_v25  ;;  %v8363_v18 = vld [vmem:[#allocation6 + $0xe00] ss:$8 sps:$4 sm:$0xff]   ;;  %v213_v25 = vld [vmem:[#allocation3 + $0x2d0] sm:$0xff]  ;;  %v502_v15 = vld [vmem:[#allocation3 + $0xbd8] sm:$0xff] }
 0x230   :  { %5466 = vmatprep.subr.bf16.mxu0 %v8338_v26  ;;  %4632 = vmatprep.mubr.bf16.mxu1 %v838_v28  ;;  %v245_v26 = vld [vmem:[#allocation3 + $0x3d0] sm:$0xff]  ;;  %v264_v28 = vld [vmem:[#allocation3 + $0x468] sm:$0xff] }
 0x231   :  { %5423 = vmatprep.mubr.bf16.mxu0 %v852_v29  ;;  %v296_v29 = vld [vmem:[#allocation3 + $0x568] sm:$0xff]  ;;  %v405_v9 = vld [vmem:[#allocation3 + $0x8d0] sm:$0xff] }
 0x232   :  { %4676 = vmatpush1.bf16.msra.mxu1 %v8333_v27  ;;  %v8371_v27 = vld [vmem:[#allocation6 + $0xe24] ss:$8 sps:$4 sm:$0xff]   ;;  %v712_v35 = vpack.c.bf16 %v296_v29, %v264_v28  ;;  %v437_v10 = vld [vmem:[#allocation3 + $0x9d0] sm:$0xff] }
 0x233   :  { %5467 = vmatpush1.bf16.msra.mxu0 %v8336_v30  ;;  %4677 = vmatprep.subr.bf16.mxu1 %v8341_v33  ;;  %v278_v30 = vld [vmem:[#allocation3 + $0x4d8] sm:$0xff]  ;;  %v693_v33 = vpack.c.bf16 %v245_v26, %v213_v25  ;;  %v469_v25 = vld [vmem:[#allocation3 + $0xad0] sm:$0xff]  ;;  %v520_v28 = vld [vmem:[#allocation3 + $0xc68] sm:$0xff] }
 0x234   :  { %5468 = vmatprep.subr.bf16.mxu0 %v8344_v36  ;;  %v8374_v36 = vld [vmem:[#allocation6 + $0xe34] ss:$8 sps:$4 sm:$0xff]   ;;  %v726_v37 = vpack.c.bf16 %v310_v31, %v278_v30  ;;  %v552_v29 = vld [vmem:[#allocation3 + $0xd68] sm:$0xff] }
 0x235   :  { %4633 = vmatmul.mubr.bf16.gmra.mrb[24].mxu1 %v837_v39  ;;  %v263_v39 = vld [vmem:[#allocation3 + $0x460] sm:$0xff]  ;;  %v501_v26 = vld [vmem:[#allocation3 + $0xbd0] sm:$0xff]  ;;  %v534_v30 = vld [vmem:[#allocation3 + $0xcd8] sm:$0xff] }
 0x236   :  { %5424 = vmatmul.mubr.bf16.gmra.mrb[24].mxu0 %v851_v40  ;;  %4678 = vmatpush1.bf16.msra.mxu1 %v8339_v43  ;;  %v295_v40 = vld [vmem:[#allocation3 + $0x560] sm:$0xff]  ;;  %v566_v31 = vld [vmem:[#allocation3 + $0xdd8] sm:$0xff] }
 0x237   :  { %5469 = vmatpush1.bf16.msra.mxu0 %v8342_v44  ;;  %4679 = vmatprep.subr.bf16.mxu1 %v8347_v45  ;;  %v8377_v43 = vld [vmem:[#allocation6 + $0xe44] ss:$8 sps:$4 sm:$0xff]  }
 0x238   :  { %5470 = vmatprep.subr.bf16.mxu0 %v8350_v46  ;;  %4642 = vmatprep.mubr.bf16.mxu1 %v870_v49  ;;  %v328_v44 = vld [vmem:[#allocation3 + $0x668] sm:$0xff]  ;;  %v342_v46 = vld [vmem:[#allocation3 + $0x6d8] sm:$0xff]  ;;  %v725_v49 = vpack.c.bf16 %v309_v42, %v277_v41  ;;  %v533_v41 = vld [vmem:[#allocation3 + $0xcd0] sm:$0xff] }
 0x239   :  { %5433 = vmatprep.mubr.bf16.mxu0 %v884_v50  ;;  %v360_v45 = vld [vmem:[#allocation3 + $0x768] sm:$0xff]  ;;  %v565_v42 = vld [vmem:[#allocation3 + $0xdd0] sm:$0xff] }
 0x23a   :  { %4680 = vmatpush1.bf16.msra.mxu1 %v8345_v47  ;;  %v374_v47 = vld [vmem:[#allocation3 + $0x7d8] sm:$0xff]  ;;  %v8375_v50 = vld [vmem:[#allocation6 + $0xe40] ss:$8 sps:$4 sm:$0xff]   ;;  %v744_v51 = vpack.c.bf16 %v360_v45, %v328_v44 }
 0x23b   :  { %5471 = vmatpush1.bf16.msra.mxu0 %v8348_v48  ;;  %4681 = vmatprep.subr.bf16.mxu1 %v8353_v55  ;;  %v711_v48 = vpack.c.bf16 %v295_v40, %v263_v39  ;;  %v758_v53 = vpack.c.bf16 %v374_v47, %v342_v46  ;;  %v327_v55 = vld [vmem:[#allocation3 + $0x660] sm:$0xff]  ;;  %v584_v44 = vld [vmem:[#allocation3 + $0xe68] sm:$0xff]  ;;  %v598_v46 = vld [vmem:[#allocation3 + $0xed8] sm:$0xff] }
 0x23c   :  { %5472 = vmatprep.subr.bf16.mxu0 %v8356_v56  ;;  %v359_v56 = vld [vmem:[#allocation3 + $0x760] sm:$0xff]  ;;  %v616_v45 = vld [vmem:[#allocation3 + $0xf68] sm:$0xff]  ;;  %v630_v47 = vld [vmem:[#allocation3 + $0xfd8] sm:$0xff] }
 0x23d   :  { %4643 = vmatmul.mubr.bf16.gmra.mrb[28].mxu1 %v869_v60  ;;  %v392_v60 = vld [vmem:[#allocation3 + $0x868] sm:$0xff]  ;;  %v743_v0 = vpack.c.bf16 %v359_v56, %v327_v55  ;;  %v519_v39 = vld [vmem:[#allocation3 + $0xc60] sm:$0xff] }
 0x23e   :  { %5434 = vmatmul.mubr.bf16.gmra.mrb[28].mxu0 %v883_v61  ;;  %4682 = vmatpush1.bf16.msra.mxu1 %v8351_v57  ;;  %v341_v57 = vld [vmem:[#allocation3 + $0x6d0] sm:$0xff]  ;;  %v424_v61 = vld [vmem:[#allocation3 + $0x968] sm:$0xff]  ;;  %v551_v40 = vld [vmem:[#allocation3 + $0xd60] sm:$0xff] }
 0x23f   :  { %5473 = vmatpush1.bf16.msra.mxu0 %v8354_v58  ;;  %4683 = vmatprep.subr.bf16.mxu1 %v8359_v1  ;;  %v373_v58 = vld [vmem:[#allocation3 + $0x7d0] sm:$0xff]  ;;  %v583_v55 = vld [vmem:[#allocation3 + $0xe60] sm:$0xff] }
 0x240   :  { %5474 = vmatprep.subr.bf16.mxu0 %v8362_v2  ;;  %4685 = vmatprep.mubr.bf16.mxu1 %v648_v5  ;;  %v757_v1 = vpack.c.bf16 %v373_v58, %v341_v57  ;;  %v8381_v2 = vld [vmem:[#allocation6 + $0xe60] ss:$8 sps:$4 sm:$0xff]   ;;  %v790_v5 = vpack.c.bf16 %v438_v63, %v406_v62  ;;  %v597_v57 = vld [vmem:[#allocation3 + $0xed0] sm:$0xff] }
 0x241   :  { %5476 = vmatprep.mubr.bf16.mxu0 %v662_v6  ;;  %v8384_v6 = vld [vmem:[#allocation6 + $0xe70] ss:$8 sps:$4 sm:$0xff]   ;;  %v615_v56 = vld [vmem:[#allocation3 + $0xf60] sm:$0xff] }
 0x242   :  { %4684 = vmatpush1.bf16.msra.mxu1 %v8357_v3  ;;  %v776_v3 = vpack.c.bf16 %v424_v61, %v392_v60  ;;  %v629_v58 = vld [vmem:[#allocation3 + $0xfd0] sm:$0xff]  ;;  %v152_v60 = vld [vmem:[#allocation3 + $0xe8] sm:$0xff]  ;;  %v871_v62 = vpack.c.bf16 %v615_v56, %v583_v55  ;;  %v503_v55 = vld [vmem:[#allocation3 + $0xbe0] sm:$0xff] }
 0x243   :  { %5475 = vmatpush1.bf16.msra.mxu0 %v8360_v4  ;;  %v8386_v4 = vld [vmem:[#allocation6 + $0xe74] ss:$8 sps:$4 sm:$0xff]   ;;  %v184_v61 = vld [vmem:[#allocation3 + $0x1e8] sm:$0xff]  ;;  %v885_v63 = vpack.c.bf16 %v629_v58, %v597_v57 }
 0x244   :  { %5557 = vmatprep.subr.bf16.mxu0 %v8365_v11  ;;  %v8389_v11 = vld [vmem:[#allocation6 + $0xe84] ss:$8 sps:$4 sm:$0xff]  }
 0x245   :  { %4686 = vmatmul.mubr.bf16.vlgmr.msra.gmra.mrb[0].mxu1 %v647_v16  ;;  %v775_v16 = vpack.c.bf16 %v423_v8, %v391_v7  ;;  %v216_v7 = vld [vmem:[#allocation3 + $0x2e8] sm:$0xff] }
 0x246   :  { %5477 = vmatmul.mubr.bf16.vlgmr.msra.gmra.mrb[0].mxu0 %v661_v17  ;;  %4695 = vmatprep.mubr.bf16.mxu1 %v680_v19  ;;  %v789_v17 = vpack.c.bf16 %v437_v10, %v405_v9  ;;  %v808_v19 = vpack.c.bf16 %v488_v13, %v456_v12  ;;  %v248_v8 = vld [vmem:[#allocation3 + $0x3e8] sm:$0xff]  ;;  %v8414_v13 = vld [vmem:[#allocation6 + $0xf10] ss:$8 sps:$4 sm:$0xff]  }
 0x247   :  { %5558 = vmatpush1.bf16.msra.mxu0 %v8363_v18  ;;  %5486 = vmatprep.mubr.bf16.mxu0 %v694_v21  ;;  %v8387_v18 = vld [vmem:[#allocation6 + $0xe80] ss:$8 sps:$4 sm:$0xff]   ;;  %v822_v21 = vpack.c.bf16 %v502_v15, %v470_v14  ;;  %v696_v12 = vpack.c.bf16 %v248_v8, %v216_v7  ;;  %v8443_v56 = vld [vmem:[#allocation6 + $0xfa4] ss:$8 sps:$4 sm:$0xff]   ;;  %v8452_v8 = vld [vmem:[#allocation6 + $0xfd4] ss:$8 sps:$4 sm:$0xff]  }
 0x248   :  { %5559 = vmatprep.subr.bf16.mxu0 %v8368_v20  ;;  %v8392_v20 = vld [vmem:[#allocation6 + $0xe94] ss:$8 sps:$4 sm:$0xff]   ;;  %v8411_v10 = vld [vmem:[#allocation6 + $0xf00] ss:$8 sps:$4 sm:$0xff]  }
 0x249   :  { %v215_v14 = vld [vmem:[#allocation3 + $0x2e0] sm:$0xff]  ;;  %v536_v57 = vld [vmem:[#allocation3 + $0xce8] sm:$0xff] }
 0x24a   :  { %v247_v15 = vld [vmem:[#allocation3 + $0x3e0] sm:$0xff]  ;;  %v568_v58 = vld [vmem:[#allocation3 + $0xde8] sm:$0xff] }
 0x24b   :  { %5560 = vmatpush1.bf16.msra.mxu0 %v8366_v22  ;;  %v8390_v22 = vld [vmem:[#allocation6 + $0xe90] ss:$8 sps:$4 sm:$0xff]  }
 0x24c   :  { %5561 = vmatprep.subr.bf16.mxu0 %v8371_v27  ;;  %v8395_v27 = vld [vmem:[#allocation6 + $0xea4] ss:$8 sps:$4 sm:$0xff]  }
 0x24d   :  { %4696 = vmatmul.mubr.bf16.gmra.mrb[4].mxu1 %v679_v32  ;;  %v807_v32 = vpack.c.bf16 %v487_v24, %v455_v23  ;;  %v8420_v23 = vld [vmem:[#allocation6 + $0xf30] ss:$8 sps:$4 sm:$0xff]   ;;  %v279_v24 = vld [vmem:[#allocation3 + $0x4e0] sm:$0xff] }
 0x24e   :  { %5487 = vmatmul.mubr.bf16.gmra.mrb[4].mxu0 %v693_v33  ;;  %4705 = vmatprep.mubr.bf16.mxu1 %v712_v35  ;;  %v821_v33 = vpack.c.bf16 %v501_v26, %v469_v25  ;;  %v840_v35 = vpack.c.bf16 %v552_v29, %v520_v28  ;;  %v311_v25 = vld [vmem:[#allocation3 + $0x5e0] sm:$0xff]  ;;  %v376_v28 = vld [vmem:[#allocation3 + $0x7e8] sm:$0xff] }
 0x24f   :  { %5562 = vmatpush1.bf16.msra.mxu0 %v8369_v34  ;;  %5496 = vmatprep.mubr.bf16.mxu0 %v726_v37  ;;  %v8393_v34 = vld [vmem:[#allocation6 + $0xea0] ss:$8 sps:$4 sm:$0xff]   ;;  %v854_v37 = vpack.c.bf16 %v566_v31, %v534_v30  ;;  %v8425_v26 = vld [vmem:[#allocation6 + $0xf44] ss:$8 sps:$4 sm:$0xff]   ;;  %v727_v29 = vpack.c.bf16 %v311_v25, %v279_v24 }
 0x250   :  { %5563 = vmatprep.subr.bf16.mxu0 %v8374_v36  ;;  %v8398_v36 = vld [vmem:[#allocation6 + $0xeb4] ss:$8 sps:$4 sm:$0xff]   ;;  %v8423_v30 = vld [vmem:[#allocation6 + $0xf40] ss:$8 sps:$4 sm:$0xff]  }
 0x253   :  { %5564 = vmatpush1.bf16.msra.mxu0 %v8372_v38  ;;  %v8396_v38 = vld [vmem:[#allocation6 + $0xeb0] ss:$8 sps:$4 sm:$0xff]  }
 0x254   :  { %5565 = vmatprep.subr.bf16.mxu0 %v8377_v43  ;;  %v8401_v43 = vld [vmem:[#allocation6 + $0xec4] ss:$8 sps:$4 sm:$0xff]  }
 0x255   :  { %4706 = vmatmul.mubr.bf16.gmra.mrb[8].mxu1 %v711_v48  ;;  %v839_v48 = vpack.c.bf16 %v551_v40, %v519_v39  ;;  %v8429_v40 = vld [vmem:[#allocation6 + $0xf60] ss:$8 sps:$4 sm:$0xff]  }
 0x256   :  { %5497 = vmatmul.mubr.bf16.gmra.mrb[8].mxu0 %v725_v49  ;;  %4715 = vmatprep.mubr.bf16.mxu1 %v744_v51  ;;  %v853_v49 = vpack.c.bf16 %v565_v42, %v533_v41  ;;  %v872_v51 = vpack.c.bf16 %v616_v45, %v584_v44  ;;  %v8434_v42 = vld [vmem:[#allocation6 + $0xf74] ss:$8 sps:$4 sm:$0xff]   ;;  %v407_v44 = vld [vmem:[#allocation3 + $0x8e0] sm:$0xff] }
 0x257   :  { %5566 = vmatpush1.bf16.msra.mxu0 %v8375_v50  ;;  %5506 = vmatprep.mubr.bf16.mxu0 %v758_v53  ;;  %v8399_v50 = vld [vmem:[#allocation6 + $0xec0] ss:$8 sps:$4 sm:$0xff]   ;;  %v886_v53 = vpack.c.bf16 %v630_v47, %v598_v46  ;;  %v8437_v46 = vld [vmem:[#allocation6 + $0xf84] ss:$8 sps:$4 sm:$0xff]  }
 0x258   :  { %5567 = vmatprep.subr.bf16.mxu0 %v8380_v52  ;;  %v8404_v52 = vld [vmem:[#allocation6 + $0xed4] ss:$8 sps:$4 sm:$0xff]   ;;  %v439_v45 = vld [vmem:[#allocation3 + $0x9e0] sm:$0xff]  ;;  %v472_v47 = vld [vmem:[#allocation3 + $0xae8] sm:$0xff] }
 0x25b   :  { %5568 = vmatpush1.bf16.msra.mxu0 %v8378_v54  ;;  %v8402_v54 = vld [vmem:[#allocation6 + $0xed0] ss:$8 sps:$4 sm:$0xff]  }
 0x25c   :  { %5569 = vmatprep.subr.bf16.mxu0 %v8383_v59  ;;  %v8407_v59 = vld [vmem:[#allocation6 + $0xee4] ss:$8 sps:$4 sm:$0xff]  }
 0x25d   :  { %4716 = vmatmul.mubr.bf16.gmra.mrb[12].mxu1 %v743_v0  ;;  %v8405_v0 = vld [vmem:[#allocation6 + $0xee0] ss:$8 sps:$4 sm:$0xff]  }
 0x25e   :  { %5507 = vmatmul.mubr.bf16.gmra.mrb[12].mxu0 %v757_v1  ;;  %4725 = vmatprep.mubr.bf16.mxu1 %v776_v3  ;;  %v664_v1 = vpack.c.bf16 %v184_v61, %v152_v60  ;;  %v8408_v3 = vld [vmem:[#allocation6 + $0xef0] ss:$8 sps:$4 sm:$0xff]   ;;  %v8441_v60 = vld [vmem:[#allocation6 + $0xfa0] ss:$8 sps:$4 sm:$0xff]   ;;  %v856_v61 = vpack.c.bf16 %v568_v58, %v536_v57 }
 0x25f   :  { %5570 = vmatpush1.bf16.msra.mxu0 %v8381_v2  ;;  %5516 = vmatprep.mubr.bf16.mxu0 %v790_v5  ;;  %v8410_v2 = vld [vmem:[#allocation6 + $0xef4] ss:$8 sps:$4 sm:$0xff]   ;;  %v183_v5 = vld [vmem:[#allocation3 + $0x1e0] sm:$0xff] }
 0x260   :  { %5571 = vmatprep.subr.bf16.mxu0 %v8386_v4  ;;  %v151_v4 = vld [vmem:[#allocation3 + $0xe0] sm:$0xff] }
 0x261   :  { %v663_v9 = vpack.c.bf16 %v183_v5, %v151_v4  ;;  %v632_v4 = vld [vmem:[#allocation3 + $0xfe8] sm:$0xff] }
 0x263   :  { %5572 = vmatpush1.bf16.msra.mxu0 %v8384_v6  ;;  %v8413_v6 = vld [vmem:[#allocation6 + $0xf04] ss:$8 sps:$4 sm:$0xff]  }
 0x264   :  { %5573 = vmatprep.subr.bf16.mxu0 %v8389_v11  ;;  %v8416_v11 = vld [vmem:[#allocation6 + $0xf14] ss:$8 sps:$4 sm:$0xff]  }
 0x265   :  { %4726 = vmatmul.mubr.bf16.gmra.mrb[16].mxu1 %v775_v16  ;;  %v8419_v16 = vld [vmem:[#allocation6 + $0xf24] ss:$8 sps:$4 sm:$0xff]  }
 0x266   :  { %5517 = vmatmul.mubr.bf16.gmra.mrb[16].mxu0 %v789_v17  ;;  %4735 = vmatprep.mubr.bf16.mxu1 %v808_v19  ;;  %v280_v17 = vld [vmem:[#allocation3 + $0x4e8] sm:$0xff] }
 0x267   :  { %5574 = vmatpush1.bf16.msra.mxu0 %v8387_v18  ;;  %5526 = vmatprep.mubr.bf16.mxu0 %v822_v21  ;;  %v312_v18 = vld [vmem:[#allocation3 + $0x5e8] sm:$0xff]  ;;  %v8422_v21 = vld [vmem:[#allocation6 + $0xf34] ss:$8 sps:$4 sm:$0xff]  }
 0x268   :  { %5575 = vmatprep.subr.bf16.mxu0 %v8392_v20  ;;  %v8417_v19 = vld [vmem:[#allocation6 + $0xf20] ss:$8 sps:$4 sm:$0xff]   ;;  %v695_v20 = vpack.c.bf16 %v247_v15, %v215_v14  ;;  %v186_v14 = vld [vmem:[#allocation3 + $0x1f8] sm:$0xff] }
 0x26b   :  { %5576 = vmatpush1.bf16.msra.mxu0 %v8390_v22  ;;  %v728_v22 = vpack.c.bf16 %v312_v18, %v280_v17  ;;  %v8458_v18 = vld [vmem:[#allocation6 + $0xff4] ss:$8 sps:$4 sm:$0xff]  }
 0x26c   :  { %5577 = vmatprep.subr.bf16.mxu0 %v8395_v27  ;;  %v344_v27 = vld [vmem:[#allocation3 + $0x6e8] sm:$0xff] }
 0x26d   :  { %4736 = vmatmul.mubr.bf16.gmra.mrb[20].mxu1 %v807_v32  ;;  %v760_v31 = vpack.c.bf16 %v376_v28, %v344_v27  ;;  %v8428_v32 = vld [vmem:[#allocation6 + $0xf54] ss:$8 sps:$4 sm:$0xff]  }
 0x26e   :  { %5527 = vmatmul.mubr.bf16.gmra.mrb[20].mxu0 %v821_v33  ;;  %4745 = vmatprep.mubr.bf16.mxu1 %v840_v35  ;;  %v8426_v33 = vld [vmem:[#allocation6 + $0xf50] ss:$8 sps:$4 sm:$0xff]   ;;  %v375_v35 = vld [vmem:[#allocation3 + $0x7e0] sm:$0xff] }
 0x26f   :  { %5578 = vmatpush1.bf16.msra.mxu0 %v8393_v34  ;;  %5536 = vmatprep.mubr.bf16.mxu0 %v854_v37  ;;  %v343_v34 = vld [vmem:[#allocation3 + $0x6e0] sm:$0xff]  ;;  %v408_v37 = vld [vmem:[#allocation3 + $0x8e8] sm:$0xff]  ;;  %v249_v27 = vld [vmem:[#allocation3 + $0x3f0] sm:$0xff] }
 0x270   :  { %5579 = vmatprep.subr.bf16.mxu0 %v8398_v36  ;;  %v8431_v36 = vld [vmem:[#allocation6 + $0xf64] ss:$8 sps:$4 sm:$0xff]   ;;  %v759_v39 = vpack.c.bf16 %v375_v35, %v343_v34  ;;  %v282_v28 = vld [vmem:[#allocation3 + $0x4f8] sm:$0xff] }
 0x271   :  { %v346_v34 = vld [vmem:[#allocation3 + $0x6f8] sm:$0xff] }
 0x272   :  { %v378_v35 = vld [vmem:[#allocation3 + $0x7f8] sm:$0xff] }
 0x273   :  { %5580 = vmatpush1.bf16.msra.mxu0 %v8396_v38  ;;  %v440_v38 = vld [vmem:[#allocation3 + $0x9e8] sm:$0xff] }
 0x274   :  { %5581 = vmatprep.subr.bf16.mxu0 %v8401_v43  ;;  %v792_v41 = vpack.c.bf16 %v440_v38, %v408_v37  ;;  %v8432_v43 = vld [vmem:[#allocation6 + $0xf70] ss:$8 sps:$4 sm:$0xff]   ;;  %v762_v37 = vpack.c.bf16 %v378_v35, %v346_v34  ;;  %v8459_v38 = vld [vmem:[#allocation9 + $0x40] sm:$0xff]  }
 0x275   :  { %4746 = vmatmul.mubr.bf16.gmra.mrb[24].mxu1 %v839_v48  ;;  %v504_v48 = vld [vmem:[#allocation3 + $0xbe8] sm:$0xff]  ;;  %7053 = vmatprep.subr.bf16.mxu1 %v8459_v38 }
 0x276   :  { %5537 = vmatmul.mubr.bf16.gmra.mrb[24].mxu0 %v853_v49  ;;  %4755 = vmatprep.mubr.bf16.mxu1 %v872_v51  ;;  %v791_v49 = vpack.c.bf16 %v439_v45, %v407_v44  ;;  %v824_v51 = vpack.c.bf16 %v504_v48, %v472_v47  ;;  %v442_v44 = vld [vmem:[#allocation3 + $0x9f8] sm:$0xff]  ;;  %v8462_v45 = vld [vmem:[#allocation9 + $0x8] sm:$0xff]  }
 0x277   :  { %5582 = vmatpush1.bf16.msra.mxu0 %v8399_v50  ;;  %5546 = vmatprep.mubr.bf16.mxu0 %v886_v53  ;;  %v8435_v50 = vld [vmem:[#allocation6 + $0xf80] ss:$8 sps:$4 sm:$0xff]   ;;  %v8438_v53 = vld [vmem:[#allocation6 + $0xf90] ss:$8 sps:$4 sm:$0xff]  }
 0x278   :  { %5583 = vmatprep.subr.bf16.mxu0 %v8404_v52  ;;  %v8440_v52 = vld [vmem:[#allocation6 + $0xf94] ss:$8 sps:$4 sm:$0xff]  }
 0x27b   :  { %5584 = vmatpush1.bf16.msra.mxu0 %v8402_v54  ;;  %v471_v54 = vld [vmem:[#allocation3 + $0xae0] sm:$0xff] }
 0x27c   :  { %5585 = vmatprep.subr.bf16.mxu0 %v8407_v59  ;;  %v823_v59 = vpack.c.bf16 %v503_v55, %v471_v54  ;;  %v506_v54 = vld [vmem:[#allocation3 + $0xbf8] sm:$0xff] }
 0x27d   :  { %4756 = vmatmul.mubr.bf16.gmra.mrb[28].mxu1 %v871_v62  ;;  %v8446_v62 = vld [vmem:[#allocation6 + $0xfb4] ss:$8 sps:$4 sm:$0xff]  }
 0x27e   :  { %5547 = vmatmul.mubr.bf16.gmra.mrb[28].mxu0 %v885_v63  ;;  %v8444_v63 = vld [vmem:[#allocation6 + $0xfb0] ss:$8 sps:$4 sm:$0xff]  }
 0x27f   :  { %5586 = vmatpush1.bf16.msra.mxu0 %v8405_v0  ;;  %5589 = vmatprep.mubr.bf16.mxu0 %v664_v1  ;;  %v535_v0 = vld [vmem:[#allocation3 + $0xce0] sm:$0xff] }
 0x280   :  { %5587 = vmatprep.subr.bf16.mxu0 %v8410_v2  ;;  %v567_v1 = vld [vmem:[#allocation3 + $0xde0] sm:$0xff] }
 0x281   :  { %v8449_v2 = vld [vmem:[#allocation6 + $0xfc4] ss:$8 sps:$4 sm:$0xff]   ;;  %v855_v5 = vpack.c.bf16 %v567_v1, %v535_v0  ;;  %v8466_v55 = vld [vmem:[#allocation9 + $0x18] sm:$0xff]  }
 0x282   :  { %v570_v0 = vld [vmem:[#allocation3 + $0xdf8] sm:$0xff]  ;;  %v8470_v1 = vld [vmem:[#allocation9 + $0x28] sm:$0xff]  }
 0x283   :  { %5588 = vmatpush1.bf16.msra.mxu0 %v8408_v3  ;;  %v600_v3 = vld [vmem:[#allocation3 + $0xee8] sm:$0xff] }
 0x284   :  { %5670 = vmatprep.subr.bf16.mxu0 %v8413_v6  ;;  %v8447_v6 = vld [vmem:[#allocation6 + $0xfc0] ss:$8 sps:$4 sm:$0xff]   ;;  %v888_v7 = vpack.c.bf16 %v632_v4, %v600_v3 }
 0x286   :  { %5590 = vmatmul.mubr.bf16.vlgmr.msra.gmra.mrb[0].mxu0 %v663_v9  ;;  %v8450_v9 = vld [vmem:[#allocation6 + $0xfd0] ss:$8 sps:$4 sm:$0xff]  }
 0x287   :  { %5671 = vmatpush1.bf16.msra.mxu0 %v8411_v10  ;;  %5599 = vmatprep.mubr.bf16.mxu0 %v696_v12  ;;  %v599_v10 = vld [vmem:[#allocation3 + $0xee0] sm:$0xff] }
 0x288   :  { %5672 = vmatprep.subr.bf16.mxu0 %v8416_v11  ;;  %v631_v11 = vld [vmem:[#allocation3 + $0xfe0] sm:$0xff] }
 0x289   :  { %v8455_v12 = vld [vmem:[#allocation6 + $0xfe4] ss:$8 sps:$4 sm:$0xff]   ;;  %v887_v15 = vpack.c.bf16 %v631_v11, %v599_v10 }
 0x28b   :  { %5673 = vmatpush1.bf16.msra.mxu0 %v8414_v13  ;;  %v154_v13 = vld [vmem:[#allocation3 + $0xf8] sm:$0xff] }
 0x28c   :  { %5674 = vmatprep.subr.bf16.mxu0 %v8419_v16  ;;  %v8453_v16 = vld [vmem:[#allocation6 + $0xfe0] ss:$8 sps:$4 sm:$0xff]   ;;  %v666_v17 = vpack.c.bf16 %v186_v14, %v154_v13  ;;  %v633_v13 = vld [vmem:[#allocation3 + $0xff0] sm:$0xff] }
 0x28e   :  { %5600 = vmatmul.mubr.bf16.gmra.mrb[4].mxu0 %v695_v20  ;;  %v153_v20 = vld [vmem:[#allocation3 + $0xf0] sm:$0xff] }
 0x28f   :  { %5675 = vmatpush1.bf16.msra.mxu0 %v8417_v19  ;;  %5609 = vmatprep.mubr.bf16.mxu0 %v728_v22  ;;  %v8456_v19 = vld [vmem:[#allocation6 + $0xff0] ss:$8 sps:$4 sm:$0xff]  }
 0x290   :  { %5676 = vmatprep.subr.bf16.mxu0 %v8422_v21  ;;  %v185_v21 = vld [vmem:[#allocation3 + $0x1f0] sm:$0xff]  ;;  %v218_v22 = vld [vmem:[#allocation3 + $0x2f8] sm:$0xff] }
 0x291   :  { %v665_v24 = vpack.c.bf16 %v185_v21, %v153_v20  ;;  %v8474_v20 = vld [vmem:[#allocation9 + $0x38] sm:$0xff]  }
 0x293   :  { %5677 = vmatpush1.bf16.msra.mxu0 %v8420_v23  ;;  %v250_v23 = vld [vmem:[#allocation3 + $0x3f8] sm:$0xff] }
 0x294   :  { %5678 = vmatprep.subr.bf16.mxu0 %v8425_v26  ;;  %v698_v25 = vpack.c.bf16 %v250_v23, %v218_v22  ;;  %v217_v26 = vld [vmem:[#allocation3 + $0x2f0] sm:$0xff] }
 0x296   :  { %5610 = vmatmul.mubr.bf16.gmra.mrb[8].mxu0 %v727_v29  ;;  %v314_v29 = vld [vmem:[#allocation3 + $0x5f8] sm:$0xff] }
 0x297   :  { %5679 = vmatpush1.bf16.msra.mxu0 %v8423_v30  ;;  %5619 = vmatprep.mubr.bf16.mxu0 %v760_v31  ;;  %v697_v30 = vpack.c.bf16 %v249_v27, %v217_v26  ;;  %v730_v31 = vpack.c.bf16 %v314_v29, %v282_v28 }
 0x298   :  { %5680 = vmatprep.subr.bf16.mxu0 %v8428_v32  ;;  %v281_v32 = vld [vmem:[#allocation3 + $0x4f0] sm:$0xff] }
 0x29b   :  { %5681 = vmatpush1.bf16.msra.mxu0 %v8426_v33  ;;  %v313_v33 = vld [vmem:[#allocation3 + $0x5f0] sm:$0xff] }
 0x29c   :  { %5682 = vmatprep.subr.bf16.mxu0 %v8431_v36  ;;  %v729_v36 = vpack.c.bf16 %v313_v33, %v281_v32 }
 0x29e   :  { %5620 = vmatmul.mubr.bf16.gmra.mrb[12].mxu0 %v759_v39  ;;  %v8460_v39 = vld [vmem:[#allocation9] sm:$0xff]  }
 0x29f   :  { %5683 = vmatpush1.bf16.msra.mxu0 %v8429_v40  ;;  %5629 = vmatprep.mubr.bf16.mxu0 %v792_v41  ;;  %v8461_v40 = vld [vmem:[#allocation9 + $0x48] sm:$0xff]  }
 0x2a0   :  { %5684 = vmatprep.subr.bf16.mxu0 %v8434_v42  ;;  %v345_v41 = vld [vmem:[#allocation3 + $0x6f0] sm:$0xff]  ;;  %7054 = vmatpush3.bf16.msra.mxu1 %v8460_v39 }
 0x2a1   :  { %v377_v42 = vld [vmem:[#allocation3 + $0x7f0] sm:$0xff]  ;;  %7055 = vmatprep.subr.bf16.mxu1 %v8461_v40 }
 0x2a2   :  { %v761_v47 = vpack.c.bf16 %v377_v42, %v345_v41 }
 0x2a3   :  { %5685 = vmatpush1.bf16.msra.mxu0 %v8432_v43  ;;  %v410_v43 = vld [vmem:[#allocation3 + $0x8f8] sm:$0xff] }
 0x2a4   :  { %5686 = vmatprep.subr.bf16.mxu0 %v8437_v46  ;;  %v8463_v46 = vld [vmem:[#allocation9 + $0x50] sm:$0xff]   ;;  %v794_v48 = vpack.c.bf16 %v442_v44, %v410_v43  ;;  %7056 = vmatpush3.bf16.msra.mxu1 %v8462_v45 }
 0x2a5   :  { %7057 = vmatprep.subr.bf16.mxu1 %v8463_v46 }
 0x2a6   :  { %5630 = vmatmul.mubr.bf16.gmra.mrb[16].mxu0 %v791_v49  ;;  %v8464_v49 = vld [vmem:[#allocation9 + $0x10] sm:$0xff]  }
 0x2a7   :  { %5687 = vmatpush1.bf16.msra.mxu0 %v8435_v50  ;;  %5639 = vmatprep.mubr.bf16.mxu0 %v824_v51  ;;  %v8465_v50 = vld [vmem:[#allocation9 + $0x58] sm:$0xff]   ;;  %v409_v51 = vld [vmem:[#allocation3 + $0x8f0] sm:$0xff] }
 0x2a8   :  { %5688 = vmatprep.subr.bf16.mxu0 %v8440_v52  ;;  %v441_v52 = vld [vmem:[#allocation3 + $0x9f0] sm:$0xff]  ;;  %7058 = vmatpush3.bf16.msra.mxu1 %v8464_v49  ;;  %v8475_v49 = vld [vmem:[%s9128_s5] sm:$0xff]  }
 0x2a9   :  { %7059 = vmatprep.subr.bf16.mxu1 %v8465_v50  ;;  %v793_v57 = vpack.c.bf16 %v441_v52, %v409_v51  ;;  %v1405_v50 = vlaneseq }
 0x2ab   :  { %5689 = vmatpush1.bf16.msra.mxu0 %v8438_v53  ;;  %v474_v53 = vld [vmem:[#allocation3 + $0xaf8] sm:$0xff]  ;;  %v1406_v51 = vshrl.u32 %v1405_v50, 7 }
 0x2ac   :  { %5690 = vmatprep.subr.bf16.mxu0 %v8443_v56  ;;  %v8467_v56 = vld [vmem:[#allocation9 + $0x60] sm:$0xff]   ;;  %v826_v58 = vpack.c.bf16 %v506_v54, %v474_v53  ;;  %7060 = vmatpush3.bf16.msra.mxu1 %v8466_v55  ;;  %v1403_v53 = vld [vmem:[#allocation8] sm:$0x3] }
 0x2ad   :  { %7061 = vmatprep.subr.bf16.mxu1 %v8467_v56  ;;  %v1407_v52 = vsub.s32 0, %v1406_v51  ;;  %v1411_v54 = vsub.s32 1, %v1406_v51 }
 0x2ae   :  { %5640 = vmatmul.mubr.bf16.gmra.mrb[20].mxu0 %v823_v59  ;;  %v8468_v59 = vld [vmem:[#allocation9 + $0x20] sm:$0xff]  }
 0x2af   :  { %5691 = vmatpush1.bf16.msra.mxu0 %v8441_v60  ;;  %5649 = vmatprep.mubr.bf16.mxu0 %v856_v61  ;;  %v8469_v60 = vld [vmem:[#allocation9 + $0x68] sm:$0xff]   ;;  %v8942_v55 = vrot.slane %v1403_v53, %v1407_v52  ;;  %v8944_v56 = vrot.slane %v1403_v53, %v1411_v54 }
 0x2b0   :  { %5692 = vmatprep.subr.bf16.mxu0 %v8446_v62  ;;  %v473_v61 = vld [vmem:[#allocation3 + $0xaf0] sm:$0xff]  ;;  %7062 = vmatpush3.bf16.msra.mxu1 %v8468_v59 }
 0x2b1   :  { %v505_v62 = vld [vmem:[#allocation3 + $0xbf0] sm:$0xff]  ;;  %7063 = vmatprep.subr.bf16.mxu1 %v8469_v60 }
 0x2b2   :  { %v825_v3 = vpack.c.bf16 %v505_v62, %v473_v61 }
 0x2b3   :  { %5693 = vmatpush1.bf16.msra.mxu0 %v8444_v63  ;;  %v538_v63 = vld [vmem:[#allocation3 + $0xcf8] sm:$0xff] }
 0x2b4   :  { %5694 = vmatprep.subr.bf16.mxu0 %v8449_v2  ;;  %v8471_v2 = vld [vmem:[#allocation9 + $0x70] sm:$0xff]   ;;  %v858_v4 = vpack.c.bf16 %v570_v0, %v538_v63  ;;  %7064 = vmatpush3.bf16.msra.mxu1 %v8470_v1 }
 0x2b5   :  { %7065 = vmatprep.subr.bf16.mxu1 %v8471_v2 }
 0x2b6   :  { %5650 = vmatmul.mubr.bf16.gmra.mrb[24].mxu0 %v855_v5  ;;  %v8472_v5 = vld [vmem:[#allocation9 + $0x30] sm:$0xff]  }
 0x2b7   :  { %5695 = vmatpush1.bf16.msra.mxu0 %v8447_v6  ;;  %5659 = vmatprep.mubr.bf16.mxu0 %v888_v7  ;;  %v537_v6 = vld [vmem:[#allocation3 + $0xcf0] sm:$0xff] }
 0x2b8   :  { %5696 = vmatprep.subr.bf16.mxu0 %v8452_v8  ;;  %v569_v7 = vld [vmem:[#allocation3 + $0xdf0] sm:$0xff]  ;;  %v602_v8 = vld [vmem:[#allocation3 + $0xef8] sm:$0xff]  ;;  %7066 = vmatpush3.bf16.msra.mxu1 %v8472_v5 }
 0x2b9   :  { %v857_v10 = vpack.c.bf16 %v569_v7, %v537_v6 }
 0x2bb   :  { %5697 = vmatpush1.bf16.msra.mxu0 %v8450_v9  ;;  %v634_v9 = vld [vmem:[#allocation3 + $0xff8] sm:$0xff] }
 0x2bc   :  { %5698 = vmatprep.subr.bf16.mxu0 %v8455_v12  ;;  %v890_v11 = vpack.c.bf16 %v634_v9, %v602_v8  ;;  %v601_v12 = vld [vmem:[#allocation3 + $0xef0] sm:$0xff] }
 0x2bd   :  { %v889_v14 = vpack.c.bf16 %v633_v13, %v601_v12 }
 0x2be   :  { %5660 = vmatmul.mubr.bf16.gmra.mrb[28].mxu0 %v887_v15 }
 0x2bf   :  { %5699 = vmatpush1.bf16.msra.mxu0 %v8453_v16  ;;  %5702 = vmatprep.mubr.bf16.mxu0 %v666_v17 }
 0x2c0   :  { %5700 = vmatprep.subr.bf16.mxu0 %v8458_v18 }
 0x2c3   :  { %5701 = vmatpush1.bf16.msra.mxu0 %v8456_v19  ;;  %v8473_v19 = vld [vmem:[#allocation9 + $0x78] sm:$0xff]  }
 0x2c4   :  { %7067 = vmatprep.subr.bf16.mxu1 %v8473_v19 }
 0x2c5   :  { %7068 = vmatpush3.bf16.msra.mxu1 %v8474_v20 }
 0x2c6   :  { %5703 = vmatmul.mubr.bf16.vlgmr.msra.gmra.mrb[0].mxu0 %v665_v24  ;;  %7133 = vmatprep.subr.bf16.mxu1 %v8475_v49 }
 0x2c7   :  { %5712 = vmatprep.mubr.bf16.mxu0 %v698_v25 }
 0x2ce   :  { %5713 = vmatmul.mubr.bf16.gmra.mrb[4].mxu0 %v697_v30 }
 0x2cf   :  { %5722 = vmatprep.mubr.bf16.mxu0 %v730_v31 }
 0x2d6   :  { %5723 = vmatmul.mubr.bf16.gmra.mrb[8].mxu0 %v729_v36 }
 0x2d7   :  { %5732 = vmatprep.mubr.bf16.mxu0 %v762_v37 }
 0x2de   :  { %5733 = vmatmul.mubr.bf16.gmra.mrb[12].mxu0 %v761_v47 }
 0x2df   :  { %5742 = vmatprep.mubr.bf16.mxu0 %v794_v48 }
 0x2e6   :  { %5743 = vmatmul.mubr.bf16.gmra.mrb[16].mxu0 %v793_v57 }
 0x2e7   :  { %5752 = vmatprep.mubr.bf16.mxu0 %v826_v58 }
 0x2ee   :  { %5753 = vmatmul.mubr.bf16.gmra.mrb[20].mxu0 %v825_v3 }
 0x2ef   :  { %5762 = vmatprep.mubr.bf16.mxu0 %v858_v4 }
 0x2f6   :  { %5763 = vmatmul.mubr.bf16.gmra.mrb[24].mxu0 %v857_v10 }
 0x2f7   :  { %5772 = vmatprep.mubr.bf16.mxu0 %v890_v11 }
 0x2fe   :  { %5773 = vmatmul.mubr.bf16.gmra.mrb[28].mxu0 %v889_v14 }
 0x318   :  { %v4687_v15 = vpop.f32.mrb[0].mxu1 }
 0x319   :  { %v4689_v16 = vpop.f32.mrb[1].mxu1  ;;  %v7165_v57 = vadd.f32 %v4687_v15, %v8942_v55 }
 0x31a   :  { %v4691_v17 = vpop.f32.mrb[2].mxu1  ;;  %v7167_v58 = vadd.f32 %v4689_v16, %v8944_v56 }
 0x31b   :  { %v4693_v18 = vpop.f32.mrb[3].mxu1  ;;  %v7169_v60 = vadd.f32 %v4691_v17, %v8942_v55  ;;  %v8476_v17 = vld [vmem:[%s9128_s5 + $0x8] sm:$0xff]  }
 0x31c   :  { %v7171_v63 = vadd.f32 %v4693_v18, %v8944_v56 }
 0x320   :  { %v4697_v21 = vpop.f32.mrb[4].mxu1 }
 0x321   :  { %v4699_v22 = vpop.f32.mrb[5].mxu1  ;;  %v7173_v9 = vadd.f32 %v4697_v21, %v8942_v55 }
 0x322   :  { %v4701_v23 = vpop.f32.mrb[6].mxu1  ;;  %v7175_v11 = vadd.f32 %v4699_v22, %v8944_v56 }
 0x323   :  { %v4703_v24 = vpop.f32.mrb[7].mxu1  ;;  %v7177_v14 = vadd.f32 %v4701_v23, %v8942_v55  ;;  %v8477_v23 = vld [vmem:[%s9128_s5 + $0x10] sm:$0xff]  }
 0x324   :  { %v7179_v18 = vadd.f32 %v4703_v24, %v8944_v56 }
 0x328   :  { %v8891_v25 = vpop.f32.mrb[8].mxu1 }
 0x329   :  { %v8893_v26 = vpop.f32.mrb[9].mxu1  ;;  %v7181_v24 = vadd.f32 %v8891_v25, %v8942_v55 }
 0x32a   :  { %v8895_v27 = vpop.f32.mrb[10].mxu1 }
 0x32b   :  { %v8897_v28 = vpop.f32.mrb[11].mxu1 }
 0x32c   :  { %v7187_v25 = vadd.f32 %v8897_v28, %v8944_v56 }
 0x330   :  { %v8899_v29 = vpop.f32.mrb[12].mxu1 }
 0x331   :  { %v8901_v30 = vpop.f32.mrb[13].mxu1  ;;  %v7189_v28 = vadd.f32 %v8899_v29, %v8942_v55 }
 0x332   :  { %v8903_v31 = vpop.f32.mrb[14].mxu1 }
 0x333   :  { %v8905_v32 = vpop.f32.mrb[15].mxu1 }
 0x334   :  { %v7195_v29 = vadd.f32 %v8905_v32, %v8944_v56 }
 0x338   :  { %v8907_v33 = vpop.f32.mrb[16].mxu1 }
 0x339   :  { %v8909_v34 = vpop.f32.mrb[17].mxu1 }
 0x33a   :  { %v8911_v35 = vpop.f32.mrb[18].mxu1  ;;  %v7199_v32 = vadd.f32 %v8909_v34, %v8944_v56 }
 0x33b   :  { %v8913_v36 = vpop.f32.mrb[19].mxu1 }
 0x340   :  { %v8915_v37 = vpop.f32.mrb[20].mxu1 }
 0x341   :  { %v8917_v38 = vpop.f32.mrb[21].mxu1 }
 0x342   :  { %v8919_v39 = vpop.f32.mrb[22].mxu1 }
 0x343   :  { %v8921_v40 = vpop.f32.mrb[23].mxu1 }
 0x348   :  { %v8923_v41 = vpop.f32.mrb[24].mxu1 }
 0x349   :  { %v8925_v42 = vpop.f32.mrb[25].mxu1 }
 0x34a   :  { %v8927_v43 = vpop.f32.mrb[26].mxu1 }
 0x34b   :  { %v8929_v44 = vpop.f32.mrb[27].mxu1 }
 0x350   :  { %v8931_v45 = vpop.f32.mrb[28].mxu1 }
 0x351   :  { %v8933_v46 = vpop.f32.mrb[29].mxu1 }
 0x352   :  { %v8935_v47 = vpop.f32.mrb[30].mxu1 }
 0x353   :  { %v8937_v48 = vpop.f32.mrb[31].mxu1 }
 0x399   :  { %v5704_v59 = vpop.f32.mrb[0].mxu0 }
 0x39a   :  { %v7166_v61 = vadd.f32 %v7165_v57, %v5704_v59  ;;  %v5706_v62 = vpop.f32.mrb[1].mxu0 }
 0x39b   :  { %v7168_v0 = vadd.f32 %v7167_v58, %v5706_v62  ;;  %v5708_v1 = vpop.f32.mrb[2].mxu0  ;;  %v7183_v58 = vadd.f32 %v8893_v26, %v8944_v56 }
 0x39c   :  { %v7170_v2 = vadd.f32 %v7169_v60, %v5708_v1  ;;  %v5710_v3 = vpop.f32.mrb[3].mxu0  ;;  %v5783_v5 = vmax.f32 %v7166_v61, 0.0 }
 0x39d   :  { %v7172_v4 = vadd.f32 %v7171_v63, %v5710_v3  ;;  %v5784_v7 = vmax.f32 %v7168_v0, 0.0  ;;  %v8478_v63 = vld [vmem:[%s9128_s5 + $0x18] sm:$0xff]  }
 0x39e   :  { %v5785_v6 = vmax.f32 %v7170_v2, 0.0 }
 0x39f   :  { %v5786_v8 = vmax.f32 %v7172_v4, 0.0 }
 0x3a0   :  { %v5815_v10 = vpack.c.bf16 %v5785_v6, %v5783_v5  ;;  %v8479_v5 = vld [vmem:[%s9128_s5 + $0x20] sm:$0xff]  }
 0x3a1   :  { %v5816_v12 = vpack.c.bf16 %v5786_v8, %v5784_v7  ;;  %v5714_v13 = vpop.f32.mrb[4].mxu0 }
 0x3a2   :  { %v7174_v15 = vadd.f32 %v7173_v9, %v5714_v13  ;;  %v5716_v16 = vpop.f32.mrb[5].mxu0  ;;  %v7191_v9 = vadd.f32 %v8901_v30, %v8944_v56 }
 0x3a3   :  { %v7176_v19 = vadd.f32 %v7175_v11, %v5716_v16  ;;  %v5718_v20 = vpop.f32.mrb[6].mxu0  ;;  %5998 = vmatprep.mubr.bf16.mxu1 %v5816_v12  ;;  %v7193_v12 = vadd.f32 %v8903_v31, %v8942_v55 }
 0x3a4   :  { %v7178_v50 = vadd.f32 %v7177_v14, %v5718_v20  ;;  %v5720_v21 = vpop.f32.mrb[7].mxu0  ;;  %5999 = vmatmul.mubr.bf16.vlgmr.msra.gmra.mrb[32].mxu1 %v5815_v10  ;;  %v5787_v22 = vmax.f32 %v7174_v15, 0.0  ;;  %v8480_v15 = vld [vmem:[%s9128_s5 + $0x28] sm:$0xff]  }
 0x3a5   :  { %v7180_v51 = vadd.f32 %v7179_v18, %v5720_v21  ;;  %7134 = vmatpush3.bf16.msra.mxu1 %v8475_v49  ;;  %v5788_v53 = vmax.f32 %v7176_v19, 0.0  ;;  %v7185_v49 = vadd.f32 %v8895_v27, %v8942_v55 }
 0x3a6   :  { %v5789_v52 = vmax.f32 %v7178_v50, 0.0  ;;  %7135 = vmatprep.subr.bf16.mxu1 %v8476_v17 }
 0x3a7   :  { %v5790_v54 = vmax.f32 %v7180_v51, 0.0  ;;  %v7197_v51 = vadd.f32 %v8907_v33, %v8942_v55 }
 0x3a8   :  { %v5817_v57 = vpack.c.bf16 %v5789_v52, %v5787_v22 }
 0x3a9   :  { %v5818_v59 = vpack.c.bf16 %v5790_v54, %v5788_v53  ;;  %v5724_v60 = vpop.f32.mrb[8].mxu0  ;;  %7136 = vmatpush3.bf16.msra.mxu1 %v8476_v17  ;;  %v7201_v53 = vadd.f32 %v8911_v35, %v8942_v55 }
 0x3aa   :  { %v7182_v61 = vadd.f32 %v7181_v24, %v5724_v60  ;;  %v5726_v62 = vpop.f32.mrb[9].mxu0  ;;  %7137 = vmatprep.subr.bf16.mxu1 %v8477_v23 }
 0x3ab   :  { %v7184_v0 = vadd.f32 %v7183_v58, %v5726_v62  ;;  %v5728_v1 = vpop.f32.mrb[10].mxu0  ;;  %6006 = vmatprep.mubr.bf16.mxu1 %v5818_v59 }
 0x3ac   :  { %v7186_v26 = vadd.f32 %v7185_v49, %v5728_v1  ;;  %v5730_v2 = vpop.f32.mrb[11].mxu0  ;;  %6007 = vmatmul.mubr.bf16.gmra.mrb[36].mxu1 %v5817_v57  ;;  %v5791_v4 = vmax.f32 %v7182_v61, 0.0  ;;  %v7203_v57 = vadd.f32 %v8913_v36, %v8944_v56 }
 0x3ad   :  { %v7188_v3 = vadd.f32 %v7187_v25, %v5730_v2  ;;  %7138 = vmatpush3.bf16.msra.mxu1 %v8477_v23  ;;  %v5792_v6 = vmax.f32 %v7184_v0, 0.0  ;;  %v7205_v25 = vadd.f32 %v8915_v37, %v8942_v55  ;;  %v7207_v0 = vadd.f32 %v8917_v38, %v8944_v56 }
 0x3ae   :  { %v5793_v27 = vmax.f32 %v7186_v26, 0.0  ;;  %7139 = vmatprep.subr.bf16.mxu1 %v8478_v63  ;;  %v7209_v26 = vadd.f32 %v8919_v39, %v8942_v55 }
 0x3af   :  { %v5794_v7 = vmax.f32 %v7188_v3, 0.0 }
 0x3b0   :  { %v5819_v8 = vpack.c.bf16 %v5793_v27, %v5791_v4  ;;  %v7211_v4 = vadd.f32 %v8921_v40, %v8944_v56 }
 0x3b1   :  { %v5820_v10 = vpack.c.bf16 %v5794_v7, %v5792_v6  ;;  %v5734_v11 = vpop.f32.mrb[12].mxu0  ;;  %7140 = vmatpush3.bf16.msra.mxu1 %v8478_v63 }
 0x3b2   :  { %v7190_v13 = vadd.f32 %v7189_v28, %v5734_v11  ;;  %v5736_v14 = vpop.f32.mrb[13].mxu0  ;;  %7141 = vmatprep.subr.bf16.mxu1 %v8479_v5  ;;  %v7215_v11 = vadd.f32 %v8925_v42, %v8944_v56 }
 0x3b3   :  { %v7192_v16 = vadd.f32 %v7191_v9, %v5736_v14  ;;  %v5738_v17 = vpop.f32.mrb[14].mxu0  ;;  %6014 = vmatprep.mubr.bf16.mxu1 %v5820_v10  ;;  %v7213_v10 = vadd.f32 %v8923_v41, %v8942_v55 }
 0x3b4   :  { %v7194_v30 = vadd.f32 %v7193_v12, %v5738_v17  ;;  %v5740_v18 = vpop.f32.mrb[15].mxu0  ;;  %6015 = vmatmul.mubr.bf16.gmra.mrb[40].mxu1 %v5819_v8  ;;  %v5795_v20 = vmax.f32 %v7190_v13, 0.0  ;;  %v7217_v13 = vadd.f32 %v8927_v43, %v8942_v55 }
 0x3b5   :  { %v7196_v19 = vadd.f32 %v7195_v29, %v5740_v18  ;;  %7142 = vmatpush3.bf16.msra.mxu1 %v8479_v5  ;;  %v5796_v50 = vmax.f32 %v7192_v16, 0.0  ;;  %v7219_v29 = vadd.f32 %v8929_v44, %v8944_v56 }
 0x3b6   :  { %v5797_v31 = vmax.f32 %v7194_v30, 0.0  ;;  %7143 = vmatprep.subr.bf16.mxu1 %v8480_v15 }
 0x3b7   :  { %v5798_v21 = vmax.f32 %v7196_v19, 0.0 }
 0x3b8   :  { %v5821_v22 = vpack.c.bf16 %v5797_v31, %v5795_v20 }
 0x3b9   :  { %v5822_v52 = vpack.c.bf16 %v5798_v21, %v5796_v50  ;;  %v5744_v23 = vpop.f32.mrb[16].mxu0  ;;  %7144 = vmatpush3.bf16.msra.mxu1 %v8480_v15  ;;  %v7221_v50 = vadd.f32 %v8931_v45, %v8942_v55  ;;  %v7223_v21 = vadd.f32 %v8933_v46, %v8944_v56 }
 0x3ba   :  { %v7198_v54 = vadd.f32 %v7197_v51, %v5744_v23  ;;  %v5746_v24 = vpop.f32.mrb[17].mxu0  ;;  %v7227_v23 = vadd.f32 %v8937_v48, %v8944_v56  ;;  %v8482_v48 = vld [vmem:[%s9128_s5 + $0x38] sm:$0xff]   ;;  %v9023_v56 = vld [vmem:[#allocation11] ss:$0 sm:$0xff] }
 0x3bb   :  { %v7200_v58 = vadd.f32 %v7199_v32, %v5746_v24  ;;  %v5748_v59 = vpop.f32.mrb[18].mxu0  ;;  %6022 = vmatprep.mubr.bf16.mxu1 %v5822_v52 }
 0x3bc   :  { %v7202_v60 = vadd.f32 %v7201_v53, %v5748_v59  ;;  %v5750_v33 = vpop.f32.mrb[19].mxu0  ;;  %6023 = vmatmul.mubr.bf16.gmra.mrb[44].mxu1 %v5821_v22  ;;  %v5799_v61 = vmax.f32 %v7198_v54, 0.0  ;;  %v7225_v22 = vadd.f32 %v8935_v47, %v8942_v55  ;;  %v8481_v47 = vld [vmem:[%s9128_s5 + $0x30] sm:$0xff]   ;;  %s8746_s5 = smov [#allocation15]  }
 0x3bd   :  { %v7204_v49 = vadd.f32 %v7203_v57, %v5750_v33  ;;  %v5800_v62 = vmax.f32 %v7200_v58, 0.0  ;;  %7145 = vmatprep.subr.bf16.mxu1 %v8481_v47  ;;  %s6501_s16 = sshll.u32 %s8746_s5, 4  ;;  %s6502_s16 = int_to_ptr.vmem [resolvable:$true] %s6501_s16 }
 0x3be   :  { %v5801_v34 = vmax.f32 %v7202_v60, 0.0  ;;  %7146 = vmatpush3.bf16.msra.mxu1 %v8481_v47  ;;  %s8701_s17 = scalar_lea.vmem %s6502_s16, 16  ;;  %s8705_s18 = scalar_lea.vmem %s6502_s16, 32 }
 0x3bf   :  { %v5802_v63 = vmax.f32 %v7204_v49, 0.0  ;;  %7147 = vmatprep.subr.bf16.mxu1 %v8482_v48  ;;  %p8702_p0 = scmp.ne.s32.totalorder %s6502_s16, %s8701_s17  ;;  %p8706_p1 = scmp.lt.s32.totalorder %s6502_s16, %s6502_s16 }
 0x3c0   :  { %v5823_v35 = vpack.c.bf16 %v5801_v34, %v5799_v61  ;;  %p8707_p2 = scmp.lt.s32.totalorder %s8705_s18, %s8701_s17 }
 0x3c1   :  { %v5824_v1 = vpack.c.bf16 %v5802_v63, %v5800_v62  ;;  %v5754_v36 = vpop.f32.mrb[20].mxu0 }
 0x3c2   :  { %v7206_v2 = vadd.f32 %v7205_v25, %v5754_v36  ;;  %v5756_v3 = vpop.f32.mrb[21].mxu0  ;;  %7148 = vmatpush3.bf16.msra.mxu1 %v8482_v48  ;;  %p8708_p3 = por %p8707_p2, %p8706_p1 }
 0x3c3   :  { %v7208_v27 = vadd.f32 %v7207_v0, %v5756_v3  ;;  %v5758_v5 = vpop.f32.mrb[22].mxu0  ;;  %6030 = vmatprep.mubr.bf16.mxu1 %v5824_v1 }
 0x3c4   :  { %v7210_v6 = vadd.f32 %v7209_v26, %v5758_v5  ;;  %v5760_v7 = vpop.f32.mrb[23].mxu0  ;;  %6031 = vmatmul.mubr.bf16.gmra.mrb[48].mxu1 %v5823_v35  ;;  %v5803_v28 = vmax.f32 %v7206_v2, 0.0  ;;  %p8709_p4 = pnand %p8708_p3, %p8702_p0 }
 0x3c5   :  { %v7212_v37 = vadd.f32 %v7211_v4, %v5760_v7  ;;  %v5804_v38 = vmax.f32 %v7208_v27, 0.0 }
 0x3c6   :  { %v5805_v8 = vmax.f32 %v7210_v6, 0.0 }
 0x3c7   :  { %v5806_v9 = vmax.f32 %v7212_v37, 0.0 }
 0x3c8   :  { %v5825_v39 = vpack.c.bf16 %v5805_v8, %v5803_v28 }
 0x3c9   :  { %v5826_v12 = vpack.c.bf16 %v5806_v9, %v5804_v38  ;;  %v5764_v40 = vpop.f32.mrb[24].mxu0 }
 0x3ca   :  { %v7214_v14 = vadd.f32 %v7213_v10, %v5764_v40  ;;  %v5766_v15 = vpop.f32.mrb[25].mxu0 }
 0x3cb   :  { %v7216_v16 = vadd.f32 %v7215_v11, %v5766_v15  ;;  %v5768_v17 = vpop.f32.mrb[26].mxu0  ;;  %6038 = vmatprep.mubr.bf16.mxu1 %v5826_v12 }
 0x3cc   :  { %v7218_v30 = vadd.f32 %v7217_v13, %v5768_v17  ;;  %v5770_v18 = vpop.f32.mrb[27].mxu0  ;;  %6039 = vmatmul.mubr.bf16.gmra.mrb[52].mxu1 %v5825_v39  ;;  %v5807_v19 = vmax.f32 %v7214_v14, 0.0 }
 0x3cd   :  { %v7220_v41 = vadd.f32 %v7219_v29, %v5770_v18  ;;  %v5808_v42 = vmax.f32 %v7216_v16, 0.0 }
 0x3ce   :  { %v5809_v20 = vmax.f32 %v7218_v30, 0.0 }
 0x3cf   :  { %v5810_v31 = vmax.f32 %v7220_v41, 0.0 }
 0x3d0   :  { %v5827_v43 = vpack.c.bf16 %v5809_v20, %v5807_v19 }
 0x3d1   :  { %v5828_v51 = vpack.c.bf16 %v5810_v31, %v5808_v42  ;;  %v5774_v44 = vpop.f32.mrb[28].mxu0 }
 0x3d2   :  { %v7222_v32 = vadd.f32 %v7221_v50, %v5774_v44  ;;  %v5776_v52 = vpop.f32.mrb[29].mxu0 }
 0x3d3   :  { %v7224_v53 = vadd.f32 %v7223_v21, %v5776_v52  ;;  %v5778_v54 = vpop.f32.mrb[30].mxu0  ;;  %6046 = vmatprep.mubr.bf16.mxu1 %v5828_v51 }
 0x3d4   :  { %v7226_v24 = vadd.f32 %v7225_v22, %v5778_v54  ;;  %v5780_v57 = vpop.f32.mrb[31].mxu0  ;;  %6047 = vmatmul.mubr.bf16.gmra.mrb[56].mxu1 %v5827_v43  ;;  %v5811_v58 = vmax.f32 %v7222_v32, 0.0 }
 0x3d5   :  { %v7228_v45 = vadd.f32 %v7227_v23, %v5780_v57  ;;  %v5812_v46 = vmax.f32 %v7224_v53, 0.0 }
 0x3d6   :  { %v5813_v59 = vmax.f32 %v7226_v24, 0.0 }
 0x3d7   :  { %v5814_v60 = vmax.f32 %v7228_v45, 0.0 }
 0x3d8   :  { %v5829_v33 = vpack.c.bf16 %v5813_v59, %v5811_v58 }
 0x3d9   :  { %v5830_v49 = vpack.c.bf16 %v5814_v60, %v5812_v46 }
 0x3db   :  { %6054 = vmatprep.mubr.bf16.mxu1 %v5830_v49 }
 0x3dc   :  { %6055 = vmatmul.mubr.bf16.gmra.mrb[60].mxu1 %v5829_v33 }
 0x477   :  { %v7069_v55 = vpop.f32.mrb[32].mxu1 }
 0x478   :  { %v7070_v61 = vpop.f32.mrb[33].mxu1 }
 0x479   :  { %v7071_v34 = vadd.f32 %v7070_v61, %v7069_v55  ;;  %v7072_v62 = vpop.f32.mrb[34].mxu1 }
 0x47a   :  { %v7073_v63 = vpop.f32.mrb[35].mxu1 }
 0x47b   :  { %v6001_v25 = vadd.f32 %v7071_v34, %v9023_v56  ;;  %v7074_v35 = vadd.f32 %v7073_v63, %v7072_v62 }
 0x47d   :  { %v6004_v0 = vadd.f32 %v7074_v35, %v9023_v56  ;;  %v6063_v1 = vmax.f32 %v6001_v25, 0.0 }
 0x47f   :  { %v6064_v36 = vmax.f32 %v6004_v0, 0.0  ;;  %v7075_v26 = vpop.f32.mrb[36].mxu1 }
 0x480   :  { %v7076_v2 = vpop.f32.mrb[37].mxu1 }
 0x481   :  { %v7077_v3 = vadd.f32 %v7076_v2, %v7075_v26  ;;  %v7078_v4 = vpop.f32.mrb[38].mxu1  ;;  %v6079_v27 = vpack.c.bf16 %v6064_v36, %v6063_v1 }
 0x482   :  { %v7079_v5 = vpop.f32.mrb[39].mxu1 }
 0x483   :  { %v6009_v6 = vadd.f32 %v7077_v3, %v9023_v56  ;;  %v7080_v7 = vadd.f32 %v7079_v5, %v7078_v4  ;;  %7149 = vmatprep.mubr.bf16.mxu1 %v6079_v27 }
 0x485   :  { %v6012_v37 = vadd.f32 %v7080_v7, %v9023_v56  ;;  %v6065_v28 = vmax.f32 %v6009_v6, 0.0 }
 0x487   :  { %v6066_v8 = vmax.f32 %v6012_v37, 0.0  ;;  %v7081_v38 = vpop.f32.mrb[40].mxu1 }
 0x488   :  { %v7082_v9 = vpop.f32.mrb[41].mxu1 }
 0x489   :  { %v6080_v10 = vpack.c.bf16 %v6066_v8, %v6065_v28  ;;  %v7083_v39 = vadd.f32 %v7082_v9, %v7081_v38  ;;  %v7084_v11 = vpop.f32.mrb[42].mxu1 }
 0x48a   :  { %v7085_v12 = vpop.f32.mrb[43].mxu1 }
 0x48b   :  { %v6017_v40 = vadd.f32 %v7083_v39, %v9023_v56  ;;  %v7086_v13 = vadd.f32 %v7085_v12, %v7084_v11  ;;  %7150 = vmatmul.mubr.bf16.vlgmr.msra.gmra.mrb[64].mxu1 %v6080_v10  ;;  %v9041_v11 = vld [vmem:[#allocation12] ss:$0 sm:$0xff] }
 0x48d   :  { %v6020_v14 = vadd.f32 %v7086_v13, %v9023_v56  ;;  %v6067_v15 = vmax.f32 %v6017_v40, 0.0 }
 0x48f   :  { %v6068_v29 = vmax.f32 %v6020_v14, 0.0  ;;  %v7087_v16 = vpop.f32.mrb[44].mxu1 }
 0x490   :  { %v7088_v17 = vpop.f32.mrb[45].mxu1 }
 0x491   :  { %v7089_v30 = vadd.f32 %v7088_v17, %v7087_v16  ;;  %v7090_v18 = vpop.f32.mrb[46].mxu1  ;;  %v6081_v41 = vpack.c.bf16 %v6068_v29, %v6067_v15  ;;  %v9045_v29 = vld [vmem:[#allocation14] ss:$0 sm:$0xff] }
 0x492   :  { %v7091_v19 = vpop.f32.mrb[47].mxu1 }
 0x493   :  { %v6025_v20 = vadd.f32 %v7089_v30, %v9023_v56  ;;  %v7092_v42 = vadd.f32 %v7091_v19, %v7090_v18  ;;  %7153 = vmatprep.mubr.bf16.mxu1 %v6081_v41 }
 0x495   :  { %v6028_v31 = vadd.f32 %v7092_v42, %v9023_v56  ;;  %v6069_v50 = vmax.f32 %v6025_v20, 0.0 }
 0x497   :  { %v6070_v43 = vmax.f32 %v6028_v31, 0.0  ;;  %v7093_v21 = vpop.f32.mrb[48].mxu1 }
 0x498   :  { %v7094_v51 = vpop.f32.mrb[49].mxu1 }
 0x499   :  { %v7095_v44 = vadd.f32 %v7094_v51, %v7093_v21  ;;  %v7096_v22 = vpop.f32.mrb[50].mxu1  ;;  %v6082_v32 = vpack.c.bf16 %v6070_v43, %v6069_v50 }
 0x49a   :  { %v7097_v52 = vpop.f32.mrb[51].mxu1 }
 0x49b   :  { %v6033_v23 = vadd.f32 %v7095_v44, %v9023_v56  ;;  %v7098_v53 = vadd.f32 %v7097_v52, %v7096_v22  ;;  %7154 = vmatmul.mubr.bf16.gmra.mrb[68].mxu1 %v6082_v32 }
 0x49d   :  { %v6036_v54 = vadd.f32 %v7098_v53, %v9023_v56  ;;  %v6071_v24 = vmax.f32 %v6033_v23, 0.0 }
 0x49f   :  { %v6072_v57 = vmax.f32 %v6036_v54, 0.0  ;;  %v7099_v45 = vpop.f32.mrb[52].mxu1 }
 0x4a0   :  { %v7100_v58 = vpop.f32.mrb[53].mxu1 }
 0x4a1   :  { %v7101_v59 = vadd.f32 %v7100_v58, %v7099_v45  ;;  %v7102_v46 = vpop.f32.mrb[54].mxu1  ;;  %v6083_v60 = vpack.c.bf16 %v6072_v57, %v6071_v24 }
 0x4a2   :  { %v7103_v33 = vpop.f32.mrb[55].mxu1 }
 0x4a3   :  { %v6041_v49 = vadd.f32 %v7101_v59, %v9023_v56  ;;  %v7104_v47 = vadd.f32 %v7103_v33, %v7102_v46  ;;  %7157 = vmatprep.mubr.bf16.mxu1 %v6083_v60 }
 0x4a5   :  { %v6044_v48 = vadd.f32 %v7104_v47, %v9023_v56  ;;  %v6073_v55 = vmax.f32 %v6041_v49, 0.0 }
 0x4a7   :  { %v6074_v61 = vmax.f32 %v6044_v48, 0.0  ;;  %v7105_v34 = vpop.f32.mrb[56].mxu1 }
 0x4a8   :  { %v7106_v62 = vpop.f32.mrb[57].mxu1 }
 0x4a9   :  { %v7107_v63 = vadd.f32 %v7106_v62, %v7105_v34  ;;  %v7108_v25 = vpop.f32.mrb[58].mxu1  ;;  %v6084_v35 = vpack.c.bf16 %v6074_v61, %v6073_v55 }
 0x4aa   :  { %v7109_v0 = vpop.f32.mrb[59].mxu1 }
 0x4ab   :  { %v6049_v1 = vadd.f32 %v7107_v63, %v9023_v56  ;;  %v7110_v36 = vadd.f32 %v7109_v0, %v7108_v25  ;;  %7158 = vmatmul.mubr.bf16.gmra.mrb[72].mxu1 %v6084_v35 }
 0x4ad   :  { %v6052_v26 = vadd.f32 %v7110_v36, %v9023_v56  ;;  %v6075_v2 = vmax.f32 %v6049_v1, 0.0 }
 0x4af   :  { %v6076_v3 = vmax.f32 %v6052_v26, 0.0  ;;  %v7111_v4 = vpop.f32.mrb[60].mxu1 }
 0x4b0   :  { %v7112_v27 = vpop.f32.mrb[61].mxu1 }
 0x4b1   :  { %v7113_v5 = vadd.f32 %v7112_v27, %v7111_v4  ;;  %v7114_v6 = vpop.f32.mrb[62].mxu1  ;;  %v6085_v7 = vpack.c.bf16 %v6076_v3, %v6075_v2 }
 0x4b2   :  { %v7115_v37 = vpop.f32.mrb[63].mxu1 }
 0x4b3   :  { %v6057_v28 = vadd.f32 %v7113_v5, %v9023_v56  ;;  %v7116_v8 = vadd.f32 %v7115_v37, %v7114_v6  ;;  %7161 = vmatprep.mubr.bf16.mxu1 %v6085_v7 }
 0x4b5   :  { %v6060_v38 = vadd.f32 %v7116_v8, %v9023_v56  ;;  %v6077_v9 = vmax.f32 %v6057_v28, 0.0 }
 0x4b7   :  { %v6078_v10 = vmax.f32 %v6060_v38, 0.0 }
 0x4b9   :  { %v6086_v39 = vpack.c.bf16 %v6078_v10, %v6077_v9 }
 0x4bb   :  { %7162 = vmatmul.mubr.bf16.gmra.mrb[76].mxu1 %v6086_v39 }
 0x55e   :  { %v7151_v12 = vpop.f32.mrb[64].mxu1 }
 0x55f   :  { %v6201_v40 = vadd.f32 %v7151_v12, %v9041_v11  ;;  %v6192_v13 = vpop.f32.mrb[65].mxu1 }
 0x560   :  { %v6193_v14 = vadd.f32 %v9041_v11, %v6192_v13  ;;  %v7152_v15 = vpop.f32.mrb[66].mxu1 }
 0x561   :  { %v6257_v16 = vmax.f32 %v6201_v40, 0.0  ;;  %v6204_v17 = vadd.f32 %v7152_v15, %v9041_v11  ;;  %v6195_v30 = vpop.f32.mrb[67].mxu1 }
 0x562   :  { %v6255_v56 = vmax.f32 %v6193_v14, 0.0  ;;  %v6196_v18 = vadd.f32 %v9041_v11, %v6195_v30 }
 0x563   :  { %v6258_v41 = vmax.f32 %v6204_v17, 0.0  ;;  %v6280_v19 = vmul.f32 %v9045_v29, %v6257_v16 }
 0x564   :  { %v6256_v20 = vmax.f32 %v6196_v18, 0.0  ;;  %v6278_v42 = vmul.f32 %v9045_v29, %v6255_v56 }
 0x565   :  { %v6301_v31 = vsel %vm6294_vm0, %v6280_v19, 0.0  ;;  %v6281_v50 = vmul.f32 %v9045_v29, %v6258_v41 }
 0x566   :  { %6302 = vadd.xlane.f32.xlu1 %v6301_v31  ;;  %v6295_v43 = vsel %vm6294_vm0, %v6278_v42, 0.0  ;;  %v6279_v21 = vmul.f32 %v9045_v29, %v6256_v20 }
 0x567   :  { %6296 = vadd.xlane.f32.xlu0 %v6295_v43  ;;  %v6304_v51 = vsel %vm6294_vm0, %v6281_v50, 0.0 }
 0x568   :  { %v6298_v44 = vsel %vm6294_vm0, %v6279_v21, 0.0  ;;  %v9093_v21 = vld [vmem:[#allocation2] ss:$0 sm:$0xff] }
 0x56a   :  { %6305 = vadd.xlane.f32.xlu1 %v6304_v51 }
 0x56b   :  { %6299 = vadd.xlane.f32.xlu0 %v6298_v44 }
 0x56e   :  { %v7155_v22 = vpop.f32.mrb[68].mxu1 }
 0x56f   :  { %v6217_v32 = vadd.f32 %v7155_v22, %v9041_v11  ;;  %v6208_v52 = vpop.f32.mrb[69].mxu1 }
 0x570   :  { %v6209_v23 = vadd.f32 %v9041_v11, %v6208_v52  ;;  %v7156_v53 = vpop.f32.mrb[70].mxu1 }
 0x571   :  { %v6220_v54 = vadd.f32 %v7156_v53, %v9041_v11  ;;  %v6211_v24 = vpop.f32.mrb[71].mxu1  ;;  %v6261_v57 = vmax.f32 %v6217_v32, 0.0 }
 0x572   :  { %v6259_v45 = vmax.f32 %v6209_v23, 0.0  ;;  %v6212_v58 = vadd.f32 %v9041_v11, %v6211_v24 }
 0x573   :  { %v6262_v59 = vmax.f32 %v6220_v54, 0.0  ;;  %v6284_v47 = vmul.f32 %v9045_v29, %v6261_v57 }
 0x574   :  { %v6260_v46 = vmax.f32 %v6212_v58, 0.0  ;;  %v6282_v60 = vmul.f32 %v9045_v29, %v6259_v45 }
 0x575   :  { %v6285_v55 = vmul.f32 %v9045_v29, %v6262_v59  ;;  %v6313_v61 = vsel %vm6294_vm0, %v6284_v47, 0.0 }
 0x576   :  { %v6307_v33 = vsel %vm6294_vm0, %v6282_v60, 0.0  ;;  %v6283_v49 = vmul.f32 %v9045_v29, %v6260_v46 }
 0x577   :  { %6308 = vadd.xlane.f32.xlu0 %v6307_v33  ;;  %v6316_v34 = vsel %vm6294_vm0, %v6285_v55, 0.0 }
 0x578   :  { %v6310_v48 = vsel %vm6294_vm0, %v6283_v49, 0.0 }
 0x579   :  { %6311 = vadd.xlane.f32.xlu1 %v6310_v48 }
 0x57b   :  { %6314 = vadd.xlane.f32.xlu0 %v6313_v61 }
 0x57d   :  { %6317 = vadd.xlane.f32.xlu1 %v6316_v34 }
 0x57e   :  { %v7159_v62 = vpop.f32.mrb[72].mxu1 }
 0x57f   :  { %v6233_v63 = vadd.f32 %v7159_v62, %v9041_v11  ;;  %v6224_v25 = vpop.f32.mrb[73].mxu1 }
 0x580   :  { %v6225_v35 = vadd.f32 %v9041_v11, %v6224_v25  ;;  %v7160_v0 = vpop.f32.mrb[74].mxu1 }
 0x581   :  { %v6236_v1 = vadd.f32 %v7160_v0, %v9041_v11  ;;  %v6227_v36 = vpop.f32.mrb[75].mxu1  ;;  %v6265_v26 = vmax.f32 %v6233_v63, 0.0 }
 0x582   :  { %v6263_v2 = vmax.f32 %v6225_v35, 0.0  ;;  %v6228_v3 = vadd.f32 %v9041_v11, %v6227_v36 }
 0x583   :  { %v6266_v4 = vmax.f32 %v6236_v1, 0.0  ;;  %v6288_v37 = vmul.f32 %v9045_v29, %v6265_v26 }
 0x584   :  { %v6264_v27 = vmax.f32 %v6228_v3, 0.0  ;;  %v6286_v5 = vmul.f32 %v9045_v29, %v6263_v2 }
 0x585   :  { %v6289_v8 = vmul.f32 %v9045_v29, %v6266_v4  ;;  %v6325_v38 = vsel %vm6294_vm0, %v6288_v37, 0.0 }
 0x586   :  { %v6319_v6 = vsel %vm6294_vm0, %v6286_v5, 0.0  ;;  %v6287_v7 = vmul.f32 %v9045_v29, %v6264_v27 }
 0x587   :  { %6320 = vadd.xlane.f32.xlu0 %v6319_v6  ;;  %v6328_v9 = vsel %vm6294_vm0, %v6289_v8, 0.0 }
 0x588   :  { %v6322_v28 = vsel %vm6294_vm0, %v6287_v7, 0.0 }
 0x589   :  { %6323 = vadd.xlane.f32.xlu1 %v6322_v28 }
 0x58b   :  { %6326 = vadd.xlane.f32.xlu0 %v6325_v38 }
 0x58d   :  { %6329 = vadd.xlane.f32.xlu1 %v6328_v9 }
 0x58e   :  { %v7163_v10 = vpop.f32.mrb[76].mxu1 }
 0x58f   :  { %v6249_v39 = vadd.f32 %v7163_v10, %v9041_v11  ;;  %v6240_v12 = vpop.f32.mrb[77].mxu1 }
 0x590   :  { %v6241_v40 = vadd.f32 %v9041_v11, %v6240_v12  ;;  %v7164_v13 = vpop.f32.mrb[78].mxu1 }
 0x591   :  { %v6252_v14 = vadd.f32 %v7164_v13, %v9041_v11  ;;  %v6243_v15 = vpop.f32.mrb[79].mxu1  ;;  %v6269_v16 = vmax.f32 %v6249_v39, 0.0 }
 0x592   :  { %v6267_v17 = vmax.f32 %v6241_v40, 0.0  ;;  %v6244_v30 = vadd.f32 %v9041_v11, %v6243_v15 }
 0x593   :  { %v6270_v56 = vmax.f32 %v6252_v14, 0.0  ;;  %v6292_v42 = vmul.f32 %v9045_v29, %v6269_v16 }
 0x594   :  { %v6268_v18 = vmax.f32 %v6244_v30, 0.0  ;;  %v6290_v41 = vmul.f32 %v9045_v29, %v6267_v17 }
 0x595   :  { %v6293_v50 = vmul.f32 %v9045_v29, %v6270_v56  ;;  %v6337_v43 = vsel %vm6294_vm0, %v6292_v42, 0.0 }
 0x596   :  { %v6331_v19 = vsel %vm6294_vm0, %v6290_v41, 0.0  ;;  %v6291_v20 = vmul.f32 %v9045_v29, %v6268_v18 }
 0x597   :  { %6332 = vadd.xlane.f32.xlu0 %v6331_v19  ;;  %v6340_v11 = vsel %vm6294_vm0, %v6293_v50, 0.0 }
 0x598   :  { %v6334_v31 = vsel %vm6294_vm0, %v6291_v20, 0.0 }
 0x599   :  { %6335 = vadd.xlane.f32.xlu1 %v6334_v31 }
 0x59b   :  { %6338 = vadd.xlane.f32.xlu0 %v6337_v43 }
 0x59d   :  { %6341 = vadd.xlane.f32.xlu1 %v6340_v11 }
 0x5f3   :  { %v6303_v51 = vpop.xlane.xlu1 %6302 }
 0x5f4   :  { %v6352_v44 = vadd.f32 %v9093_v21, %v6303_v51  ;;  %v6297_v22 = vpop.xlane.xlu0 %6296 }
 0x5f5   :  { %v6350_v32 = vadd.f32 %v9093_v21, %v6297_v22 }
 0x5f6   :  { %v6368_v52 = vsub.f32 0.0, %v6352_v44 }
 0x5f7   :  { %v6366_v23 = vsub.f32 0.0, %v6350_v32  ;;  %v6306_v53 = vpop.xlane.xlu1 %6305 }
 0x5f8   :  { %v6353_v29 = vadd.f32 %v9093_v21, %v6306_v53  ;;  %v6300_v54 = vpop.xlane.xlu0 %6299  ;;  %v6386_v45 = vmul.f32 1.442695, %v6368_v52 }
 0x5f9   :  { %v6382_v24 = vmul.f32 1.442695, %v6366_v23  ;;  %v6351_v57 = vadd.f32 %v9093_v21, %v6300_v54 }
 0x5fa   :  { %v6369_v58 = vsub.f32 0.0, %v6353_v29 }
 0x5fb   :  { %8483 = vpow2.f32 %v6382_v24  ;;  %v6367_v59 = vsub.f32 0.0, %v6351_v57 }
 0x5fc   :  { %8485 = vpow2.f32 %v6386_v45  ;;  %v6388_v60 = vmul.f32 1.442695, %v6369_v58 }
 0x5fd   :  { %v6384_v46 = vmul.f32 1.442695, %v6367_v59 }
 0x5ff   :  { %8487 = vpow2.f32 %v6384_v46 }
 0x600   :  { %8489 = vpow2.f32 %v6388_v60 }
 0x604   :  { %v6309_v33 = vpop.xlane.xlu0 %6308 }
 0x605   :  { %v8484_v49 = vpop.eup %8483  ;;  %v6354_v47 = vadd.f32 %v9093_v21, %v6309_v33 }
 0x606   :  { %v6414_v48 = vadd.f32 1.0, %v8484_v49  ;;  %v6312_v55 = vpop.xlane.xlu1 %6311  ;;  %v8486_v62 = vpop.eup %8485 }
 0x607   :  { %v6370_v61 = vsub.f32 0.0, %v6354_v47  ;;  %v6355_v34 = vadd.f32 %v9093_v21, %v6312_v55  ;;  %v6416_v27 = vadd.f32 1.0, %v8486_v62 }
 0x608   :  { %8491 = vrcp.f32 %v6414_v48  ;;  %v6315_v63 = vpop.xlane.xlu0 %6314 }
 0x609   :  { %v8488_v25 = vpop.eup %8487  ;;  %v6390_v35 = vmul.f32 1.442695, %v6370_v61  ;;  %v6371_v0 = vsub.f32 0.0, %v6355_v34  ;;  %v6356_v1 = vadd.f32 %v9093_v21, %v6315_v63 }
 0x60a   :  { %v6415_v36 = vadd.f32 1.0, %v8488_v25  ;;  %v6318_v26 = vpop.xlane.xlu1 %6317  ;;  %v8490_v5 = vpop.eup %8489 }
 0x60b   :  { %v6392_v2 = vmul.f32 1.442695, %v6371_v0  ;;  %v6372_v3 = vsub.f32 0.0, %v6356_v1  ;;  %v6357_v4 = vadd.f32 %v9093_v21, %v6318_v26  ;;  %v6417_v37 = vadd.f32 1.0, %v8490_v5 }
 0x60c   :  { %8493 = vrcp.f32 %v6415_v36 }
 0x60d   :  { %8495 = vpow2.f32 %v6390_v35  ;;  %v6394_v6 = vmul.f32 1.442695, %v6372_v3  ;;  %v6373_v7 = vsub.f32 0.0, %v6357_v4 }
 0x60e   :  { %8497 = vpow2.f32 %v6392_v2 }
 0x60f   :  { %8499 = vrcp.f32 %v6416_v27  ;;  %v6396_v28 = vmul.f32 1.442695, %v6373_v7 }
 0x610   :  { %8501 = vpow2.f32 %v6394_v6 }
 0x611   :  { %8503 = vrcp.f32 %v6417_v37 }
 0x612   :  { %v8492_v8 = vpop.eup %8491  ;;  %8505 = vpow2.f32 %v6396_v28 }
 0x613   :  { %6462 = vxpose.xlu0.b32.start [1/16] (narrow) %v8492_v8, 8 }
 0x614   :  { %v6321_v38 = vpop.xlane.xlu0 %6320 }
 0x615   :  { %v6358_v9 = vadd.f32 %v9093_v21, %v6321_v38 }
 0x616   :  { %v8494_v10 = vpop.eup %8493  ;;  %v6324_v39 = vpop.xlane.xlu1 %6323 }
 0x617   :  { %v8496_v12 = vpop.eup %8495  ;;  %v6374_v40 = vsub.f32 0.0, %v6358_v9  ;;  %v6359_v13 = vadd.f32 %v9093_v21, %v6324_v39  ;;  %6463 = vxpose.xlu0.b32.cont [2/16] (narrow) %v8494_v10, 8 }
 0x618   :  { %v8498_v14 = vpop.eup %8497  ;;  %v6418_v15 = vadd.f32 1.0, %v8496_v12  ;;  %v6327_v16 = vpop.xlane.xlu0 %6326 }
 0x619   :  { %v6398_v17 = vmul.f32 1.442695, %v6374_v40  ;;  %v6375_v30 = vsub.f32 0.0, %v6359_v13  ;;  %v6360_v56 = vadd.f32 %v9093_v21, %v6327_v16  ;;  %v8500_v18 = vpop.eup %8499  ;;  %v6419_v41 = vadd.f32 1.0, %v8498_v14 }
 0x61a   :  { %8507 = vrcp.f32 %v6418_v15  ;;  %v6330_v19 = vpop.xlane.xlu1 %6329  ;;  %v8502_v20 = vpop.eup %8501 }
 0x61b   :  { %v6400_v42 = vmul.f32 1.442695, %v6375_v30  ;;  %v6376_v31 = vsub.f32 0.0, %v6360_v56  ;;  %v6361_v50 = vadd.f32 %v9093_v21, %v6330_v19  ;;  %6464 = vxpose.xlu0.b32.cont [3/16] (narrow) %v8500_v18, 8  ;;  %8509 = vpow2.f32 %v6398_v17  ;;  %v8504_v51 = vpop.eup %8503 }
 0x61c   :  { %8511 = vrcp.f32 %v6419_v41  ;;  %v6420_v44 = vadd.f32 1.0, %v8502_v20  ;;  %v8506_v22 = vpop.eup %8505 }
 0x61d   :  { %v6402_v43 = vmul.f32 1.442695, %v6376_v31  ;;  %v6377_v11 = vsub.f32 0.0, %v6361_v50  ;;  %8513 = vpow2.f32 %v6400_v42  ;;  %v6421_v52 = vadd.f32 1.0, %v8506_v22 }
 0x61f   :  { %6465 = vxpose.xlu0.b32.cont [4/16] (narrow) %v8504_v51, 8  ;;  %8515 = vpow2.f32 %v6402_v43  ;;  %v6404_v32 = vmul.f32 1.442695, %v6377_v11 }
 0x620   :  { %8517 = vrcp.f32 %v6420_v44 }
 0x621   :  { %8519 = vpow2.f32 %v6404_v32 }
 0x622   :  { %8521 = vrcp.f32 %v6421_v52 }
 0x624   :  { %v8508_v23 = vpop.eup %8507  ;;  %v6333_v53 = vpop.xlane.xlu0 %6332 }
 0x625   :  { %6466 = vxpose.xlu0.b32.cont [5/16] (narrow) %v8508_v23, 8  ;;  %v6362_v29 = vadd.f32 %v9093_v21, %v6333_v53  ;;  %v8510_v24 = vpop.eup %8509 }
 0x626   :  { %v6336_v54 = vpop.xlane.xlu1 %6335  ;;  %v8512_v58 = vpop.eup %8511  ;;  %v6422_v59 = vadd.f32 1.0, %v8510_v24 }
 0x627   :  { %v6378_v57 = vsub.f32 0.0, %v6362_v29  ;;  %v6363_v45 = vadd.f32 %v9093_v21, %v6336_v54  ;;  %v8514_v60 = vpop.eup %8513 }
 0x628   :  { %v6339_v46 = vpop.xlane.xlu0 %6338  ;;  %8523 = vrcp.f32 %v6422_v59  ;;  %v6423_v48 = vadd.f32 1.0, %v8514_v60 }
 0x629   :  { %v6406_v33 = vmul.f32 1.442695, %v6378_v57  ;;  %v6379_v49 = vsub.f32 0.0, %v6363_v45  ;;  %6467 = vxpose.xlu0.b32.cont [6/16] (narrow) %v8512_v58, 8  ;;  %v6364_v47 = vadd.f32 %v9093_v21, %v6339_v46  ;;  %v8516_v61 = vpop.eup %8515 }
 0x62a   :  { %v6342_v55 = vpop.xlane.xlu1 %6341  ;;  %v8518_v63 = vpop.eup %8517  ;;  %v6424_v0 = vadd.f32 1.0, %v8516_v61 }
 0x62b   :  { %8525 = vpow2.f32 %v6406_v33  ;;  %v6408_v34 = vmul.f32 1.442695, %v6379_v49  ;;  %v6380_v62 = vsub.f32 0.0, %v6364_v47  ;;  %v6365_v25 = vadd.f32 %v9093_v21, %v6342_v55  ;;  %v8520_v36 = vpop.eup %8519 }
 0x62c   :  { %8527 = vrcp.f32 %v6423_v48  ;;  %v8522_v26 = vpop.eup %8521  ;;  %v6425_v3 = vadd.f32 1.0, %v8520_v36 }
 0x62d   :  { %v6410_v35 = vmul.f32 1.442695, %v6380_v62  ;;  %6468 = vxpose.xlu0.b32.cont [7/16] (narrow) %v8518_v63, 8  ;;  %v6381_v1 = vsub.f32 0.0, %v6365_v25  ;;  %8529 = vpow2.f32 %v6408_v34 }
 0x62f   :  { %8531 = vpow2.f32 %v6410_v35  ;;  %v6412_v2 = vmul.f32 1.442695, %v6381_v1 }
 0x630   :  { %8533 = vrcp.f32 %v6424_v0 }
 0x631   :  { %6469 = vxpose.xlu0.b32.cont [8/16] (narrow) %v8522_v26, 8  ;;  %8535 = vpow2.f32 %v6412_v2 }
 0x632   :  { %v8524_v4 = vpop.eup %8523  ;;  %8537 = vrcp.f32 %v6425_v3 }
 0x635   :  { %v8526_v27 = vpop.eup %8525  ;;  %6470 = vxpose.xlu0.b32.cont [9/16] (narrow) %v8524_v4, 8 }
 0x636   :  { %v6426_v5 = vadd.f32 1.0, %v8526_v27  ;;  %v8528_v21 = vpop.eup %8527 }
 0x637   :  { %v8530_v6 = vpop.eup %8529 }
 0x638   :  { %8539 = vrcp.f32 %v6426_v5  ;;  %v6427_v7 = vadd.f32 1.0, %v8530_v6 }
 0x639   :  { %6471 = vxpose.xlu0.b32.cont [10/16] (narrow) %v8528_v21, 8  ;;  %v8532_v37 = vpop.eup %8531 }
 0x63a   :  { %v8534_v28 = vpop.eup %8533  ;;  %8541 = vrcp.f32 %v6427_v7  ;;  %v6428_v8 = vadd.f32 1.0, %v8532_v37 }
 0x63b   :  { %v8536_v38 = vpop.eup %8535 }
 0x63c   :  { %v8538_v9 = vpop.eup %8537  ;;  %8543 = vrcp.f32 %v6428_v8  ;;  %v6429_v39 = vadd.f32 1.0, %v8536_v38 }
 0x63d   :  { %6472 = vxpose.xlu0.b32.cont [11/16] (narrow) %v8534_v28, 8 }
 0x63e   :  { %8545 = vrcp.f32 %v6429_v39 }
 0x641   :  { %6473 = vxpose.xlu0.b32.cont [12/16] (narrow) %v8538_v9, 8 }
 0x642   :  { %v8540_v10 = vpop.eup %8539 }
 0x644   :  { %v8542_v12 = vpop.eup %8541 }
 0x645   :  { %6474 = vxpose.xlu0.b32.cont [13/16] (narrow) %v8540_v10, 8 }
 0x646   :  { %v8544_v40 = vpop.eup %8543 }
 0x648   :  { %v8546_v13 = vpop.eup %8545 }
 0x649   :  { %6475 = vxpose.xlu0.b32.cont [14/16] (narrow) %v8542_v12, 8 }
 0x64d   :  { %6476 = vxpose.xlu0.b32.cont [15/16] (narrow) %v8544_v40, 8 }
 0x651   :  { %6477 = vxpose.xlu0.b32.end [16/16] (narrow) %v8546_v13, 8 }
 0x695   :  { %v6478_v14 = vpop.trf.xlu0 }
 0x696   :  { %6494 = vst [vmem:[#allocation15] sm:$0x1] %v6478_v14 }
 0x697   :  { %8712 = shalt.err (!%p8709_p4)
}
 0x698   :  { %s8713_s22 = scalar_lea.hbm %s9132_s9, 16 }
 0x699   :  { %p8714_p5 = scmp.ne.s32.totalorder %s9132_s9, %s8713_s22  ;;  %p8717_p6 = scmp.lt.u32.totalorder %s8713_s22, %s9132_s9 }
 0x69b   :  { %p8719_p7 = pnand %p8717_p6, %p8714_p5 }
 0x69d   :  { %8722 = shalt.err (!%p8719_p7)
}
 0x69e   :  { %6504 = dma.vmem_to_hbm [thread:$0]  %s6502_s16, 16, %s9132_s9, [#allocation5]  }
 0x69f   :  { %8731 = dma.done.wait [#allocation5], 16  }
 0x6a0   :  { %8732 = vsyncadd [#allocation5], 4294967280 }
 0x6a1   :  { %6508 = vsyncpa [#allocation4], 1 }
 0x6a2   :  { %6509 = vsyncpa [#allocation7], 1 }
 0x6a3   :  { %6510 = vsyncpa [#allocation10], 1 }
 0x6a4   :  { %6511 = vsyncpa [#allocation13], 1 }
 0x6a5   :  { %6512 = vsyncpa [#allocation5], 1 }

</bundles_post_ra>
